<compile_context>
chip_gen: v6e
topology: v6e:2x2x1
jax: 0.10.0
libtpu: 0.0.40
codegen_flags: <defaults>
</compile_context>

<pallas_src>
import math
from functools import partial

import jax
import jax.numpy as jnp
from jax.experimental import pallas as pl
from jax.experimental.pallas import tpu as pltpu


def _subpixel_kernel(x_ref, w_ref, b_ref, a_ref, o_ref, col_ref, *,
                     KH, KW, TH, W, Cin, r, taps_per_write, n_groups):
    """One (batch, row-tile) grid step: conv3x3 + bias + PReLU + PixelShuffle.

    x_ref  : (1, H+2, W+2, Cin)   bf16  padded input image (whole batch item)
    w_ref  : (Kp, Cout)           bf16  weights, K = (kh, kw, ci) zero-padded;
                                        Cout ordered (dy, dx, ci)
    b_ref  : (1, Cout)            f32   bias, Cout ordered (dy, dx, ci)
    a_ref  : (1,)                 f32   PReLU alpha (SMEM scalar)
    o_ref  : (TH, r, W, r*Cin)          shuffled output rows of this tile
    col_ref: (TH*W, Kp)           bf16  im2col scratch (VMEM)
    """
    t = pl.program_id(1)
    row0 = pl.multiple_of(t * TH, TH)

    # ---- im2col staging ----------------------------------------------------
    # 3 row-slab loads (one per kh); the three kw windows are sliced from each
    # slab in-register.  Taps are written in groups of `taps_per_write` so
    # every col_ref store is a full 128-lane, 128-aligned slab.
    slabs = [x_ref[0, pl.ds(row0 + kh, TH), :, :] for kh in range(KH)]  # (TH, W+2, Cin)
    patches = [slabs[kh][:, kw:kw + W, :]                                # (TH, W, Cin)
               for kh in range(KH) for kw in range(KW)]
    # Pad the tap list to fill the last group.  The matching weight rows are
    # zero, but the staged data must be finite (NaN * 0 == NaN), so use zeros.
    while len(patches) < n_groups * taps_per_write:
        patches.append(jnp.zeros_like(patches[0]))

    gw = taps_per_write * Cin                          # lane width of one group
    for g in range(n_groups):
        grp = patches[g * taps_per_write:(g + 1) * taps_per_write]
        blk = grp[0] if taps_per_write == 1 else jnp.concatenate(grp, axis=-1)
        col_ref[:, g * gw:(g + 1) * gw] = blk.reshape(TH * W, gw)

    # ---- conv: one MXU matmul with all taps folded into K (f32 accumulate) --
    acc = jnp.dot(col_ref[...], w_ref[...],
                  preferred_element_type=jnp.float32)        # (TH*W, Cout) f32

    # ---- fused epilogue: bias + PReLU (scalar alpha; exact pre-shuffle) -----
    acc = acc + b_ref[...]
    alpha = a_ref[0]
    acc = jnp.where(acc > 0, acc, alpha * acc)

    # ---- fused PixelShuffle store -------------------------------------------
    # Cout is ordered (dy, dx, ci): each dy-plane is a 128-aligned lane slice;
    # splitting (TH*W) -> (TH, W) is a free relabel, and stacking the r planes
    # on a new major axis gives the output block indexed [h, dy, w, dx*Cin+ci]
    # == shuffled pixel (h*r+dy, w*r+dx, ci).
    rc = r * Cin
    parts = [acc[:, dy * rc:(dy + 1) * rc].reshape(TH, W, rc) for dy in range(r)]
    shuffled = jnp.stack(parts, axis=1)                      # (TH, r, W, rc)
    o_ref[...] = shuffled.astype(o_ref.dtype)


def _choose_row_tile(N, H, W, Cin, r, Kp, out_bytes, vmem_budget=20 * 1024 * 1024):
    """Largest row tile (divisor of H) whose per-step buffers fit a budget
    sized conservatively for v7x's 64 MiB VMEM, keeping >= 2 grid steps so
    both v7x TensorCores stay busy."""
    rc = r * Cin

    def step_bytes(th):
        col = th * W * Kp * 2                       # im2col scratch (bf16)
        out = 2 * th * r * W * rc * out_bytes       # double-buffered out block
        return col + out

    divisors = [d for d in range(1, H + 1) if H % d == 0]
    fitting = [d for d in divisors if step_bytes(d) <= vmem_budget] or [1]
    th = max(fitting)
    if N * (H // th) < 2:                           # megacore: >= 2 grid units
        halves = [d for d in fitting if H // d >= 2]
        if halves:
            th = max(halves)
    return th


def subpixel_forward(x_nchw, w, b, alpha, *, scale, channels_last=True,
                     out_dtype=jnp.float32):
    """SubPixel forward.

    x_nchw: (N, C, H, W) f32; w: (3, 3, C, C*r*r) with PyTorch output-channel
    order ci*r*r + dy*r + dx on the last axis; b: (C*r*r,); alpha: scalar.

    Returns (N, H*r, W*r, C) if channels_last (recommended: one fewer full HBM
    pass), else (N, C, H*r, W*r) exactly like the PyTorch module.
    Set out_dtype=jnp.bfloat16 to halve output write bytes (helps v5e most).
    """
    r = int(math.isqrt(scale))
    assert r * r == scale, f"scale={scale} must be a perfect square"
    N, Cin, H, W = x_nchw.shape
    KH = KW = 3
    Cout = Cin * r * r
    assert (r * Cin) % 128 == 0, "fused shuffle store requires lane-dense r*Cin"

    # Pair adjacent taps when two Cin-blocks fill exactly one 128-lane group.
    taps = KH * KW
    taps_per_write = 2 if (2 * Cin) % 128 == 0 else 1
    n_groups = -(-taps // taps_per_write)            # ceil
    Kp = n_groups * taps_per_write * Cin             # 640 for Cin=64

    TH = _choose_row_tile(N, H, W, Cin, r, Kp,
                          out_bytes=jnp.dtype(out_dtype).itemsize)
    HT = H // TH
    rc = r * Cin

    # NCHW -> NHWC, bf16 for the MXU, "same" spatial padding by 1.
    x = jnp.transpose(x_nchw, (0, 2, 3, 1)).astype(jnp.bfloat16)
    xp = jnp.pad(x, ((0, 0), (1, 1), (1, 1), (0, 0)))

    # Weights: K rows ordered (kh, kw, ci), zero-padded to Kp; columns
    # re-ordered from PyTorch's (ci, dy, dx) to (dy, dx, ci) so the pixel
    # shuffle becomes lane-aligned slices in the kernel epilogue.
    w_perm = jnp.transpose(w.reshape(KH, KW, Cin, Cin, r, r),
                           (0, 1, 2, 4, 5, 3)).reshape(KH * KW * Cin, Cout)
    w2 = jnp.zeros((Kp, Cout), w.dtype).at[:KH * KW * Cin].set(w_perm)
    w2 = w2.astype(jnp.bfloat16)
    b2 = jnp.transpose(b.reshape(Cin, r, r), (1, 2, 0)).reshape(1, Cout)
    b2 = b2.astype(jnp.float32)
    a1 = jnp.asarray(alpha, jnp.float32).reshape(1)

    kernel = partial(_subpixel_kernel, KH=KH, KW=KW, TH=TH, W=W, Cin=Cin, r=r,
                     taps_per_write=taps_per_write, n_groups=n_groups)

    y = pl.pallas_call(
        kernel,
        out_shape=jax.ShapeDtypeStruct((N * H, r, W, rc), out_dtype),
        grid_spec=pltpu.PrefetchScalarGridSpec(
            num_scalar_prefetch=0,
            grid=(N, HT),
            in_specs=[
                # Whole padded image of batch item n; resident across row tiles.
                pl.BlockSpec((1, H + 2, W + 2, Cin), lambda n, t: (n, 0, 0, 0)),
                pl.BlockSpec((Kp, Cout), lambda n, t: (0, 0)),
                pl.BlockSpec((1, Cout), lambda n, t: (0, 0)),
                pl.BlockSpec(memory_space=pltpu.MemorySpace.SMEM),   # alpha
            ],
            out_specs=pl.BlockSpec((TH, r, W, rc),
                                   lambda n, t: (n * HT + t, 0, 0, 0)),
            scratch_shapes=[pltpu.VMEM((TH * W, Kp), jnp.bfloat16)],
        ),
        compiler_params=pltpu.CompilerParams(
            dimension_semantics=("parallel", "parallel"),
            vmem_limit_bytes=64 * 1024 * 1024),
    )(xp, w2, b2, a1)

    # Free metadata reshape: (N*H, r, W, r*Cin) is row-major identical to
    # (N, H, r, W, r, Cin), so collapsing adjacent dims gives upscaled NHWC.
    y = y.reshape(N, H * r, W * r, Cin)
    if channels_last:
        return y
    return jnp.transpose(y, (0, 3, 1, 2))           # strict PyTorch NCHW layout


def subpixel_reference(x_nchw, w, b, alpha, *, scale):
    """Pure-JAX (XLA) reference mirroring the PyTorch module, with the same
    bf16 matmul-input / f32 accumulation numerics as the Pallas kernel."""
    r = int(math.isqrt(scale))
    N, Cin, H, W = x_nchw.shape
    Cout = Cin * r * r
    wt = jnp.transpose(w, (3, 2, 0, 1)).astype(jnp.bfloat16)   # OIHW
    y = jax.lax.conv_general_dilated(
        x_nchw.astype(jnp.bfloat16), wt,
        window_strides=(1, 1), padding=((1, 1), (1, 1)),
        dimension_numbers=("NCHW", "OIHW", "NCHW"),
        preferred_element_type=jnp.float32)
    y = y + b.reshape(1, Cout, 1, 1)
    # nn.PixelShuffle(r)
    y = y.reshape(N, Cin, r, r, H, W)
    y = jnp.transpose(y, (0, 1, 4, 2, 5, 3))
    y = y.reshape(N, Cin, H * r, W * r)
    # nn.PReLU() (single scalar alpha), applied after the shuffle as in PyTorch.
    return jnp.where(y > 0, y, alpha * y)


if __name__ == "__main__":
    # SubPixel(channel_in=64, scale=4)  ->  r = 2, conv 64 -> 256 channels.
    channel_in, scale = 64, 4
    r = int(math.isqrt(scale))
    N, H, W = 2, 16, 16

    key = jax.random.PRNGKey(0)
    kx, kw, kb = jax.random.split(key, 3)
    x = jax.random.normal(kx, (N, channel_in, H, W), jnp.float32)
    fan_in = 3 * 3 * channel_in
    w = jax.random.normal(kw, (3, 3, channel_in, channel_in * r * r),
                          jnp.float32) / math.sqrt(fan_in)
    b = 0.01 * jax.random.normal(kb, (channel_in * r * r,), jnp.float32)
    alpha = jnp.float32(0.25)              # nn.PReLU() default init

    fwd = jax.jit(partial(subpixel_forward, scale=scale, channels_last=True))
    out = jax.block_until_ready(fwd(x, w, b, alpha))

    assert out.shape == (N, H * r, W * r, channel_in), out.shape
    assert bool(jnp.all(jnp.isfinite(out)))

    ref_nchw = subpixel_reference(x, w, b, alpha, scale=scale)
    ref = jnp.transpose(ref_nchw, (0, 2, 3, 1))        # NHWC for comparison
    assert bool(jnp.allclose(out, ref, atol=1e-2, rtol=1e-2)), float(
        jnp.max(jnp.abs(out - ref)))

    print("KERNEL_OK")
</pallas_src>

<mosaic_0001>
module attributes {stable_mosaic.version = 11 : i64} {
  func.func @_subpixel_kernel(%arg0: i32, %arg1: i32, %arg2: memref<1x18x18x64xbf16, #tpu.memory_space<vmem>>, %arg3: memref<640x256xbf16, #tpu.memory_space<vmem>>, %arg4: memref<1x256xf32, #tpu.memory_space<vmem>>, %arg5: memref<1xf32, #tpu.memory_space<smem>>, %arg6: memref<16x2x16x128xf32, #tpu.memory_space<vmem>>, %arg7: memref<256x640xbf16, #tpu.memory_space<vmem>>) attributes {dimension_semantics = [#tpu.dimension_semantics<parallel>, #tpu.dimension_semantics<parallel>], iteration_bounds = array<i64: 2, 1>, scalar_prefetch = 0 : i64, scratch_operands = 1 : i64, tpu.core_type = #tpu.core_type<tc>, window_params = [{transform_indices = @transform_0, window_bounds = array<i64: 1, 18, 18, 64>}, {pipeline_mode = #tpu.pipeline_mode<synchronous>, transform_indices = @transform_1, window_bounds = array<i64: 640, 256>}, {pipeline_mode = #tpu.pipeline_mode<synchronous>, transform_indices = @transform_2, window_bounds = array<i64: 1, 256>}, {transform_indices = @transform_3, window_bounds = array<i64: 1>}, {transform_indices = @transform_4, window_bounds = array<i64: 16, 2, 16, 128>}]} {
    %c16_i32 = arith.constant 16 : i32
    %0 = arith.muli %arg1, %c16_i32 : i32
    %1 = tpu.assume_multiple %0, 16 : i32
    %c0_i32 = arith.constant 0 : i32
    %2 = arith.addi %1, %c0_i32 : i32
    %c0 = arith.constant 0 : index
    %3 = arith.index_cast %2 : i32 to index
    %c0_0 = arith.constant 0 : index
    %c0_1 = arith.constant 0 : index
    %4 = vector.load %arg2[%c0, %3, %c0_0, %c0_1] : memref<1x18x18x64xbf16, #tpu.memory_space<vmem>>, vector<1x16x18x64xbf16>
    %5 = vector.shape_cast %4 : vector<1x16x18x64xbf16> to vector<16x18x64xbf16>
    %c1_i32 = arith.constant 1 : i32
    %6 = arith.addi %1, %c1_i32 : i32
    %c0_2 = arith.constant 0 : index
    %7 = arith.index_cast %6 : i32 to index
    %c0_3 = arith.constant 0 : index
    %c0_4 = arith.constant 0 : index
    %8 = vector.load %arg2[%c0_2, %7, %c0_3, %c0_4] : memref<1x18x18x64xbf16, #tpu.memory_space<vmem>>, vector<1x16x18x64xbf16>
    %9 = vector.shape_cast %8 : vector<1x16x18x64xbf16> to vector<16x18x64xbf16>
    %c2_i32 = arith.constant 2 : i32
    %10 = arith.addi %1, %c2_i32 : i32
    %c0_5 = arith.constant 0 : index
    %11 = arith.index_cast %10 : i32 to index
    %c0_6 = arith.constant 0 : index
    %c0_7 = arith.constant 0 : index
    %12 = vector.load %arg2[%c0_5, %11, %c0_6, %c0_7] : memref<1x18x18x64xbf16, #tpu.memory_space<vmem>>, vector<1x16x18x64xbf16>
    %13 = vector.shape_cast %12 : vector<1x16x18x64xbf16> to vector<16x18x64xbf16>
    %14 = vector.extract_strided_slice %5 {offsets = [0, 0, 0], sizes = [16, 16, 64], strides = [1, 1, 1]} : vector<16x18x64xbf16> to vector<16x16x64xbf16>
    %15 = vector.extract_strided_slice %5 {offsets = [0, 1, 0], sizes = [16, 16, 64], strides = [1, 1, 1]} : vector<16x18x64xbf16> to vector<16x16x64xbf16>
    %16 = vector.extract_strided_slice %5 {offsets = [0, 2, 0], sizes = [16, 16, 64], strides = [1, 1, 1]} : vector<16x18x64xbf16> to vector<16x16x64xbf16>
    %17 = vector.extract_strided_slice %9 {offsets = [0, 0, 0], sizes = [16, 16, 64], strides = [1, 1, 1]} : vector<16x18x64xbf16> to vector<16x16x64xbf16>
    %18 = vector.extract_strided_slice %9 {offsets = [0, 1, 0], sizes = [16, 16, 64], strides = [1, 1, 1]} : vector<16x18x64xbf16> to vector<16x16x64xbf16>
    %19 = vector.extract_strided_slice %9 {offsets = [0, 2, 0], sizes = [16, 16, 64], strides = [1, 1, 1]} : vector<16x18x64xbf16> to vector<16x16x64xbf16>
    %20 = vector.extract_strided_slice %13 {offsets = [0, 0, 0], sizes = [16, 16, 64], strides = [1, 1, 1]} : vector<16x18x64xbf16> to vector<16x16x64xbf16>
    %21 = vector.extract_strided_slice %13 {offsets = [0, 1, 0], sizes = [16, 16, 64], strides = [1, 1, 1]} : vector<16x18x64xbf16> to vector<16x16x64xbf16>
    %22 = vector.extract_strided_slice %13 {offsets = [0, 2, 0], sizes = [16, 16, 64], strides = [1, 1, 1]} : vector<16x18x64xbf16> to vector<16x16x64xbf16>
    %cst = arith.constant 0.000000e+00 : bf16
    %23 = vector.broadcast %cst : bf16 to vector<16x16x64xbf16>
    %24 = tpu.concatenate %14, %15 in 2 : vector<16x16x64xbf16>, vector<16x16x64xbf16> -> vector<16x16x128xbf16>
    %25 = vector.shape_cast %24 : vector<16x16x128xbf16> to vector<256x128xbf16>
    %c0_8 = arith.constant 0 : index
    %c0_9 = arith.constant 0 : index
    %26 = vector.load %arg7[%c0_8, %c0_9] : memref<256x640xbf16, #tpu.memory_space<vmem>>, vector<256x128xbf16>
    tpu.vector_store %arg7[%c0_8, %c0_9], %25 {strides = array<i32>} : memref<256x640xbf16, #tpu.memory_space<vmem>>, vector<256x128xbf16>,
    %27 = tpu.concatenate %16, %17 in 2 : vector<16x16x64xbf16>, vector<16x16x64xbf16> -> vector<16x16x128xbf16>
    %28 = vector.shape_cast %27 : vector<16x16x128xbf16> to vector<256x128xbf16>
    %c0_10 = arith.constant 0 : index
    %c128 = arith.constant 128 : index
    %29 = vector.load %arg7[%c0_10, %c128] : memref<256x640xbf16, #tpu.memory_space<vmem>>, vector<256x128xbf16>
    tpu.vector_store %arg7[%c0_10, %c128], %28 {strides = array<i32>} : memref<256x640xbf16, #tpu.memory_space<vmem>>, vector<256x128xbf16>,
    %30 = tpu.concatenate %18, %19 in 2 : vector<16x16x64xbf16>, vector<16x16x64xbf16> -> vector<16x16x128xbf16>
    %31 = vector.shape_cast %30 : vector<16x16x128xbf16> to vector<256x128xbf16>
    %c0_11 = arith.constant 0 : index
    %c256 = arith.constant 256 : index
    %32 = vector.load %arg7[%c0_11, %c256] : memref<256x640xbf16, #tpu.memory_space<vmem>>, vector<256x128xbf16>
    tpu.vector_store %arg7[%c0_11, %c256], %31 {strides = array<i32>} : memref<256x640xbf16, #tpu.memory_space<vmem>>, vector<256x128xbf16>,
    %33 = tpu.concatenate %20, %21 in 2 : vector<16x16x64xbf16>, vector<16x16x64xbf16> -> vector<16x16x128xbf16>
    %34 = vector.shape_cast %33 : vector<16x16x128xbf16> to vector<256x128xbf16>
    %c0_12 = arith.constant 0 : index
    %c384 = arith.constant 384 : index
    %35 = vector.load %arg7[%c0_12, %c384] : memref<256x640xbf16, #tpu.memory_space<vmem>>, vector<256x128xbf16>
    tpu.vector_store %arg7[%c0_12, %c384], %34 {strides = array<i32>} : memref<256x640xbf16, #tpu.memory_space<vmem>>, vector<256x128xbf16>,
    %36 = tpu.concatenate %22, %23 in 2 : vector<16x16x64xbf16>, vector<16x16x64xbf16> -> vector<16x16x128xbf16>
    %37 = vector.shape_cast %36 : vector<16x16x128xbf16> to vector<256x128xbf16>
    %c0_13 = arith.constant 0 : index
    %c512 = arith.constant 512 : index
    %38 = vector.load %arg7[%c0_13, %c512] : memref<256x640xbf16, #tpu.memory_space<vmem>>, vector<256x128xbf16>
    tpu.vector_store %arg7[%c0_13, %c512], %37 {strides = array<i32>} : memref<256x640xbf16, #tpu.memory_space<vmem>>, vector<256x128xbf16>,
    %c0_14 = arith.constant 0 : index
    %c0_15 = arith.constant 0 : index
    %39 = vector.load %arg7[%c0_14, %c0_15] : memref<256x640xbf16, #tpu.memory_space<vmem>>, vector<256x640xbf16>
    %c0_16 = arith.constant 0 : index
    %c0_17 = arith.constant 0 : index
    %40 = vector.load %arg3[%c0_16, %c0_17] : memref<640x256xbf16, #tpu.memory_space<vmem>>, vector<640x256xbf16>
    %cst_18 = arith.constant dense<0.000000e+00> : vector<256x256xf32>
    %41 = tpu.matmul %39, %40, %cst_18 {dimension_numbers = #tpu.dot_dimension_numbers<[1], [0], [0], [1], [0, 0, 1, 1], [], []>} : vector<256x640xbf16>, vector<640x256xbf16>, vector<256x256xf32> -> vector<256x256xf32>
    %c0_19 = arith.constant 0 : index
    %c0_20 = arith.constant 0 : index
    %42 = vector.load %arg4[%c0_19, %c0_20] : memref<1x256xf32, #tpu.memory_space<vmem>>, vector<1x256xf32>
    %43 = vector.broadcast %42 : vector<1x256xf32> to vector<256x256xf32>
    %44 = arith.addf %41, %43 : vector<256x256xf32>
    %c0_21 = arith.constant 0 : index
    %45 = memref.load %arg5[%c0_21] : memref<1xf32, #tpu.memory_space<smem>>
    %cst_22 = arith.constant 0.000000e+00 : f32
    %46 = vector.broadcast %cst_22 : f32 to vector<256x256xf32>
    %47 = arith.cmpf ogt, %44, %46 : vector<256x256xf32>
    %48 = vector.broadcast %45 : f32 to vector<256x256xf32>
    %49 = arith.mulf %48, %44 : vector<256x256xf32>
    %50 = arith.select %47, %44, %49 : vector<256x256xi1>, vector<256x256xf32>
    %51 = vector.extract_strided_slice %50 {offsets = [0, 0], sizes = [256, 128], strides = [1, 1]} : vector<256x256xf32> to vector<256x128xf32>
    %52 = vector.shape_cast %51 : vector<256x128xf32> to vector<16x16x128xf32>
    %53 = vector.extract_strided_slice %50 {offsets = [0, 128], sizes = [256, 128], strides = [1, 1]} : vector<256x256xf32> to vector<256x128xf32>
    %54 = vector.shape_cast %53 : vector<256x128xf32> to vector<16x16x128xf32>
    %55 = vector.shape_cast %52 : vector<16x16x128xf32> to vector<16x1x16x128xf32>
    %56 = vector.shape_cast %54 : vector<16x16x128xf32> to vector<16x1x16x128xf32>
    %57 = tpu.concatenate %55, %56 in 1 : vector<16x1x16x128xf32>, vector<16x1x16x128xf32> -> vector<16x2x16x128xf32>
    %c0_23 = arith.constant 0 : index
    %c0_24 = arith.constant 0 : index
    %c0_25 = arith.constant 0 : index
    %c0_26 = arith.constant 0 : index
    %58 = vector.load %arg6[%c0_23, %c0_24, %c0_25, %c0_26] : memref<16x2x16x128xf32, #tpu.memory_space<vmem>>, vector<16x2x16x128xf32>
    tpu.vector_store %arg6[%c0_23, %c0_24, %c0_25, %c0_26], %57 {strides = array<i32>} : memref<16x2x16x128xf32, #tpu.memory_space<vmem>>, vector<16x2x16x128xf32>,
    return
  }
  func.func @transform_0(%arg0: i32, %arg1: i32) -> (i32, i32, i32, i32) {
    %c0_i32 = arith.constant 0 : i32
    %c0_i32_0 = arith.constant 0 : i32
    %c0_i32_1 = arith.constant 0 : i32
    %c0_i32_2 = arith.constant 0 : i32
    return %arg0, %c0_i32, %c0_i32_0, %c0_i32_1 : i32, i32, i32, i32
  }
  func.func @transform_1(%arg0: i32, %arg1: i32) -> (i32, i32) {
    %c0_i32 = arith.constant 0 : i32
    %c0_i32_0 = arith.constant 0 : i32
    %c0_i32_1 = arith.constant 0 : i32
    return %c0_i32, %c0_i32_0 : i32, i32
  }
  func.func @transform_2(%arg0: i32, %arg1: i32) -> (i32, i32) {
    %c0_i32 = arith.constant 0 : i32
    %c0_i32_0 = arith.constant 0 : i32
    %c0_i32_1 = arith.constant 0 : i32
    return %c0_i32, %c0_i32_0 : i32, i32
  }
  func.func @transform_3(%arg0: i32, %arg1: i32) -> i32 {
    %c0_i32 = arith.constant 0 : i32
    %c0_i32_0 = arith.constant 0 : i32
    return %c0_i32 : i32
  }
  func.func @transform_4(%arg0: i32, %arg1: i32) -> (i32, i32, i32, i32) {
    %c1_i32 = arith.constant 1 : i32
    %0 = arith.muli %arg0, %c1_i32 : i32
    %1 = arith.addi %0, %arg1 : i32
    %c0_i32 = arith.constant 0 : i32
    %c0_i32_0 = arith.constant 0 : i32
    %c0_i32_1 = arith.constant 0 : i32
    %c0_i32_2 = arith.constant 0 : i32
    return %1, %c0_i32, %c0_i32_0, %c0_i32_1 : i32, i32, i32, i32
  }
}

</mosaic_0001>

<bundles_post_ra>
// kernel: subpixel_forward.1
= control target key start
LH: loop header
LB: loop body
LE: loop exit
PB: predicated region body
PF: predicated region fallthrough
CT: control target
= control target key end

     0   :  { %s5721_s17 = smov 0   ;;  %s5723_s18 = smov 0   ;;  %s7115_s0 = inlined_call_operand.vmem [shape: bf16[2,18,18,64], index: 0, kind: input, shape index: {}]   ;;  %s7116_s1 = inlined_call_operand.vmem [shape: bf16[640,256], index: 1, kind: input, shape index: {}]   ;;  %s7117_s2 = inlined_call_operand.vmem [shape: f32[1,256], index: 2, kind: input, shape index: {}]   ;;  %s7118_s3 = inlined_call_operand.<no memory space> [shape: f32[1], index: 3, kind: input, shape index: {}]   ;;  %s7119_s4 = inlined_call_operand.vmem [shape: f32[32,2,16,128], index: 4, kind: output, shape index: {}]  }
   0x1   :  { %9 = sst [smem:[#allocation3]] %s7118_s3  ;;  %s5725_s19 = smov 0  }
   0x2 LB: > { %s27_s3 = sadd.s32 1, %s5685_s18  ;;  %p4673_p0 = scmp.ge.s32.totalorder %s5689_s19, 1  ;;  %s5689_s19 = sphi %s5725_s19, %s15_s19   ;;  %s5685_s18 = sphi %s5723_s18, %s7161_s18   ;;  %s5681_s17 = sphi %s5721_s17, %s7160_s17  }
   0x3   : > { %p29_p1 = scmp.ge.s32.totalorder %s27_s3, 2  ;;  %p177_p2 = scmp.lt.s32.totalorder %s5689_s19, 3 }
   0x5   : > { %s7163_s3 = smov (%p29_p1, %s27_s3), 0  ;;  %p178_p3 = pnand %p4673_p0, %p177_p2 }
   0x7   : > { %181 = sbr.rel (%p178_p3) target bundleno = 572 (0x23c), region = 36 }
   0xc   : > { %p205_p4 = scmp.lt.s32.totalorder %s5681_s17, 1  ;;  %v5301_v0 = vld [vmem:[%s7116_s1 + $0x74] ss:$8 sps:$4 sm:$0xff]   ;;  %v5303_v1 = vld [vmem:[%s7116_s1 + $0x70] ss:$8 sps:$4 sm:$0xff]   ;;  %s5691_s15 = smov 64  }
   0xd   : > { %v5307_v2 = vld [vmem:[%s7116_s1 + $0x64] ss:$8 sps:$4 sm:$0xff]   ;;  %5193 = vmatprep.subr.bf16.mxu1 %v5301_v0  ;;  %3752 = vmatprep.subr.bf16.mxu0 %v5301_v0  ;;  %v5309_v3 = vld [vmem:[%s7116_s1 + $0x60] ss:$8 sps:$4 sm:$0xff]   ;;  %v5310_v4 = vld [vmem:[%s7116_s1 + $0x54] ss:$8 sps:$4 sm:$0xff]  }
   0xe   : > { %s206_s24 = scalar_select %p205_p4, %s5681_s17, 1  ;;  %5209 = vmatpush1.bf16.msra.mxu1 %v5303_v1  ;;  %3753 = vmatpush1.bf16.msra.mxu0 %v5303_v1  ;;  %vm504_vm0 = vsmask.f32 7424  ;;  %v5312_v5 = vld [vmem:[%s7116_s1 + $0x50] ss:$8 sps:$4 sm:$0xff]   ;;  %vm729_vm1 = vcmask 523264  }
   0xf   : > { %5194 = vmatprep.subr.bf16.mxu1 %v5307_v2  ;;  %3754 = vmatprep.subr.bf16.mxu0 %v5307_v2  ;;  %v5316_v7 = vld [vmem:[%s7116_s1 + $0x44] ss:$8 sps:$4 sm:$0xff]   ;;  %v5318_v13 = vld [vmem:[%s7116_s1 + $0x40] ss:$8 sps:$4 sm:$0xff]   ;;  %v5319_v16 = vld [vmem:[%s7116_s1 + $0x34] ss:$8 sps:$4 sm:$0xff]  }
  0x10   : > { %s5225_s27 = smul.u32 216, %s206_s24  ;;  %vm1114_vm2 = vcmask 1046528   ;;  %s4675_s12 = sshll.u32 %s5681_s17, 4 }
  0x11   : > { %p212_p5 = scmp.lt.s32.totalorder %s4675_s12, 31  ;;  %s4331_s13 = sld [smem:[#allocation3]] }
  0x12   : > { %s5761_s8 = scalar_lea.vmem %s7115_s0, %s5225_s27  ;;  %5210 = vmatpush1.bf16.msra.mxu1 %v5309_v3  ;;  %3755 = vmatpush1.bf16.msra.mxu0 %v5309_v3 }
  0x13   : > { %v5252_v6 = vld [vmem:[%s5761_s8 + $0x6c] sm:$0xff]   ;;  %v5254_v10 = vld [vmem:[%s5761_s8 + $0x60] sm:$0xff]   ;;  %5195 = vmatprep.subr.bf16.mxu1 %v5310_v4  ;;  %3756 = vmatprep.subr.bf16.mxu0 %v5310_v4  ;;  %v5255_v12 = vld [vmem:[%s5761_s8 + $0x68] ss:$0 sps:$4 sm:$0x11]   ;;  %s7165_s12 = smov (!%p212_p5, %s4675_s12), 31 }
  0x14   : > { %v5771_v8 = vld [vmem:[%s5761_s8 + $0xc] sm:$0xff]   ;;  %v994_v9 = vrot.slane %v5252_v6, 7  ;;  %v602_v14 = vshrl.u32 %v5254_v10, 16  ;;  %v604_v15 = vshll.u32 %v5254_v10, 16  ;;  %v609_v17 = vshll.u32 %v5255_v12, 16  ;;  %v5256_v18 = vld [vmem:[%s5761_s8 + $0x78] sm:$0xff]  }
  0x15   : > { %v986_v11 = vrot.slane %v5771_v8, 7  ;;  %v5257_v20 = vld [vmem:[%s5761_s8] sm:$0xff]   ;;  %v995_v22 = vrot.slane %v5256_v18, 7  ;;  %v5258_v23 = vld [vmem:[%s5761_s8 + $0x8] ss:$0 sps:$4 sm:$0x11]  }
  0x16   : > { %1018 = vrot.lane.b32.xlu0 %v994_v9, %s5691_s15  ;;  %5211 = vmatpush1.bf16.msra.mxu1 %v5312_v5  ;;  %v606_v19 = vrot.slane %v604_v15, 1  ;;  %v611_v21 = vrot.slane %v609_v17, 1  ;;  %v5259_v24 = vld [vmem:[%s5761_s8 + $0x6c] sm:$0xff]   ;;  %v506_v26 = vshrl.u32 %v5257_v20, 16  ;;  %v508_v27 = vshll.u32 %v5257_v20, 16  ;;  %v5791_v34 = vld [vmem:[%s5761_s8 + $0x18] sm:$0xff]  }
  0x17   : > { %3757 = vmatpush1.bf16.msra.mxu0 %v5312_v5  ;;  %5196 = vmatprep.subr.bf16.mxu1 %v5316_v7  ;;  %v513_v28 = vshll.u32 %v5258_v23, 16  ;;  %v5260_v29 = vld [vmem:[%s5761_s8 + $0x74] ss:$0 sps:$4 sm:$0x11]   ;;  %v614_v30 = vshrl.u32 %v5259_v24, 16  ;;  %v616_v31 = vshll.u32 %v5259_v24, 16 }
  0x18   : > { %3758 = vmatprep.subr.bf16.mxu0 %v5316_v7  ;;  %v607_v25 = vor.u32 %v606_v19, %v602_v14  ;;  %v510_v33 = vrot.slane %v508_v27, 1  ;;  %v621_v37 = vshll.u32 %v5260_v29, 16  ;;  %v5262_v38 = vld [vmem:[%s5761_s8 + $0x84] sm:$0xff]   ;;  %v987_v40 = vrot.slane %v5791_v34, 7  ;;  %v5263_v41 = vld [vmem:[%s5761_s8 + $0xc] sm:$0xff]   ;;  %v5265_v49 = vld [vmem:[%s5761_s8 + $0x78] sm:$0xff]  }
  0x19   : > { %v515_v35 = vrot.slane %v513_v28, 1  ;;  %v618_v36 = vrot.slane %v616_v31, 1  ;;  %v996_v44 = vrot.slane %v5262_v38, 7  ;;  %v5264_v46 = vld [vmem:[%s5761_s8 + $0x14] ss:$0 sps:$4 sm:$0x11]  }
  0x1a   : > { %1002 = vrot.lane.b32.xlu0 %v986_v11, %s5691_s15  ;;  %5212 = vmatpush1.bf16.msra.mxu1 %v5318_v13  ;;  %v612_v32 = vsel %vm504_vm0, %v607_v25, %v611_v21  ;;  %v511_v39 = vor.u32 %v510_v33, %v506_v26  ;;  %v623_v43 = vrot.slane %v621_v37, 1  ;;  %v518_v47 = vshrl.u32 %v5263_v41, 16  ;;  %v5266_v53 = vld [vmem:[%s5761_s8 + $0x80] ss:$0 sps:$4 sm:$0x11]   ;;  %v5806_v56 = vld [vmem:[%s5761_s8 + $0x24] sm:$0xff]  }
  0x1b   : > { %3759 = vmatpush1.bf16.msra.mxu0 %v5318_v13  ;;  %5197 = vmatprep.subr.bf16.mxu1 %v5319_v16  ;;  %v619_v42 = vor.u32 %v618_v36, %v614_v30  ;;  %v520_v48 = vshll.u32 %v5263_v41, 16  ;;  %v525_v52 = vshll.u32 %v5264_v46, 16  ;;  %v626_v54 = vshrl.u32 %v5265_v49, 16  ;;  %v5268_v62 = vld [vmem:[%s5761_s8 + $0x90] sm:$0xff]   ;;  %v5269_v63 = vld [vmem:[%s5761_s8 + $0x18] sm:$0xff]   ;;  %v5271_v2 = vld [vmem:[%s5761_s8 + $0x84] sm:$0xff]  }
  0x1c   : > { %3760 = vmatprep.subr.bf16.mxu0 %v5319_v16  ;;  %713 = vrot.lane.b32.xlu1 %v612_v32, %s5691_s15  ;;  %v516_v45 = vsel %vm504_vm0, %v511_v39, %v515_v35  ;;  %v628_v55 = vshll.u32 %v5265_v49, 16  ;;  %v633_v59 = vshll.u32 %v5266_v53, 16  ;;  %v988_v61 = vrot.slane %v5806_v56, 7  ;;  %v5270_v5 = vld [vmem:[%s5761_s8 + $0x20] ss:$0 sps:$4 sm:$0x11]  }
  0x1d   : > { %v624_v50 = vsel %vm504_vm0, %v619_v42, %v623_v43  ;;  %v522_v51 = vrot.slane %v520_v48, 1  ;;  %v527_v58 = vrot.slane %v525_v52, 1  ;;  %v997_v4 = vrot.slane %v5268_v62, 7  ;;  %v5272_v12 = vld [vmem:[%s5761_s8 + $0x8c] ss:$0 sps:$4 sm:$0x11]  }
  0x1e   : > { %1020 = vrot.lane.b32.xlu0 %v995_v22, %s5691_s15  ;;  %v630_v60 = vrot.slane %v628_v55, 1  ;;  %v635_v1 = vrot.slane %v633_v59, 1  ;;  %v530_v6 = vshrl.u32 %v5269_v63, 16  ;;  %v532_v7 = vshll.u32 %v5269_v63, 16  ;;  %v5821_v15 = vld [vmem:[%s5761_s8 + $0x30] sm:$0xff]   ;;  %v5274_v21 = vld [vmem:[%s5761_s8 + $0x9c] sm:$0xff]  }
  0x1f   : > { %v523_v57 = vor.u32 %v522_v51, %v518_v47  ;;  %v537_v11 = vshll.u32 %v5270_v5, 16  ;;  %v638_v13 = vshrl.u32 %v5271_v2, 16  ;;  %v640_v14 = vshll.u32 %v5271_v2, 16  ;;  %v5275_v22 = vld [vmem:[%s5761_s8 + $0x24] sm:$0xff]   ;;  %v5277_v24 = vld [vmem:[%s5761_s8 + $0x90] sm:$0xff]   ;;  %v5836_v42 = vld [vmem:[%s5761_s8 + $0x3c] sm:$0xff]  }
  0x20   : > { %697 = vrot.lane.b32.xlu1 %v516_v45, %s5691_s15  ;;  %v631_v3 = vor.u32 %v630_v60, %v626_v54  ;;  %v534_v10 = vrot.slane %v532_v7, 1  ;;  %v645_v18 = vshll.u32 %v5272_v12, 16  ;;  %v989_v20 = vrot.slane %v5821_v15, 7  ;;  %v5276_v27 = vld [vmem:[%s5761_s8 + $0x2c] ss:$0 sps:$4 sm:$0x11]  }
  0x21   : > { %v528_v0 = vsel %vm504_vm0, %v523_v57, %v527_v58  ;;  %v539_v17 = vrot.slane %v537_v11, 1  ;;  %v642_v19 = vrot.slane %v640_v14, 1  ;;  %v542_v28 = vshrl.u32 %v5275_v22, 16  ;;  %v5278_v35 = vld [vmem:[%s5761_s8 + $0x98] ss:$0 sps:$4 sm:$0x11]  }
  0x22   : > { %715 = vrot.lane.b32.xlu0 %v624_v50, %s5691_s15  ;;  %v636_v9 = vsel %vm504_vm0, %v631_v3, %v635_v1  ;;  %v535_v16 = vor.u32 %v534_v10, %v530_v6  ;;  %v647_v23 = vrot.slane %v645_v18, 1  ;;  %v544_v29 = vshll.u32 %v5275_v22, 16  ;;  %v5281_v43 = vld [vmem:[%s5761_s8 + $0x30] sm:$0xff]   ;;  %v5283_v45 = vld [vmem:[%s5761_s8 + $0x9c] sm:$0xff]   ;;  %v5280_v47 = vld [vmem:[%s5761_s8 + $0xa8] sm:$0xff]   ;;  %s5192_s17 = sshll.u32 %s7165_s12, 5 }
  0x23   : > { %v643_v26 = vor.u32 %v642_v19, %v638_v13  ;;  %v998_v31 = vrot.slane %v5274_v21, 7  ;;  %v549_v33 = vshll.u32 %v5276_v27, 16  ;;  %v650_v36 = vshrl.u32 %v5277_v24, 16  ;;  %v5282_v48 = vld [vmem:[%s5761_s8 + $0x38] ss:$0 sps:$4 sm:$0x11]   ;;  %s6886_s20 = scalar_lea.vmem %s7119_s4, %s5192_s17 }
  0x24   : > { %1004 = vrot.lane.b32.xlu1 %v987_v40, %s5691_s15  ;;  %v540_v25 = vsel %vm504_vm0, %v535_v16, %v539_v17  ;;  %v546_v32 = vrot.slane %v544_v29, 1  ;;  %v652_v37 = vshll.u32 %v5277_v24, 16  ;;  %v657_v40 = vshll.u32 %v5278_v35, 16  ;;  %v5284_v57 = vld [vmem:[%s5761_s8 + $0xa4] ss:$0 sps:$4 sm:$0x11]  }
  0x25   : > { %v648_v30 = vsel %vm504_vm0, %v643_v26, %v647_v23  ;;  %v551_v39 = vrot.slane %v549_v33, 1  ;;  %v554_v49 = vshrl.u32 %v5281_v43, 16  ;;  %v556_v50 = vshll.u32 %v5281_v43, 16  ;;  %v5851_v1 = vld [vmem:[%s5761_s8 + $0x48] sm:$0xff]   ;;  %v5287_v2 = vld [vmem:[%s5761_s8 + $0x3c] sm:$0xff]   ;;  %v5286_v6 = vld [vmem:[%s5761_s8 + $0xb4] sm:$0xff]  }
  0x26   : > { %1022 = vrot.lane.b32.xlu0 %v996_v44, %s5691_s15  ;;  %v547_v38 = vor.u32 %v546_v32, %v542_v28  ;;  %v654_v41 = vrot.slane %v652_v37, 1  ;;  %v659_v44 = vrot.slane %v657_v40, 1  ;;  %v990_v53 = vrot.slane %v5836_v42, 7  ;;  %v5288_v7 = vld [vmem:[%s5761_s8 + $0x44] ss:$0 sps:$4 sm:$0x11]  }
  0x27   : > { %v558_v54 = vrot.slane %v556_v50, 1  ;;  %v561_v55 = vshll.u32 %v5282_v48, 16  ;;  %v662_v58 = vshrl.u32 %v5283_v45, 16  ;;  %v664_v59 = vshll.u32 %v5283_v45, 16  ;;  %v5863_v19 = vld [vmem:[%s5761_s8 + $0x54] sm:$0xff]   ;;  %v5292_v24 = vld [vmem:[%s5761_s8 + $0xc0] sm:$0xff]  }
  0x28   : > { %699 = vrot.lane.b32.xlu1 %v528_v0, %s5691_s15  ;;  %v655_v46 = vor.u32 %v654_v41, %v650_v36  ;;  %v552_v51 = vsel %vm504_vm0, %v547_v38, %v551_v39  ;;  %v999_v60 = vrot.slane %v5280_v47, 7  ;;  %v568_v10 = vshll.u32 %v5287_v2, 16  ;;  %v5290_v14 = vld [vmem:[%s5761_s8 + $0xb0] ss:$0 sps:$4 sm:$0x11]   ;;  %v5295_v28 = vld [vmem:[%s5761_s8 + $0xb4] sm:$0xff]  }
  0x29   : > { %v559_v62 = vor.u32 %v558_v54, %v554_v49  ;;  %v563_v63 = vrot.slane %v561_v55, 1  ;;  %v666_v0 = vrot.slane %v664_v59, 1  ;;  %v573_v13 = vshll.u32 %v5288_v7, 16  ;;  %v5294_v32 = vld [vmem:[%s5761_s8 + $0x50] ss:$0 sps:$4 sm:$0x11]  }
  0x2a   : > { %717 = vrot.lane.b32.xlu0 %v636_v9, %s5691_s15  ;;  %v660_v52 = vsel %vm504_vm0, %v655_v46, %v659_v44  ;;  %v566_v9 = vshrl.u32 %v5287_v2, 16  ;;  %v570_v12 = vrot.slane %v568_v10, 1  ;;  %v681_v21 = vshll.u32 %v5290_v14, 16  ;;  %v5296_v38 = vld [vmem:[%s5761_s8 + $0xbc] ss:$0 sps:$4 sm:$0x11]  }
  0x2b   : > { %v667_v5 = vor.u32 %v666_v0, %v662_v58  ;;  %v564_v11 = vsel %vm504_vm0, %v559_v62, %v563_v63  ;;  %v1000_v22 = vrot.slane %v5286_v6, 7  ;;  %v575_v27 = vrot.slane %v573_v13, 1  ;;  %v5879_v48 = vld [vmem:[%s5761_s8 + $0x60] sm:$0xff]   ;;  %v5298_v49 = vld [vmem:[%s5761_s8 + $0x54] sm:$0xff]  }
  0x2c   : > { %1006 = vrot.lane.b32.xlu1 %v988_v61, %s5691_s15  ;;  %v669_v61 = vshll.u32 %v5284_v57, 16  ;;  %v571_v26 = vor.u32 %v570_v12, %v566_v9  ;;  %v1001_v35 = vrot.slane %v5292_v24, 7  ;;  %v585_v37 = vshll.u32 %v5294_v32, 16  ;;  %v5886_v55 = vld [vmem:[%s5761_s8 + $0x14] ss:$0 sps:$4 sm:$0x11]  }
  0x2d   : > { %v688_v41 = vshll.u32 %v5295_v28, 16  ;;  %v686_v44 = vshrl.u32 %v5295_v28, 16  ;;  %v693_v45 = vshll.u32 %v5296_v38, 16  ;;  %v592_v54 = vshll.u32 %v5298_v49, 16 }
  0x2e   : > { %1024 = vrot.lane.b32.xlu0 %v997_v4, %s5691_s15  ;;  %v671_v3 = vrot.slane %v669_v61, 1  ;;  %v5289_v4 = vld [vmem:[%s5761_s8 + $0xa8] sm:$0xff]   ;;  %v576_v39 = vsel %vm504_vm0, %v571_v26, %v575_v27  ;;  %v587_v46 = vrot.slane %v585_v37, 1  ;;  %v1342_v57 = vshll.u32 %v5771_v8, 16 }
  0x2f   : > { %v674_v16 = vshrl.u32 %v5289_v4, 16  ;;  %v676_v18 = vshll.u32 %v5289_v4, 16  ;;  %v690_v47 = vrot.slane %v688_v41, 1  ;;  %v695_v50 = vrot.slane %v693_v45, 1 }
  0x30   : > { %701 = vrot.lane.b32.xlu1 %v540_v25, %s5691_s15  ;;  %v672_v17 = vsel %vm504_vm0, %v667_v5, %v671_v3  ;;  %v5293_v25 = vld [vmem:[%s5761_s8 + $0x48] sm:$0xff]   ;;  %v993_v61 = vrot.slane %v5879_v48, 7  ;;  %v594_v62 = vrot.slane %v592_v54, 1  ;;  %v1340_v63 = vshrl.u32 %v5771_v8, 16 }
  0x31   : > { %v678_v23 = vrot.slane %v676_v18, 1  ;;  %v580_v33 = vshll.u32 %v5293_v25, 16  ;;  %v578_v36 = vshrl.u32 %v5293_v25, 16  ;;  %v691_v58 = vor.u32 %v690_v47, %v686_v44  ;;  %v5305_v5 = vld [vmem:[%s5761_s8 + $0x20] ss:$0 sps:$4 sm:$0x11]  }
  0x32   : > { %719 = vrot.lane.b32.xlu0 %v648_v30, %s5691_s15  ;;  %v683_v30 = vrot.slane %v681_v21, 1  ;;  %v1344_v0 = vrot.slane %v1342_v57, 1  ;;  %v1347_v3 = vshll.u32 %v5886_v55, 16  ;;  %v1351_v4 = vshrl.u32 %v5886_v55, 16 }
  0x33   : > { %v679_v29 = vor.u32 %v678_v23, %v674_v16  ;;  %v582_v40 = vrot.slane %v580_v33, 1  ;;  %v696_v8 = vsel %vm504_vm0, %v691_v58, %v695_v50  ;;  %v2115_v12 = vshll.u32 %v5305_v5, 16  ;;  %v5905_v16 = vld [vmem:[%s5761_s8 + $0x20] ss:$0 sps:$4 sm:$0x11]  }
  0x34   : > { %1008 = vrot.lane.b32.xlu1 %v989_v20, %s5691_s15  ;;  %v991_v20 = vrot.slane %v5851_v1, 7  ;;  %v2509_v14 = vsel %vm729_vm1, %v5305_v5, 0  ;;  %v1349_v21 = vrot.slane %v1347_v3, 1  ;;  %v1356_v23 = vshll.u32 %v5791_v34, 16 }
  0x35   : > { %v684_v43 = vsel %vm504_vm0, %v679_v29, %v683_v30  ;;  %v2117_v26 = vrot.slane %v2115_v12, 1  ;;  %v1354_v27 = vshrl.u32 %v5791_v34, 16  ;;  %v5314_v28 = vld [vmem:[%s5761_s8 + $0x2c] ss:$0 sps:$4 sm:$0x11]   ;;  %v1365_v37 = vshrl.u32 %v5905_v16, 16 }
  0x36   : > { %1026 = vrot.lane.b32.xlu0 %v998_v31, %s5691_s15  ;;  %v992_v31 = vrot.slane %v5863_v19, 7  ;;  %v1358_v30 = vrot.slane %v1356_v23, 1  ;;  %v5918_v33 = vld [vmem:[%s5761_s8 + $0x2c] ss:$0 sps:$4 sm:$0x11]   ;;  %v2511_v41 = vsel %vm729_vm1, %v5314_v28, 0 }
  0x37   : > { %v5321_v34 = vld [vmem:[%s7116_s1 + $0x30] ss:$8 sps:$4 sm:$0xff]   ;;  %v2576_v45 = vrot.slane %v2511_v41, 1  ;;  %v1370_v47 = vshll.u32 %v5806_v56, 16  ;;  %v2127_v57 = vshll.u32 %v5314_v28, 16  ;;  %v5964_v23 = vld [vmem:[%s5761_s8 + $0x3c] sm:$0xff]  }
  0x38   : > { %703 = vrot.lane.b32.xlu1 %v552_v51, %s5691_s15  ;;  %v5299_v51 = vld [vmem:[%s5761_s8 + $0x5c] ss:$0 sps:$4 sm:$0x11]   ;;  %5213 = vmatpush1.bf16.msra.mxu1 %v5321_v34  ;;  %v1359_v50 = vor.u32 %v1358_v30, %v1354_v27  ;;  %v2514_v30 = vsel %vm729_vm1, %v5964_v23, 0 }
  0x39   : > { %v597_v59 = vshll.u32 %v5299_v51, 16  ;;  %3761 = vmatpush1.bf16.msra.mxu0 %v5321_v34 }
  0x3a   : > { %721 = vrot.lane.b32.xlu0 %v660_v52, %s5691_s15  ;;  %v583_v52 = vor.u32 %v582_v40, %v578_v36 }
  0x3b   : > { %v599_v2 = vrot.slane %v597_v59, 1  ;;  %v1372_v59 = vrot.slane %v1370_v47, 1  ;;  %v5337_v47 = vld [vmem:[%s7116_s1 + $0xf4] ss:$8 sps:$4 sm:$0xff]  }
  0x3c   : > { %1010 = vrot.lane.b32.xlu1 %v990_v53, %s5691_s15  ;;  %v590_v53 = vshrl.u32 %v5298_v49, 16  ;;  %v588_v6 = vsel %vm504_vm0, %v583_v52, %v587_v46  ;;  %v1368_v46 = vshrl.u32 %v5806_v56, 16  ;;  %v1375_v52 = vshll.u32 %v5918_v33, 16 }
  0x3e   : > { %1028 = vrot.lane.b32.xlu0 %v999_v60, %s5691_s15  ;;  %v5304_v60 = vld [vmem:[%s5761_s8 + $0x18] sm:$0xff]   ;;  %v595_v7 = vor.u32 %v594_v62, %v590_v53  ;;  %v1377_v56 = vrot.slane %v1375_v52, 1  ;;  %v5340_v52 = vld [vmem:[%s5761_s8 + $0x48] sm:$0xff]  }
  0x3f   : > { %v2108_v9 = vshrl.u32 %v5304_v60, 16  ;;  %v2110_v10 = vshll.u32 %v5304_v60, 16  ;;  %v2508_v13 = vsel %vm729_vm1, %v5304_v60, 0  ;;  %v5323_v53 = vld [vmem:[%s5761_s8 + $0x38] ss:$0 sps:$4 sm:$0x11]  }
  0x40   : > { %705 = vrot.lane.b32.xlu1 %v564_v11, %s5691_s15  ;;  %v5899_v11 = vld [vmem:[%s5761_s8 + $0x24] sm:$0xff]   ;;  %v2572_v18 = vrot.slane %v2508_v13, 1  ;;  %v600_v24 = vsel %vm504_vm0, %v595_v7, %v599_v2  ;;  %v5939_v62 = vld [vmem:[%s5761_s8 + $0x38] ss:$0 sps:$4 sm:$0x11]   ;;  %v2139_v3 = vshll.u32 %v5323_v53, 16 }
  0x41   : > { %v2510_v32 = vsel %vm729_vm1, %v5899_v11, 0  ;;  %v2122_v38 = vshll.u32 %v5899_v11, 16  ;;  %v2120_v40 = vshrl.u32 %v5899_v11, 16  ;;  %v1384_v11 = vshll.u32 %v5821_v15, 16 }
  0x42   : > { %723 = vrot.lane.b32.xlu0 %v672_v17, %s5691_s15  ;;  %v2112_v17 = vrot.slane %v2110_v10, 1  ;;  %v2575_v44 = vrot.slane %v2510_v32, 1  ;;  %v2129_v13 = vrot.slane %v2127_v57, 1  ;;  %v1389_v55 = vshll.u32 %v5939_v62, 16 }
  0x43   : > { %v2124_v54 = vrot.slane %v2122_v38, 1  ;;  %v1396_v32 = vshrl.u32 %v5836_v42, 16  ;;  %v2581_v38 = vrot.slane %v2514_v30, 1  ;;  %v1426_v30 = vshll.u32 %v5863_v19, 16 }
  0x44   : > { %1012 = vrot.lane.b32.xlu1 %v991_v20, %s5691_s15  ;;  %v1345_v20 = vor.u32 %v1344_v0, %v1340_v63  ;;  %v2113_v25 = vor.u32 %v2112_v17, %v2108_v9  ;;  %v2577_v58 = vsel %vm1114_vm2, %v2575_v44, %v2576_v45  ;;  %v5325_v63 = vld [vmem:[%s7116_s1 + $0x24] ss:$8 sps:$4 sm:$0xff]   ;;  %v1373_v0 = vor.u32 %v1372_v59, %v1368_v46  ;;  %v5330_v17 = vld [vmem:[%s7116_s1 + $0x10] ss:$8 sps:$4 sm:$0xff]   ;;  %v5336_v46 = vld [vmem:[%s7116_s1] ss:$8 sps:$4 sm:$0xff]  }
  0x45   : > { %v5000_v60 = vcombine.low %v2577_v58, %v2577_v58  ;;  %v2513_v9 = vsel %vm729_vm1, %v5323_v53, 0  ;;  %5198 = vmatprep.subr.bf16.mxu1 %v5325_v63  ;;  %3762 = vmatprep.subr.bf16.mxu0 %v5325_v63  ;;  %v5341_v59 = vld [vmem:[%s5761_s8 + $0x50] ss:$0 sps:$4 sm:$0x11]  }
  0x46   : > { %1030 = vrot.lane.b32.xlu0 %v1000_v22, %s5691_s15  ;;  %v2573_v22 = vrot.slane %v2509_v14, 1  ;;  %v2118_v49 = vsel %vm504_vm0, %v2113_v25, %v2117_v26  ;;  %v1386_v26 = vrot.slane %v1384_v11, 1  ;;  %v1410_v11 = vshrl.u32 %v5851_v1, 16 }
  0x47   : > { %2718 = vst [vmem:[#allocation2 + $0x38] sm:$0xf] %v5000_v60  ;;  %v2158_v60 = vshll.u32 %v5340_v52, 16 }
  0x48   : > { %707 = vrot.lane.b32.xlu1 %v576_v39, %s5691_s15  ;;  %v2574_v29 = vsel %vm1114_vm2, %v2572_v18, %v2573_v22  ;;  %v1350_v39 = vsel %vm504_vm0, %v1345_v20, %v1349_v21  ;;  %v2125_v18 = vor.u32 %v2124_v54, %v2120_v40  ;;  %v1379_v20 = vshrl.u32 %v5918_v33, 16 }
  0x49   : > { %v4999_v36 = vcombine.high %v2574_v29, %v2574_v29  ;;  %v2141_v21 = vrot.slane %v2139_v3, 1  ;;  %v1382_v22 = vshrl.u32 %v5821_v15, 16  ;;  %v5332_v15 = vld [vmem:[%s5761_s8 + $0x44] ss:$0 sps:$4 sm:$0x11]   ;;  %v2146_v40 = vshll.u32 %v5964_v23, 16 }
  0x4a   : > { %725 = vrot.lane.b32.xlu0 %v684_v43, %s5691_s15  ;;  %v5322_v43 = vld [vmem:[%s5761_s8 + $0x30] sm:$0xff]   ;;  %v2130_v34 = vsel %vm504_vm0, %v2125_v18, %v2129_v13 }
  0x4b   : > { %2717 = vst [vmem:[#allocation2 + $0x24] sm:$0xf] %v4999_v36  ;;  %v2134_v2 = vshll.u32 %v5322_v43, 16  ;;  %v2512_v5 = vsel %vm729_vm1, %v5322_v43, 0  ;;  %v2132_v7 = vshrl.u32 %v5322_v43, 16  ;;  %v2144_v36 = vshrl.u32 %v5964_v23, 16 }
  0x4c   : > { %1014 = vrot.lane.b32.xlu1 %v992_v31, %s5691_s15  ;;  %v1361_v31 = vshll.u32 %v5905_v16, 16  ;;  %v2578_v10 = vrot.slane %v2512_v5, 1  ;;  %v2579_v16 = vrot.slane %v2513_v9, 1  ;;  %v1387_v57 = vor.u32 %v1386_v26, %v1382_v22  ;;  %v6006_v3 = vld [vmem:[%s5761_s8 + $0x50] ss:$0 sps:$4 sm:$0x11]  }
  0x4d   : > { %v2136_v14 = vrot.slane %v2134_v2, 1  ;;  %v2160_v5 = vrot.slane %v2158_v60, 1  ;;  %v6034_v22 = vld [vmem:[%s5761_s8 + $0x54] sm:$0xff]   ;;  %v5350_v26 = vld [vmem:[%s5761_s8 + $0x5c] ss:$0 sps:$4 sm:$0x11]  }
  0x4e   : > { %1032 = vrot.lane.b32.xlu0 %v1001_v35, %s5691_s15  ;;  %v4998_v35 = vcombine.low %v2574_v29, %v2574_v29  ;;  %v1363_v51 = vrot.slane %v1361_v31, 1  ;;  %v2580_v25 = vsel %vm1114_vm2, %v2578_v10, %v2579_v16  ;;  %v1393_v29 = vshrl.u32 %v5939_v62, 16  ;;  %v5975_v31 = vld [vmem:[%s5761_s8 + $0x44] ss:$0 sps:$4 sm:$0x11]  }
  0x4f   : > { %v5002_v27 = vcombine.low %v2580_v25, %v2580_v25  ;;  %v5003_v28 = vcombine.high %v2580_v25, %v2580_v25  ;;  %v1403_v45 = vshll.u32 %v5975_v31, 16  ;;  %v5345_v16 = vld [vmem:[%s7116_s1 + $0xe0] ss:$8 sps:$4 sm:$0xff]   ;;  %v5348_v62 = vld [vmem:[%s7116_s1 + $0xd0] ss:$8 sps:$4 sm:$0xff]  }
  0x50   : > { %709 = vrot.lane.b32.xlu1 %v588_v6, %s5691_s15  ;;  %2716 = vst [vmem:[#allocation2 + $0x10] sm:$0xf] %v4998_v35  ;;  %v5327_v6 = vld [vmem:[%s7116_s1 + $0x20] ss:$8 sps:$4 sm:$0xff]   ;;  %v1364_v12 = vsel %vm504_vm0, %v1359_v50, %v1363_v51  ;;  %v1398_v35 = vshll.u32 %v5836_v42, 16 }
  0x51   : > { %5214 = vmatpush1.bf16.msra.mxu1 %v5327_v6  ;;  %3763 = vmatpush1.bf16.msra.mxu0 %v5327_v6  ;;  %2720 = vst [vmem:[#allocation2 + $0x60] sm:$0xf] %v5002_v27  ;;  %2721 = vst [vmem:[#allocation2 + $0x74] sm:$0xf] %v5003_v28  ;;  %v5334_v42 = vld [vmem:[%s7116_s1 + $0x4] ss:$8 sps:$4 sm:$0xff]  }
  0x52   : > { %727 = vrot.lane.b32.xlu0 %v696_v8, %s5691_s15  ;;  %v5328_v8 = vld [vmem:[%s7116_s1 + $0x14] ss:$8 sps:$4 sm:$0xff]   ;;  %v1400_v44 = vrot.slane %v1398_v35, 1  ;;  %v5339_v51 = vld [vmem:[%s7116_s1 + $0xf0] ss:$8 sps:$4 sm:$0xff]   ;;  %v1405_v63 = vrot.slane %v1403_v45, 1 }
  0x53   : > { %5199 = vmatprep.subr.bf16.mxu1 %v5328_v8  ;;  %3764 = vmatprep.subr.bf16.mxu0 %v5328_v8  ;;  %v2163_v6 = vshll.u32 %v5341_v59, 16  ;;  %v1412_v8 = vshll.u32 %v5851_v1, 16  ;;  %v5346_v1 = vld [vmem:[%s7116_s1 + $0xd4] ss:$8 sps:$4 sm:$0xff]   ;;  %v1407_v28 = vshrl.u32 %v5975_v31, 16  ;;  %v1421_v35 = vshrl.u32 %v6006_v3, 16 }
  0x54   : > { %1016 = vrot.lane.b32.xlu1 %v993_v61, %s5691_s15  ;;  %v5001_v61 = vcombine.high %v2577_v58, %v2577_v58  ;;  %v2148_v58 = vrot.slane %v2146_v40, 1  ;;  %v1428_v31 = vrot.slane %v1426_v30, 1  ;;  %v5352_v40 = vld [vmem:[%s7116_s1 + $0xc4] ss:$8 sps:$4 sm:$0xff]  }
  0x55   : > { %5215 = vmatpush1.bf16.msra.mxu1 %v5330_v17  ;;  %3765 = vmatpush1.bf16.msra.mxu0 %v5330_v17  ;;  %v1414_v25 = vrot.slane %v1412_v8, 1  ;;  %v5361_v8 = vld [vmem:[%s7116_s1 + $0xa4] ss:$8 sps:$4 sm:$0xff]  }
  0x56   : > { %711 = vrot.lane.b32.xlu0 %v600_v24, %s5691_s15  ;;  %2719 = vst [vmem:[#allocation2 + $0x4c] sm:$0xf] %v5001_v61  ;;  %v1378_v24 = vsel %vm504_vm0, %v1373_v0, %v1377_v56  ;;  %5200 = vmatprep.subr.bf16.mxu1 %v5334_v42  ;;  %v2516_v61 = vsel %vm729_vm1, %v5340_v52, 0  ;;  %v1401_v56 = vor.u32 %v1400_v44, %v1396_v32  ;;  %v2156_v0 = vshrl.u32 %v5340_v52, 16  ;;  %v5354_v44 = vld [vmem:[%s7116_s1 + $0xc0] ss:$8 sps:$4 sm:$0xff]  }
  0x57   : > { %3766 = vmatprep.subr.bf16.mxu0 %v5334_v42  ;;  %v2584_v2 = vrot.slane %v2516_v61, 1  ;;  %v2149_v33 = vor.u32 %v2148_v58, %v2144_v36  ;;  %v2519_v36 = vsel %vm729_vm1, %v5350_v26, 0  ;;  %v2168_v42 = vshrl.u32 %v6034_v22, 16 }
  0x58   : > { %1563 = vrot.lane.b32.xlu1 %v1350_v39, %s5691_s15  ;;  %v1391_v39 = vrot.slane %v1389_v55, 1  ;;  %v1406_v17 = vsel %vm504_vm0, %v1401_v56, %v1405_v63  ;;  %v2161_v18 = vor.u32 %v2160_v5, %v2156_v0  ;;  %v2170_v55 = vshll.u32 %v6034_v22, 16  ;;  %v6075_v63 = vld [vmem:[%s5761_s8 + $0x68] ss:$0 sps:$4 sm:$0x11]  }
  0x59   : > { %5216 = vmatpush1.bf16.msra.mxu1 %v5336_v46  ;;  %3767 = vmatpush1.bf16.msra.mxu0 %v5336_v46  ;;  %v1440_v0 = vshll.u32 %v5879_v48, 16 }
  0x5a   : > { %2299 = vrot.lane.b32.xlu0 %v2118_v49, %s5691_s15  ;;  %v2151_v49 = vshll.u32 %v5332_v15, 16  ;;  %5201 = vmatprep.subr.bf16.mxu1 %v5337_v47  ;;  %v1392_v13 = vsel %vm504_vm0, %v1387_v57, %v1391_v39 }
  0x5b   : > { %3768 = vmatprep.subr.bf16.mxu0 %v5337_v47  ;;  %v5355_v47 = vld [vmem:[%s7116_s1 + $0xb4] ss:$8 sps:$4 sm:$0xff]  }
  0x5c   : > { %1565 = vrot.lane.b32.xlu1 %v1351_v4, %s5691_s15  ;;  %v2137_v4 = vor.u32 %v2136_v14, %v2132_v7  ;;  %v2517_v7 = vsel %vm729_vm1, %v5341_v59, 0  ;;  %v2153_v9 = vrot.slane %v2151_v49, 1  ;;  %v1417_v14 = vshll.u32 %v6006_v3, 16  ;;  %v5358_v49 = vld [vmem:[%s5761_s8 + $0x60] sm:$0xff]  }
  0x5d   : > { %5217 = vmatpush2.bf16.msra.mxu1 %v5339_v51  ;;  %v2585_v10 = vrot.slane %v2517_v7, 1  ;;  %3769 = vmatpush2.bf16.msra.mxu0 %v5339_v51  ;;  %v2180_v57 = vshrl.u32 %v5358_v49, 16  ;;  %v2182_v58 = vshll.u32 %v5358_v49, 16  ;;  %v2520_v59 = vsel %vm729_vm1, %v5358_v49, 0 }
  0x5e   : > { %1569 = vrot.lane.b32.xlu0 %v1365_v37, %s5691_s15  ;;  %v2515_v37 = vsel %vm729_vm1, %v5332_v15, 0  ;;  %v2142_v43 = vsel %vm504_vm0, %v2137_v4, %v2141_v21  ;;  %v2518_v4 = vsel %vm729_vm1, %v6034_v22, 0  ;;  %v2154_v27 = vsel %vm504_vm0, %v2149_v33, %v2153_v9  ;;  %v6045_v15 = vld [vmem:[%s5761_s8 + $0x5c] ss:$0 sps:$4 sm:$0x11]  }
  0x5f   : > { %v2582_v41 = vrot.slane %v2515_v37, 1  ;;  %v2586_v21 = vsel %vm1114_vm2, %v2584_v2, %v2585_v10  ;;  %v1424_v37 = vshrl.u32 %v5863_v19, 16  ;;  %v1431_v39 = vshll.u32 %v6045_v15, 16 }
  0x60   : > { %1567 = vrot.lane.b32.xlu1 %v1364_v12, %s5691_s15  ;;  %v5343_v12 = vld [vmem:[%s7116_s1 + $0xe4] ss:$8 sps:$4 sm:$0xff]   ;;  %v5006_v23 = vcombine.low %v2586_v21, %v2586_v21  ;;  %v2175_v19 = vshll.u32 %v5350_v26, 16  ;;  %v2590_v56 = vrot.slane %v2520_v59, 1  ;;  %v2184_v3 = vrot.slane %v2182_v58, 1  ;;  %v5581_v59 = vld [vmem:[%s5761_s8 + $0x78] sm:$0xff]  }
  0x61   : > { %v2583_v50 = vsel %vm1114_vm2, %v2581_v38, %v2582_v41  ;;  %5202 = vmatprep.subr.bf16.mxu1 %v5343_v12  ;;  %3770 = vmatprep.subr.bf16.mxu0 %v5343_v12  ;;  %v1419_v38 = vrot.slane %v1417_v14, 1  ;;  %v1415_v41 = vor.u32 %v1414_v25, %v1410_v11  ;;  %v1433_v46 = vrot.slane %v1431_v39, 1  ;;  %v5368_v25 = vld [vmem:[%s5761_s8 + $0x74] ss:$0 sps:$4 sm:$0x11]  }
  0x62   : > { %1571 = vrot.lane.b32.xlu0 %v1378_v24, %s5691_s15  ;;  %v5004_v53 = vcombine.low %v2583_v50, %v2583_v50  ;;  %v5005_v54 = vcombine.high %v2583_v50, %v2583_v50  ;;  %v5007_v24 = vcombine.high %v2586_v21, %v2586_v21  ;;  %5218 = vmatpush2.bf16.msra.mxu1 %v5345_v16  ;;  %v2177_v61 = vrot.slane %v2175_v19, 1  ;;  %v6127_v58 = vld [vmem:[%s5761_s8 + $0x80] ss:$0 sps:$4 sm:$0x11]  }
  0x63   : > { %2724 = vst [vmem:[#allocation2 + $0xb0] sm:$0xf] %v5006_v23  ;;  %5203 = vmatprep.subr.bf16.mxu1 %v5346_v1  ;;  %3771 = vmatpush2.bf16.msra.mxu0 %v5345_v16  ;;  %v1429_v52 = vor.u32 %v1428_v31, %v1424_v37  ;;  %v1420_v60 = vsel %vm504_vm0, %v1415_v41, %v1419_v38  ;;  %v1435_v9 = vshrl.u32 %v6045_v15, 16  ;;  %v1445_v11 = vshll.u32 %v6075_v63, 16  ;;  %v5363_v16 = vld [vmem:[%s7116_s1 + $0xa0] ss:$8 sps:$4 sm:$0xff]  }
  0x64   : > { %2301 = vrot.lane.b32.xlu1 %v2130_v34, %s5691_s15  ;;  %2722 = vst [vmem:[#allocation2 + $0x88] sm:$0xf] %v5004_v53  ;;  %2723 = vst [vmem:[#allocation2 + $0x9c] sm:$0xf] %v5005_v54  ;;  %v2588_v34 = vrot.slane %v2519_v36, 1  ;;  %3772 = vmatprep.subr.bf16.mxu0 %v5346_v1  ;;  %v2185_v12 = vor.u32 %v2184_v3, %v2180_v57  ;;  %v1438_v33 = vshrl.u32 %v5879_v48, 16 }
  0x65   : > { %2725 = vst [vmem:[#allocation2 + $0xc4] sm:$0xf] %v5007_v24  ;;  %v5357_v53 = vld [vmem:[%s7116_s1 + $0xb0] ss:$8 sps:$4 sm:$0xff]   ;;  %v1434_v7 = vsel %vm504_vm0, %v1429_v52, %v1433_v46  ;;  %v1442_v14 = vrot.slane %v1440_v0, 1  ;;  %v1447_v23 = vrot.slane %v1445_v11, 1 }
  0x66   : > { %2303 = vrot.lane.b32.xlu0 %v2142_v43, %s5691_s15  ;;  %5219 = vmatpush2.bf16.msra.mxu1 %v5348_v62  ;;  %v2172_v43 = vrot.slane %v2170_v55, 1  ;;  %v5359_v54 = vld [vmem:[%s5761_s8 + $0x68] ss:$0 sps:$4 sm:$0x11]   ;;  %v5366_v24 = vld [vmem:[%s7116_s1 + $0x90] ss:$8 sps:$4 sm:$0xff]  }
  0x67   : > { %5204 = vmatprep.subr.bf16.mxu1 %v5352_v40  ;;  %3773 = vmatpush2.bf16.msra.mxu0 %v5348_v62  ;;  %v2187_v5 = vshll.u32 %v5359_v54, 16  ;;  %v1443_v30 = vor.u32 %v1442_v14, %v1438_v33  ;;  %v2523_v36 = vsel %vm729_vm1, %v5368_v25, 0  ;;  %v5376_v37 = vld [vmem:[%s5761_s8 + $0x78] sm:$0xff]   ;;  %v1468_v0 = vshll.u32 %v5581_v59, 16  ;;  %v6146_v14 = vld [vmem:[%s5761_s8 + $0x84] sm:$0xff]  }
  0x68   : > { %1573 = vrot.lane.b32.xlu1 %v1379_v20, %s5691_s15  ;;  %v2165_v20 = vrot.slane %v2163_v6, 1  ;;  %3774 = vmatprep.subr.bf16.mxu0 %v5352_v40  ;;  %v2173_v2 = vor.u32 %v2172_v43, %v2168_v42  ;;  %v2521_v6 = vsel %vm729_vm1, %v5359_v54, 0  ;;  %v5370_v40 = vld [vmem:[%s7116_s1 + $0x84] ss:$8 sps:$4 sm:$0xff]   ;;  %v5372_v42 = vld [vmem:[%s7116_s1 + $0x80] ss:$8 sps:$4 sm:$0xff]  }
  0x69   : > { %v2591_v10 = vrot.slane %v2521_v6, 1  ;;  %v2204_v43 = vshrl.u32 %v5376_v37, 16  ;;  %v2206_v46 = vshll.u32 %v5376_v37, 16  ;;  %v2524_v52 = vsel %vm729_vm1, %v5376_v37, 0  ;;  %v5384_v6 = vld [vmem:[%s7116_s1 + $0x174] ss:$8 sps:$4 sm:$0xff]  }
  0x6a   : > { %1577 = vrot.lane.b32.xlu0 %v1393_v29, %s5691_s15  ;;  %v2587_v29 = vrot.slane %v2518_v4, 1  ;;  %v2166_v32 = vsel %vm504_vm0, %v2161_v18, %v2165_v20  ;;  %5220 = vmatpush2.bf16.msra.mxu1 %v5354_v44  ;;  %v5364_v18 = vld [vmem:[%s7116_s1 + $0x94] ss:$8 sps:$4 sm:$0xff]   ;;  %v5367_v20 = vld [vmem:[%s5761_s8 + $0x6c] sm:$0xff]   ;;  %v2178_v48 = vsel %vm504_vm0, %v2173_v2, %v2177_v61  ;;  %v2596_v57 = vrot.slane %v2524_v52, 1 }
  0x6b   : > { %5205 = vmatprep.subr.bf16.mxu1 %v5355_v47  ;;  %3775 = vmatpush2.bf16.msra.mxu0 %v5354_v44  ;;  %v2592_v1 = vsel %vm1114_vm2, %v2590_v56, %v2591_v10  ;;  %v2194_v26 = vshll.u32 %v5367_v20, 16  ;;  %v2522_v55 = vsel %vm729_vm1, %v5367_v20, 0  ;;  %v2208_v54 = vrot.slane %v2206_v46, 1  ;;  %v5387_v33 = vld [vmem:[%s7116_s1 + $0x274] ss:$8 sps:$4 sm:$0xff]  }
  0x6c   : > { %1575 = vrot.lane.b32.xlu1 %v1392_v13, %s5691_s15  ;;  %v2589_v45 = vsel %vm1114_vm2, %v2587_v29, %v2588_v34  ;;  %v2189_v13 = vrot.slane %v2187_v5, 1  ;;  %3776 = vmatprep.subr.bf16.mxu0 %v5355_v47  ;;  %v5010_v21 = vcombine.low %v2592_v1, %v2592_v1  ;;  %v5011_v62 = vcombine.high %v2592_v1, %v2592_v1 }
  0x6d   : > { %v5008_v50 = vcombine.low %v2589_v45, %v2589_v45  ;;  %v5009_v51 = vcombine.high %v2589_v45, %v2589_v45  ;;  %v2593_v4 = vrot.slane %v2522_v55, 1  ;;  %v2196_v38 = vrot.slane %v2194_v26, 1  ;;  %v5395_v26 = vld [vmem:[%s5761_s8 + $0x8c] ss:$0 sps:$4 sm:$0x11]  }
  0x6e   : > { %1579 = vrot.lane.b32.xlu0 %v1406_v17, %s5691_s15  ;;  %5221 = vmatpush2.bf16.msra.mxu1 %v5357_v53  ;;  %v1449_v17 = vshrl.u32 %v6075_v63, 16  ;;  %v2190_v22 = vsel %vm504_vm0, %v2185_v12, %v2189_v13  ;;  %2728 = vst [vmem:[#allocation2 + $0x100] sm:$0xf] %v5010_v21  ;;  %2729 = vst [vmem:[#allocation2 + $0x114] sm:$0xf] %v5011_v62  ;;  %v2594_v34 = vrot.slane %v2523_v36, 1 }
  0x6f   : > { %2726 = vst [vmem:[#allocation2 + $0xd8] sm:$0xf] %v5008_v50  ;;  %2727 = vst [vmem:[#allocation2 + $0xec] sm:$0xf] %v5009_v51  ;;  %5206 = vmatprep.subr.bf16.mxu1 %v5361_v8  ;;  %3777 = vmatpush2.bf16.msra.mxu0 %v5357_v53  ;;  %v1448_v47 = vsel %vm504_vm0, %v1443_v30, %v1447_v23  ;;  %v2209_v2 = vor.u32 %v2208_v54, %v2204_v43  ;;  %v1473_v5 = vshll.u32 %v6127_v58, 16  ;;  %v5394_v21 = vld [vmem:[%s5761_s8 + $0x84] sm:$0xff]  }
  0x70   : > { %2305 = vrot.lane.b32.xlu1 %v2154_v27, %s5691_s15  ;;  %3778 = vmatprep.subr.bf16.mxu0 %v5361_v8  ;;  %v6106_v27 = vld [vmem:[%s5761_s8 + $0x74] ss:$0 sps:$4 sm:$0x11]   ;;  %v2595_v19 = vsel %vm1114_vm2, %v2593_v4, %v2594_v34  ;;  %v5377_v51 = vld [vmem:[%s5761_s8 + $0x80] ss:$0 sps:$4 sm:$0x11]  }
  0x71   : > { %v1459_v39 = vshll.u32 %v6106_v27, 16  ;;  %v5012_v49 = vcombine.low %v2595_v19, %v2595_v19  ;;  %v5013_v50 = vcombine.high %v2595_v19, %v2595_v19  ;;  %v2211_v56 = vshll.u32 %v5377_v51, 16  ;;  %v5586_v43 = vld [vmem:[%s5761_s8 + $0x8] ss:$0 sps:$4 sm:$0x11]  }
  0x72   : > { %2307 = vrot.lane.b32.xlu0 %v2166_v32, %s5691_s15  ;;  %5222 = vmatpush2.bf16.msra.mxu1 %v5363_v16  ;;  %v2192_v32 = vshrl.u32 %v5367_v20, 16  ;;  %v2525_v63 = vsel %vm729_vm1, %v5377_v51, 0  ;;  %v1470_v10 = vrot.slane %v1468_v0, 1  ;;  %v1477_v11 = vshrl.u32 %v6127_v58, 16 }
  0x73   : > { %5207 = vmatprep.subr.bf16.mxu1 %v5364_v18  ;;  %3779 = vmatpush2.bf16.msra.mxu0 %v5363_v16  ;;  %v1461_v45 = vrot.slane %v1459_v39, 1  ;;  %2730 = vst [vmem:[#allocation2 + $0x128] sm:$0xf] %v5012_v49  ;;  %2731 = vst [vmem:[#allocation2 + $0x13c] sm:$0xf] %v5013_v50  ;;  %v2597_v3 = vrot.slane %v2525_v63, 1 }
  0x74   : > { %1581 = vrot.lane.b32.xlu1 %v1407_v28, %s5691_s15  ;;  %v5580_v28 = vld [vmem:[%s5761_s8 + $0x6c] sm:$0xff]   ;;  %3780 = vmatprep.subr.bf16.mxu0 %v5364_v18  ;;  %v2197_v53 = vor.u32 %v2196_v38, %v2192_v32  ;;  %v1475_v13 = vrot.slane %v1473_v5, 1  ;;  %v1480_v16 = vshrl.u32 %v6146_v14, 16  ;;  %v1482_v62 = vshll.u32 %v6146_v14, 16 }
  0x75   : > { %v1452_v29 = vshrl.u32 %v5580_v28, 16  ;;  %v1454_v15 = vshll.u32 %v5580_v28, 16  ;;  %v2598_v12 = vsel %vm1114_vm2, %v2596_v57, %v2597_v3  ;;  %v2218_v28 = vshll.u32 %v5394_v21, 16  ;;  %v5413_v3 = vld [vmem:[%s5761_s8 + $0x98] ss:$0 sps:$4 sm:$0x11]  }
  0x76   : > { %1585 = vrot.lane.b32.xlu0 %v1421_v35, %s5691_s15  ;;  %v2199_v35 = vshll.u32 %v5368_v25, 16  ;;  %5223 = vmatpush2.bf16.msra.mxu1 %v5366_v24  ;;  %v5015_v18 = vcombine.high %v2598_v12, %v2598_v12  ;;  %v2526_v30 = vsel %vm729_vm1, %v5394_v21, 0  ;;  %v2527_v32 = vsel %vm729_vm1, %v5395_v26, 0  ;;  %v5587_v5 = vld [vmem:[%s5761_s8 + $0x6c] sm:$0xff]  }
  0x77   : > { %v1456_v31 = vrot.slane %v1454_v15, 1  ;;  %5208 = vmatprep.subr.bf16.mxu1 %v5370_v40  ;;  %3781 = vmatpush2.bf16.msra.mxu0 %v5366_v24  ;;  %v5584_v24 = vld [vmem:[%s5761_s8 + $0x68] ss:$0 sps:$4 sm:$0x11]   ;;  %v2223_v15 = vshll.u32 %v5395_v26, 16  ;;  %v2220_v38 = vrot.slane %v2218_v28, 1 }
  0x78   : > { %1583 = vrot.lane.b32.xlu1 %v1420_v60, %s5691_s15  ;;  %v2201_v41 = vrot.slane %v2199_v35, 1  ;;  %v1466_v60 = vshrl.u32 %v5581_v59, 16  ;;  %3782 = vmatprep.subr.bf16.mxu0 %v5370_v40  ;;  %2733 = vst [vmem:[#allocation2 + $0x164] sm:$0xf] %v5015_v18  ;;  %v2599_v34 = vrot.slane %v2526_v30, 1  ;;  %v1484_v51 = vrot.slane %v1482_v62, 1 }
  0x79   : > { %v1457_v44 = vor.u32 %v1456_v31, %v1452_v29  ;;  %v6163_v35 = vld [vmem:[%s5761_s8 + $0x8c] ss:$0 sps:$4 sm:$0x11]   ;;  %v2600_v31 = vrot.slane %v2527_v32, 1 }
  0x7a   : > { %1587 = vrot.lane.b32.xlu0 %v1434_v7, %s5691_s15  ;;  %5224 = vmatpush2.bf16.msra.mxu1 %v5372_v42  ;;  %v1463_v7 = vshrl.u32 %v6106_v27, 16  ;;  %v2202_v8 = vsel %vm504_vm0, %v2197_v53, %v2201_v41  ;;  %v1471_v20 = vor.u32 %v1470_v10, %v1466_v60  ;;  %v2216_v27 = vshrl.u32 %v5394_v21, 16  ;;  %v5585_v41 = vld [vmem:[%s5761_s8] sm:$0xff]   ;;  %v5590_v32 = vld [vmem:[%s5761_s8 + $0x14] ss:$0 sps:$4 sm:$0x11]  }
  0x7b   : > { %v1462_v61 = vsel %vm504_vm0, %v1457_v44, %v1461_v45  ;;  %3945 = vmatprep.subr.bf16.mxu1 %v5384_v6  ;;  %3783 = vmatpush2.bf16.msra.mxu0 %v5372_v42  ;;  %v2601_v50 = vsel %vm1114_vm2, %v2599_v34, %v2600_v31  ;;  %v1487_v52 = vshll.u32 %v6163_v35, 16  ;;  %v1491_v53 = vshrl.u32 %v6163_v35, 16 }
  0x7c   : > { %2309 = vrot.lane.b32.xlu1 %v2178_v48, %s5691_s15  ;;  %4138 = vmatprep.subr.bf16.mxu0 %v5387_v33  ;;  %v1476_v29 = vsel %vm504_vm0, %v1471_v20, %v1475_v13  ;;  %v2221_v46 = vor.u32 %v2220_v38, %v2216_v27  ;;  %v5016_v60 = vcombine.low %v2601_v50, %v2601_v50 }
  0x7d   : > { %v5017_v10 = vcombine.high %v2601_v50, %v2601_v50  ;;  %v1489_v33 = vrot.slane %v1487_v52, 1 }
  0x7e   : > { %2311 = vrot.lane.b32.xlu0 %v2190_v22, %s5691_s15  ;;  %v5583_v22 = vld [vmem:[%s5761_s8 + $0x60] sm:$0xff]   ;;  %2734 = vst [vmem:[#allocation2 + $0x178] sm:$0xf] %v5016_v60 }
  0x7f   : > { %2735 = vst [vmem:[#allocation2 + $0x18c] sm:$0xf] %v5017_v10  ;;  %v6235_v10 = vld [vmem:[%s5761_s8 + $0x9c] sm:$0xff]  }
  0x80   : > { %1589 = vrot.lane.b32.xlu1 %v1435_v9, %s5691_s15  ;;  %v2213_v9 = vrot.slane %v2211_v56, 1 }
  0x82   : > { %1593 = vrot.lane.b32.xlu0 %v1449_v17, %s5691_s15  ;;  %v2214_v1 = vsel %vm504_vm0, %v2209_v2, %v2213_v9  ;;  %v5014_v17 = vcombine.low %v2598_v12, %v2598_v12 }
  0x84   : > { %1591 = vrot.lane.b32.xlu1 %v1448_v47, %s5691_s15  ;;  %2732 = vst [vmem:[#allocation2 + $0x150] sm:$0xf] %v5014_v17  ;;  %v2225_v47 = vrot.slane %v2223_v15, 1  ;;  %v5589_v15 = vld [vmem:[%s5761_s8 + $0xc] sm:$0xff]  }
  0x86   : > { %1595 = vrot.lane.b32.xlu0 %v1462_v61, %s5691_s15  ;;  %v2226_v59 = vsel %vm504_vm0, %v2221_v46, %v2225_v47  ;;  %v6179_v61 = vld [vmem:[%s5761_s8 + $0x90] sm:$0xff]  }
  0x87   : > { %v2230_v20 = vshll.u32 %v6179_v61, 16  ;;  %v2528_v14 = vsel %vm729_vm1, %v6179_v61, 0 }
  0x88   : > { %v1019_v48 = vpop.permute.xlu0 %1018  ;;  %2313 = vrot.lane.b32.xlu1 %v2202_v8, %s5691_s15  ;;  %v2602_v38 = vrot.slane %v2528_v14, 1 }
  0x89   : > { %v1059_v23 = vsel %vm729_vm1, %v5583_v22, %v1019_v48  ;;  %v1060_v25 = vsel %vm729_vm1, %v5584_v24, %v1019_v48  ;;  %v2235_v48 = vshll.u32 %v5413_v3, 16  ;;  %v2232_v27 = vrot.slane %v2230_v20, 1 }
  0x8a   : > { %v1139_v55 = vrot.slane %v1059_v23, 1  ;;  %v1140_v4 = vrot.slane %v1060_v25, 1  ;;  %2315 = vrot.lane.b32.xlu0 %v2214_v1, %s5691_s15  ;;  %v2228_v1 = vshrl.u32 %v6179_v61, 16 }
  0x8b   : > { %v2237_v28 = vrot.slane %v2235_v48, 1 }
  0x8c   : > { %v1141_v36 = vsel %vm1114_vm2, %v1139_v55, %v1140_v4  ;;  %v1003_v37 = vpop.permute.xlu0 %1002  ;;  %1597 = vrot.lane.b32.xlu1 %v1463_v7, %s5691_s15  ;;  %v5588_v7 = vld [vmem:[%s5761_s8 + $0x74] ss:$0 sps:$4 sm:$0x11]  }
  0x8d   : > { %v4870_v39 = vcombine.low %v1141_v36, %v1141_v36  ;;  %v4871_v40 = vcombine.high %v1141_v36, %v1141_v36  ;;  %v1035_v42 = vsel %vm729_vm1, %v5585_v41, %v1003_v37  ;;  %v1036_v19 = vsel %vm729_vm1, %v5586_v43, %v1003_v37 }
  0x8e   : > { %v1115_v44 = vrot.slane %v1035_v42, 1  ;;  %v1116_v45 = vrot.slane %v1036_v19, 1  ;;  %1601 = vrot.lane.b32.xlu0 %v1477_v11, %s5691_s15  ;;  %v714_v49 = vpop.permute.xlu1 %713  ;;  %v1485_v11 = vor.u32 %v1484_v51, %v1480_v16  ;;  %v5592_v42 = vld [vmem:[%s5761_s8 + $0x80] ss:$0 sps:$4 sm:$0x11]  }
  0x8f   : > { %1275 = vst [vmem:[#allocation2 + $0x144] sm:$0xf] %v4870_v39  ;;  %1276 = vst [vmem:[#allocation2 + $0x158] sm:$0xf] %v4871_v40  ;;  %v747_v57 = vsel %vm729_vm1, %v5583_v22, %v714_v49  ;;  %v5591_v40 = vld [vmem:[%s5761_s8 + $0x78] sm:$0xff]   ;;  %v2233_v49 = vor.u32 %v2232_v27, %v2228_v1 }
  0x90   : > { %v1117_v54 = vsel %vm1114_vm2, %v1115_v44, %v1116_v45  ;;  %v1021_v58 = vpop.permute.xlu0 %1020  ;;  %v4822_v0 = vcombine.low %v747_v57, %v747_v57  ;;  %v4823_v2 = vcombine.high %v747_v57, %v747_v57  ;;  %1599 = vrot.lane.b32.xlu1 %v1476_v29, %s5691_s15  ;;  %v1490_v4 = vsel %vm504_vm0, %v1485_v11, %v1489_v33  ;;  %v5382_v19 = vld [vmem:[%s7116_s1 + $0x170] ss:$8 sps:$4 sm:$0xff]   ;;  %v6238_v11 = vld [vmem:[%s5761_s8 + $0xa4] ss:$0 sps:$4 sm:$0x11]  }
  0x91   : > { %v4854_v56 = vcombine.low %v1117_v54, %v1117_v54  ;;  %v4855_v63 = vcombine.high %v1117_v54, %v1117_v54  ;;  %v1062_v6 = vsel %vm729_vm1, %v5587_v5, %v1021_v58  ;;  %v1063_v9 = vsel %vm729_vm1, %v5588_v7, %v1021_v58  ;;  %v6215_v44 = vld [vmem:[%s5761_s8 + $0x98] ss:$0 sps:$4 sm:$0x11]  }
  0x92   : > { %890 = vst [vmem:[#allocation2 + $0x140] sm:$0xf] %v4822_v0  ;;  %891 = vst [vmem:[#allocation2 + $0x154] sm:$0xf] %v4823_v2  ;;  %v1142_v8 = vrot.slane %v1062_v6, 1  ;;  %v1143_v12 = vrot.slane %v1063_v9, 1  ;;  %v698_v13 = vpop.permute.xlu1 %697  ;;  %1603 = vrot.lane.b32.xlu0 %v1490_v4, %s5691_s15 }
  0x93   : > { %1259 = vst [vmem:[#allocation2 + $0x4] sm:$0xf] %v4854_v56  ;;  %1260 = vst [vmem:[#allocation2 + $0x18] sm:$0xf] %v4855_v63  ;;  %v731_v17 = vsel %vm729_vm1, %v5585_v41, %v698_v13  ;;  %v2529_v29 = vsel %vm729_vm1, %v5413_v3, 0  ;;  %v2238_v13 = vsel %vm504_vm0, %v2233_v49, %v2237_v28  ;;  %v1501_v1 = vshll.u32 %v6215_v44, 16 }
  0x94   : > { %v716_v18 = vpop.permute.xlu0 %715  ;;  %v1144_v16 = vsel %vm1114_vm2, %v1142_v8, %v1143_v12  ;;  %v4806_v21 = vcombine.low %v731_v17, %v731_v17  ;;  %v4807_v62 = vcombine.high %v731_v17, %v731_v17  ;;  %2317 = vrot.lane.b32.xlu1 %v2226_v59, %s5691_s15  ;;  %v2603_v34 = vrot.slane %v2529_v29, 1  ;;  %v6220_v59 = vld [vmem:[%s5761_s8 + $0x90] sm:$0xff]   ;;  %v5393_v0 = vld [vmem:[%s7116_s1 + $0x164] ss:$8 sps:$4 sm:$0xff]   ;;  %v5391_v9 = vld [vmem:[%s7116_s1 + $0x160] ss:$8 sps:$4 sm:$0xff]  }
  0x95   : > { %v749_v22 = vsel %vm729_vm1, %v5587_v5, %v716_v18  ;;  %v4872_v23 = vcombine.low %v1144_v16, %v1144_v16  ;;  %v4873_v24 = vcombine.high %v1144_v16, %v1144_v16  ;;  %v1494_v60 = vshrl.u32 %v6220_v59, 16  ;;  %v5385_v7 = vld [vmem:[%s7116_s1 + $0x270] ss:$8 sps:$4 sm:$0xff]   ;;  %v5596_v29 = vld [vmem:[%s5761_s8 + $0x84] sm:$0xff]  }
  0x96   : > { %v4824_v25 = vcombine.low %v749_v22, %v749_v22  ;;  %v4825_v26 = vcombine.high %v749_v22, %v749_v22  ;;  %874 = vst [vmem:[#allocation2] sm:$0xf] %v4806_v21  ;;  %875 = vst [vmem:[#allocation2 + $0x14] sm:$0xf] %v4807_v62  ;;  %v1005_v55 = vpop.permute.xlu1 %1004  ;;  %v2604_v50 = vsel %vm1114_vm2, %v2602_v38, %v2603_v34  ;;  %v5375_v54 = vld [vmem:[#allocation2 + $0x144] ss:$20 sps:$4 sm:$0xff]   ;;  %2319 = vrot.lane.b32.xlu0 %v2238_v13, %s5691_s15 }
  0x97   : > { %1277 = vst [vmem:[#allocation2 + $0x16c] sm:$0xf] %v4872_v23  ;;  %1278 = vst [vmem:[#allocation2 + $0x180] sm:$0xf] %v4873_v24  ;;  %v1038_v30 = vsel %vm729_vm1, %v5589_v15, %v1005_v55  ;;  %v1039_v36 = vsel %vm729_vm1, %v5590_v32, %v1005_v55  ;;  %v5018_v57 = vcombine.low %v2604_v50, %v2604_v50  ;;  %3864 = vmatprep.mubr.bf16.mxu1 %v5375_v54  ;;  %v5594_v21 = vld [vmem:[%s5761_s8 + $0x18] sm:$0xff]  }
  0x98   : > { %892 = vst [vmem:[#allocation2 + $0x168] sm:$0xf] %v4824_v25  ;;  %893 = vst [vmem:[#allocation2 + $0x17c] sm:$0xf] %v4825_v26  ;;  %v1023_v37 = vpop.permute.xlu0 %1022  ;;  %v1118_v31 = vrot.slane %v1038_v30, 1  ;;  %v1119_v39 = vrot.slane %v1039_v36, 1  ;;  %1605 = vrot.lane.b32.xlu1 %v1491_v53, %s5691_s15  ;;  %v5019_v58 = vcombine.high %v2604_v50, %v2604_v50 }
  0x99   : > { %v1065_v41 = vsel %vm729_vm1, %v5591_v40, %v1023_v37  ;;  %v1066_v43 = vsel %vm729_vm1, %v5592_v42, %v1023_v37  ;;  %v5373_v47 = vld [vmem:[#allocation2 + $0x140] ss:$20 sps:$4 sm:$0xff]   ;;  %2736 = vst [vmem:[#allocation2 + $0x1a0] sm:$0xf] %v5018_v57  ;;  %v1496_v33 = vshll.u32 %v6220_v59, 16  ;;  %v1505_v14 = vshrl.u32 %v6215_v44, 16 }
  0x9a   : > { %v1145_v45 = vrot.slane %v1065_v41, 1  ;;  %v1146_v46 = vrot.slane %v1066_v43, 1  ;;  %v1120_v51 = vsel %vm1114_vm2, %v1118_v31, %v1119_v39  ;;  %v700_v52 = vpop.permute.xlu1 %699  ;;  %2737 = vst [vmem:[#allocation2 + $0x1b4] sm:$0xf] %v5019_v58  ;;  %3865 = vmatmul.mubr.bf16.vlgmr.msra.gmra.mxu1 %v5373_v47  ;;  %v5381_v48 = vld [vmem:[#allocation2 + $0x4] ss:$20 sps:$4 sm:$0xff]  }
  0x9b   : > { %v4856_v35 = vcombine.low %v1120_v51, %v1120_v51  ;;  %v4857_v53 = vcombine.high %v1120_v51, %v1120_v51  ;;  %v733_v56 = vsel %vm729_vm1, %v5589_v15, %v700_v52  ;;  %3946 = vmatpush1.bf16.msra.mxu1 %v5382_v19  ;;  %v2240_v16 = vshrl.u32 %v6235_v10, 16  ;;  %v5595_v22 = vld [vmem:[%s5761_s8 + $0x20] ss:$0 sps:$4 sm:$0x11]   ;;  %v5402_v26 = vld [vmem:[%s7116_s1 + $0x154] ss:$8 sps:$4 sm:$0xff]   ;;  %3784 = vmatprep.mubr.bf16.mxu0 %v5381_v48 }
  0x9c   : > { %v1147_v61 = vsel %vm1114_vm2, %v1145_v45, %v1146_v46  ;;  %v718_v63 = vpop.permute.xlu0 %717  ;;  %v4808_v5 = vcombine.low %v733_v56, %v733_v56  ;;  %v4809_v6 = vcombine.high %v733_v56, %v733_v56  ;;  %3947 = vmatprep.subr.bf16.mxu1 %v5393_v0  ;;  %v1498_v55 = vrot.slane %v1496_v33, 1  ;;  %v5597_v30 = vld [vmem:[%s5761_s8 + $0x8c] ss:$0 sps:$4 sm:$0x11]   ;;  %v5400_v36 = vld [vmem:[%s7116_s1 + $0x150] ss:$8 sps:$4 sm:$0xff]   ;;  %1609 = vrot.lane.b32.xlu0 %v1505_v14, %s5691_s15 }
  0x9d   : > { %v4874_v2 = vcombine.low %v1147_v61, %v1147_v61  ;;  %v4875_v3 = vcombine.high %v1147_v61, %v1147_v61  ;;  %1261 = vst [vmem:[#allocation2 + $0x2c] sm:$0xf] %v4856_v35  ;;  %1262 = vst [vmem:[#allocation2 + $0x40] sm:$0xf] %v4857_v53  ;;  %v751_v8 = vsel %vm729_vm1, %v5591_v40, %v718_v63  ;;  %v5379_v12 = vld [vmem:[#allocation2] ss:$20 sps:$4 sm:$0xff]  }
  0x9e   : > { %876 = vst [vmem:[#allocation2 + $0x28] sm:$0xf] %v4808_v5  ;;  %877 = vst [vmem:[#allocation2 + $0x3c] sm:$0xf] %v4809_v6  ;;  %v4826_v17 = vcombine.low %v751_v8, %v751_v8  ;;  %v4827_v18 = vcombine.high %v751_v8, %v751_v8  ;;  %v1007_v20 = vpop.permute.xlu1 %1006  ;;  %v5388_v25 = vld [vmem:[#allocation2 + $0x16c] ss:$20 sps:$4 sm:$0xff]   ;;  %3785 = vmatmul.mubr.bf16.vlgmr.msra.gmra.mxu0 %v5379_v12  ;;  %v1499_v40 = vor.u32 %v1498_v55, %v1494_v60 }
  0x9f   : > { %1279 = vst [vmem:[#allocation2 + $0x194] sm:$0xf] %v4874_v2  ;;  %1280 = vst [vmem:[#allocation2 + $0x1a8] sm:$0xf] %v4875_v3  ;;  %v1041_v62 = vsel %vm729_vm1, %v5594_v21, %v1007_v20  ;;  %v1042_v23 = vsel %vm729_vm1, %v5595_v22, %v1007_v20  ;;  %v1503_v4 = vrot.slane %v1501_v1, 1  ;;  %3874 = vmatprep.mubr.bf16.mxu1 %v5388_v25  ;;  %v2242_v41 = vshll.u32 %v6235_v10, 16 }
  0xa0   : > { %v1025_v24 = vpop.permute.xlu0 %1024  ;;  %894 = vst [vmem:[#allocation2 + $0x190] sm:$0xf] %v4826_v17  ;;  %895 = vst [vmem:[#allocation2 + $0x1a4] sm:$0xf] %v4827_v18  ;;  %v1121_v27 = vrot.slane %v1041_v62, 1  ;;  %v1122_v28 = vrot.slane %v1042_v23, 1  ;;  %4139 = vmatpush1.bf16.msra.mxu0 %v5385_v7  ;;  %3948 = vmatpush1.bf16.msra.mxu1 %v5391_v9 }
  0xa1   : > { %v1068_v15 = vsel %vm729_vm1, %v5596_v29, %v1025_v24  ;;  %v1069_v32 = vsel %vm729_vm1, %v5597_v30, %v1025_v24  ;;  %v5403_v37 = vld [vmem:[%s7116_s1 + $0x260] ss:$8 sps:$4 sm:$0xff]   ;;  %v5405_v38 = vld [vmem:[%s7116_s1 + $0x264] ss:$8 sps:$4 sm:$0xff]   ;;  %v2247_v44 = vshll.u32 %v6238_v11, 16  ;;  %v6277_v45 = vsel %vm729_vm1, %v6235_v10, 0  ;;  %3949 = vmatprep.subr.bf16.mxu1 %v5402_v26 }
  0xa2   : > { %v1148_v34 = vrot.slane %v1068_v15, 1  ;;  %v1149_v31 = vrot.slane %v1069_v32, 1  ;;  %v5390_v39 = vld [vmem:[#allocation2 + $0x168] ss:$20 sps:$4 sm:$0xff]   ;;  %v1123_v42 = vsel %vm1114_vm2, %v1121_v27, %v1122_v28  ;;  %v702_v43 = vpop.permute.xlu1 %701  ;;  %v5411_v19 = vld [vmem:[%s7116_s1 + $0x144] ss:$8 sps:$4 sm:$0xff]   ;;  %4140 = vmatprep.subr.bf16.mxu0 %v5405_v38  ;;  %v1504_v56 = vsel %vm504_vm0, %v1499_v40, %v1503_v4 }
  0xa3   : > { %v6281_v46 = vsel %vm729_vm1, %v6238_v11, 0  ;;  %v4858_v47 = vcombine.low %v1123_v42, %v1123_v42  ;;  %v4859_v49 = vcombine.high %v1123_v42, %v1123_v42  ;;  %v735_v51 = vsel %vm729_vm1, %v5594_v21, %v702_v43  ;;  %v5409_v60 = vld [vmem:[%s7116_s1 + $0x140] ss:$8 sps:$4 sm:$0xff]   ;;  %v5423_v35 = vld [vmem:[%s7116_s1 + $0x254] ss:$8 sps:$4 sm:$0xff]   ;;  %3875 = vmatmul.mubr.bf16.gmra.mxu1 %v5390_v39  ;;  %1607 = vrot.lane.b32.xlu1 %v1504_v56, %s5691_s15 }
  0xa4   : > { %v1150_v50 = vsel %vm1114_vm2, %v1148_v34, %v1149_v31  ;;  %v720_v52 = vpop.permute.xlu0 %719  ;;  %v4810_v58 = vcombine.low %v735_v51, %v735_v51  ;;  %v4811_v59 = vcombine.high %v735_v51, %v735_v51  ;;  %v5397_v61 = vld [vmem:[#allocation2 + $0x2c] ss:$20 sps:$4 sm:$0xff]   ;;  %v5420_v63 = vld [vmem:[%s7116_s1 + $0x134] ss:$8 sps:$4 sm:$0xff]   ;;  %v2244_v0 = vrot.slane %v2242_v41, 1  ;;  %3950 = vmatpush1.bf16.msra.mxu1 %v5400_v36  ;;  %4141 = vmatpush1.bf16.msra.mxu0 %v5403_v37  ;;  %v5598_v12 = vld [vmem:[%s5761_s8 + $0x24] sm:$0xff]  }
  0xa5   : > { %v4876_v54 = vcombine.low %v1150_v50, %v1150_v50  ;;  %v4877_v57 = vcombine.high %v1150_v50, %v1150_v50  ;;  %1263 = vst [vmem:[#allocation2 + $0x54] sm:$0xf] %v4858_v47  ;;  %1264 = vst [vmem:[#allocation2 + $0x68] sm:$0xf] %v4859_v49  ;;  %v753_v53 = vsel %vm729_vm1, %v5596_v29, %v720_v52  ;;  %v2249_v2 = vrot.slane %v2247_v44, 1  ;;  %v6312_v14 = vld [vmem:[%s5761_s8 + $0x9c] sm:$0xff]  }
  0xa6   : > { %878 = vst [vmem:[#allocation2 + $0x50] sm:$0xf] %v4810_v58  ;;  %879 = vst [vmem:[#allocation2 + $0x64] sm:$0xf] %v4811_v59  ;;  %v4828_v3 = vcombine.low %v753_v53, %v753_v53  ;;  %v4829_v5 = vcombine.high %v753_v53, %v753_v53  ;;  %v1009_v6 = vpop.permute.xlu1 %1008  ;;  %v5399_v7 = vld [vmem:[#allocation2 + $0x28] ss:$20 sps:$4 sm:$0xff]   ;;  %3794 = vmatprep.mubr.bf16.mxu0 %v5397_v61  ;;  %3951 = vmatprep.subr.bf16.mxu1 %v5411_v19 }
  0xa7   : > { %1281 = vst [vmem:[#allocation2 + $0x1bc] sm:$0xf] %v4876_v54  ;;  %1282 = vst [vmem:[#allocation2 + $0x1d0] sm:$0xf] %v4877_v57  ;;  %v5421_v9 = vld [vmem:[%s7116_s1 + $0x250] ss:$8 sps:$4 sm:$0xff]   ;;  %v1044_v13 = vsel %vm729_vm1, %v5598_v12, %v1009_v6  ;;  %v2245_v20 = vor.u32 %v2244_v0, %v2240_v16  ;;  %4142 = vmatprep.subr.bf16.mxu0 %v5423_v35  ;;  %3795 = vmatmul.mubr.bf16.gmra.mxu0 %v5399_v7 }
  0xa8   : > { %v2605_v11 = vrot.slane %v6277_v45, 1  ;;  %v2606_v8 = vrot.slane %v6281_v46, 1  ;;  %v5599_v33 = vld [vmem:[%s5761_s8 + $0x2c] ss:$0 sps:$4 sm:$0x11]   ;;  %v1027_v17 = vpop.permute.xlu0 %1026  ;;  %v1508_v21 = vshrl.u32 %v6312_v14, 16  ;;  %3952 = vmatpush1.bf16.msra.mxu1 %v5409_v60  ;;  %4143 = vmatpush1.bf16.msra.mxu0 %v5421_v9 }
  0xa9   : > { %v1045_v1 = vsel %vm729_vm1, %v5599_v33, %v1009_v6  ;;  %v5406_v18 = vld [vmem:[#allocation2 + $0x194] ss:$20 sps:$4 sm:$0xff]   ;;  %v6309_v48 = vld [vmem:[%s5761_s8 + $0xa4] ss:$0 sps:$4 sm:$0x11]   ;;  %v1124_v62 = vrot.slane %v1044_v13, 1  ;;  %v2250_v28 = vsel %vm504_vm0, %v2245_v20, %v2249_v2  ;;  %3953 = vmatprep.subr.bf16.mxu1 %v5420_v63 }
  0xaa   : > { %896 = vst [vmem:[#allocation2 + $0x1b8] sm:$0xf] %v4828_v3  ;;  %897 = vst [vmem:[#allocation2 + $0x1cc] sm:$0xf] %v4829_v5  ;;  %v1125_v22 = vrot.slane %v1045_v1, 1  ;;  %v5601_v23 = vld [vmem:[%s5761_s8 + $0x90] sm:$0xff]   ;;  %3884 = vmatprep.mubr.bf16.mxu1 %v5406_v18  ;;  %v2607_v29 = vsel %vm1114_vm2, %v2605_v11, %v2606_v8  ;;  %v704_v30 = vpop.permute.xlu1 %703  ;;  %2321 = vrot.lane.b32.xlu1 %v2250_v28, %s5691_s15 }
  0xab   : > { %v1071_v24 = vsel %vm729_vm1, %v5601_v23, %v1027_v17  ;;  %v5602_v25 = vld [vmem:[%s5761_s8 + $0x98] ss:$0 sps:$4 sm:$0x11]   ;;  %v5441_v16 = vld [vmem:[%s7116_s1 + $0x244] ss:$8 sps:$4 sm:$0xff]   ;;  %v5020_v36 = vcombine.low %v2607_v29, %v2607_v29  ;;  %v5021_v37 = vcombine.high %v2607_v29, %v2607_v29  ;;  %v1510_v38 = vshll.u32 %v6312_v14, 16 }
  0xac   : > { %v1072_v26 = vsel %vm729_vm1, %v5602_v25, %v1027_v17  ;;  %v5418_v10 = vld [vmem:[%s7116_s1 + $0x130] ss:$8 sps:$4 sm:$0xff]   ;;  %v1151_v55 = vrot.slane %v1071_v24, 1  ;;  %v1126_v15 = vsel %vm1114_vm2, %v1124_v62, %v1125_v22  ;;  %v5429_v32 = vld [vmem:[%s7116_s1 + $0x124] ss:$8 sps:$4 sm:$0xff]   ;;  %v737_v41 = vsel %vm729_vm1, %v5598_v12, %v704_v30  ;;  %v722_v42 = vpop.permute.xlu0 %721  ;;  %4144 = vmatprep.subr.bf16.mxu0 %v5441_v16  ;;  %v5605_v12 = vld [vmem:[%s5761_s8 + $0x9c] sm:$0xff]  }
  0xad   : > { %v1152_v4 = vrot.slane %v1072_v26, 1  ;;  %v5408_v27 = vld [vmem:[#allocation2 + $0x190] ss:$20 sps:$4 sm:$0xff]   ;;  %v5439_v34 = vld [vmem:[%s7116_s1 + $0x240] ss:$8 sps:$4 sm:$0xff]   ;;  %v4860_v31 = vcombine.low %v1126_v15, %v1126_v15  ;;  %v4861_v39 = vcombine.high %v1126_v15, %v1126_v15  ;;  %v4812_v45 = vcombine.low %v737_v41, %v737_v41  ;;  %3954 = vmatpush1.bf16.msra.mxu1 %v5418_v10 }
  0xae   : > { %v6339_v43 = vld [vmem:[%s5761_s8 + $0xa8] sm:$0xff]   ;;  %v4813_v46 = vcombine.high %v737_v41, %v737_v41  ;;  %2738 = vst [vmem:[#allocation2 + $0x1c8] sm:$0xf] %v5020_v36  ;;  %2739 = vst [vmem:[#allocation2 + $0x1dc] sm:$0xf] %v5021_v37  ;;  %v755_v51 = vsel %vm729_vm1, %v5601_v23, %v722_v42  ;;  %3885 = vmatmul.mubr.bf16.gmra.mxu1 %v5408_v27  ;;  %v1512_v54 = vrot.slane %v1510_v38, 1  ;;  %v1011_v35 = vpop.permute.xlu1 %1010  ;;  %4145 = vmatpush1.bf16.msra.mxu0 %v5439_v34 }
  0xaf   : > { %v1153_v40 = vsel %vm1114_vm2, %v1151_v55, %v1152_v4  ;;  %v5427_v47 = vld [vmem:[%s7116_s1 + $0x120] ss:$8 sps:$4 sm:$0xff]   ;;  %v6346_v49 = vld [vmem:[%s5761_s8 + $0xb0] ss:$0 sps:$4 sm:$0x11]   ;;  %v1515_v57 = vshll.u32 %v6309_v48, 16  ;;  %v4830_v59 = vcombine.low %v755_v51, %v755_v51  ;;  %v4831_v60 = vcombine.high %v755_v51, %v755_v51  ;;  %3955 = vmatprep.subr.bf16.mxu1 %v5429_v32 }
  0xb0   : > { %v4878_v19 = vcombine.low %v1153_v40, %v1153_v40  ;;  %v4879_v44 = vcombine.high %v1153_v40, %v1153_v40  ;;  %v5459_v50 = vld [vmem:[%s7116_s1 + $0x234] ss:$8 sps:$4 sm:$0xff]   ;;  %1265 = vst [vmem:[#allocation2 + $0x7c] sm:$0xf] %v4860_v31  ;;  %1266 = vst [vmem:[#allocation2 + $0x90] sm:$0xf] %v4861_v39  ;;  %v1029_v5 = vpop.permute.xlu0 %1028  ;;  %v1513_v7 = vor.u32 %v1512_v54, %v1508_v21 }
  0xb1   : > { %v5415_v52 = vld [vmem:[#allocation2 + $0x54] ss:$20 sps:$4 sm:$0xff]   ;;  %880 = vst [vmem:[#allocation2 + $0x78] sm:$0xf] %v4812_v45  ;;  %881 = vst [vmem:[#allocation2 + $0x8c] sm:$0xf] %v4813_v46  ;;  %v1074_v13 = vsel %vm729_vm1, %v5605_v12, %v1029_v5  ;;  %4146 = vmatprep.subr.bf16.mxu0 %v5459_v50  ;;  %3956 = vmatpush1.bf16.msra.mxu1 %v5427_v47 }
  0xb2   : > { %v5438_v58 = vld [vmem:[%s7116_s1 + $0x114] ss:$8 sps:$4 sm:$0xff]   ;;  %1283 = vst [vmem:[#allocation2 + $0x1e4] sm:$0xf] %v4878_v19  ;;  %1284 = vst [vmem:[#allocation2 + $0x1f8] sm:$0xf] %v4879_v44  ;;  %3804 = vmatprep.mubr.bf16.mxu0 %v5415_v52  ;;  %v706_v23 = vpop.permute.xlu1 %705 }
  0xb3   : > { %v5417_v53 = vld [vmem:[#allocation2 + $0x50] ss:$20 sps:$4 sm:$0xff]   ;;  %v1519_v61 = vshrl.u32 %v6309_v48, 16  ;;  %v2252_v56 = vshrl.u32 %v6339_v43, 16  ;;  %v1517_v9 = vrot.slane %v1515_v57, 1  ;;  %v1154_v20 = vrot.slane %v1074_v13, 1  ;;  %3957 = vmatprep.subr.bf16.mxu1 %v5438_v58 }
  0xb4   : > { %v5603_v63 = vld [vmem:[%s5761_s8 + $0x30] sm:$0xff]   ;;  %v5604_v2 = vld [vmem:[%s5761_s8 + $0x38] ss:$0 sps:$4 sm:$0x11]   ;;  %898 = vst [vmem:[#allocation2 + $0x1e0] sm:$0xf] %v4830_v59  ;;  %3805 = vmatmul.mubr.bf16.gmra.mxu0 %v5417_v53  ;;  %v724_v27 = vpop.permute.xlu0 %723 }
  0xb5   : > { %v1047_v0 = vsel %vm729_vm1, %v5603_v63, %v1011_v35  ;;  %v1048_v3 = vsel %vm729_vm1, %v5604_v2, %v1011_v35  ;;  %v5424_v6 = vld [vmem:[#allocation2 + $0x1bc] ss:$20 sps:$4 sm:$0xff]   ;;  %899 = vst [vmem:[#allocation2 + $0x1f4] sm:$0xf] %v4831_v60  ;;  %1613 = vrot.lane.b32.xlu1 %v1519_v61, %s5691_s15  ;;  %v5426_v14 = vld [vmem:[#allocation2 + $0x1b8] ss:$20 sps:$4 sm:$0xff]   ;;  %v1518_v21 = vsel %vm504_vm0, %v1513_v7, %v1517_v9 }
  0xb6   : > { %v1127_v11 = vrot.slane %v1047_v0, 1  ;;  %v1128_v8 = vrot.slane %v1048_v3, 1  ;;  %v5606_v33 = vld [vmem:[%s5761_s8 + $0xa4] ss:$0 sps:$4 sm:$0x11]   ;;  %3894 = vmatprep.mubr.bf16.mxu1 %v5424_v6  ;;  %v2254_v62 = vshll.u32 %v6339_v43, 16  ;;  %1611 = vrot.lane.b32.xlu0 %v1518_v21, %s5691_s15  ;;  %v739_v4 = vsel %vm729_vm1, %v5603_v63, %v706_v23  ;;  %v1013_v42 = vpop.permute.xlu1 %1012 }
  0xb7   : > { %v1075_v1 = vsel %vm729_vm1, %v5606_v33, %v1029_v5  ;;  %v5436_v17 = vld [vmem:[%s7116_s1 + $0x110] ss:$8 sps:$4 sm:$0xff]   ;;  %v2259_v24 = vshll.u32 %v6346_v49, 16  ;;  %v6382_v25 = vsel %vm729_vm1, %v6339_v43, 0  ;;  %v6386_v26 = vsel %vm729_vm1, %v6346_v49, 0  ;;  %3895 = vmatmul.mubr.bf16.gmra.mxu1 %v5426_v14  ;;  %v5607_v47 = vld [vmem:[%s5761_s8 + $0x3c] sm:$0xff]  }
  0xb8   : > { %v5457_v18 = vld [vmem:[%s7116_s1 + $0x230] ss:$8 sps:$4 sm:$0xff]   ;;  %v1155_v48 = vrot.slane %v1075_v1, 1  ;;  %v1129_v22 = vsel %vm1114_vm2, %v1127_v11, %v1128_v8  ;;  %v5447_v28 = vld [vmem:[%s7116_s1 + $0x104] ss:$8 sps:$4 sm:$0xff]   ;;  %v4814_v30 = vcombine.low %v739_v4, %v739_v4  ;;  %v4815_v32 = vcombine.high %v739_v4, %v739_v4  ;;  %3958 = vmatpush1.bf16.msra.mxu1 %v5436_v17  ;;  %v1031_v52 = vpop.permute.xlu0 %1030 }
  0xb9   : > { %v4862_v10 = vcombine.low %v1129_v22, %v1129_v22  ;;  %v4863_v16 = vcombine.high %v1129_v22, %v1129_v22  ;;  %v5445_v36 = vld [vmem:[%s7116_s1 + $0x100] ss:$8 sps:$4 sm:$0xff]   ;;  %4147 = vmatpush1.bf16.msra.mxu0 %v5457_v18  ;;  %v757_v37 = vsel %vm729_vm1, %v5605_v12, %v724_v27  ;;  %v5433_v38 = vld [vmem:[#allocation2 + $0x7c] ss:$20 sps:$4 sm:$0xff]   ;;  %v2256_v34 = vrot.slane %v2254_v62, 1  ;;  %3959 = vmatprep.subr.bf16.mxu1 %v5447_v28  ;;  %v6439_v21 = vld [vmem:[%s5761_s8 + $0xb4] sm:$0xff]  }
  0xba   : > { %v1156_v55 = vsel %vm1114_vm2, %v1154_v20, %v1155_v48  ;;  %v2261_v31 = vrot.slane %v2259_v24, 1  ;;  %v5456_v39 = vld [vmem:[%s7116_s1 + $0x1f4] ss:$8 sps:$4 sm:$0xff]   ;;  %882 = vst [vmem:[#allocation2 + $0xa0] sm:$0xf] %v4814_v30  ;;  %v4832_v40 = vcombine.low %v757_v37, %v757_v37  ;;  %v4833_v41 = vcombine.high %v757_v37, %v757_v37  ;;  %3814 = vmatprep.mubr.bf16.mxu0 %v5433_v38  ;;  %v6415_v59 = vld [vmem:[%s5761_s8 + $0xa8] sm:$0xff]   ;;  %v708_v12 = vpop.permute.xlu1 %707 }
  0xbb   : > { %v4880_v29 = vcombine.low %v1156_v55, %v1156_v55  ;;  %v4881_v15 = vcombine.high %v1156_v55, %v1156_v55  ;;  %1267 = vst [vmem:[#allocation2 + $0xa4] sm:$0xf] %v4862_v10  ;;  %1268 = vst [vmem:[#allocation2 + $0xb8] sm:$0xf] %v4863_v16  ;;  %v5435_v19 = vld [vmem:[#allocation2 + $0x78] ss:$20 sps:$4 sm:$0xff]   ;;  %v1050_v49 = vsel %vm729_vm1, %v5607_v47, %v1013_v42 }
  0xbc   : > { %883 = vst [vmem:[#allocation2 + $0xb4] sm:$0xf] %v4815_v32  ;;  %v2608_v44 = vrot.slane %v6382_v25, 1  ;;  %v2609_v45 = vrot.slane %v6386_v26, 1  ;;  %v5477_v46 = vld [vmem:[%s7116_s1 + $0x224] ss:$8 sps:$4 sm:$0xff]   ;;  %v2257_v57 = vor.u32 %v2256_v34, %v2252_v56  ;;  %3815 = vmatmul.mubr.bf16.gmra.mxu0 %v5435_v19  ;;  %3960 = vmatpush1.bf16.msra.mxu1 %v5445_v36  ;;  %v741_v48 = vsel %vm729_vm1, %v5607_v47, %v708_v12  ;;  %v726_v14 = vpop.permute.xlu0 %725 }
  0xbd   : > { %1285 = vst [vmem:[#allocation2 + $0x20c] sm:$0xf] %v4880_v29  ;;  %1286 = vst [vmem:[#allocation2 + $0x220] sm:$0xf] %v4881_v15  ;;  %v5442_v54 = vld [vmem:[#allocation2 + $0x1e4] ss:$20 sps:$4 sm:$0xff]   ;;  %4148 = vmatprep.subr.bf16.mxu0 %v5477_v46  ;;  %3961 = vmatprep.subr.bf16.mxu1 %v5456_v39  ;;  %v4816_v23 = vcombine.low %v741_v48, %v741_v48  ;;  %v4817_v24 = vcombine.high %v741_v48, %v741_v48 }
  0xbe   : > { %v5608_v50 = vld [vmem:[%s5761_s8 + $0x44] ss:$0 sps:$4 sm:$0x11]   ;;  %v6412_v58 = vld [vmem:[%s5761_s8 + $0xb0] ss:$0 sps:$4 sm:$0x11]   ;;  %3904 = vmatprep.mubr.bf16.mxu1 %v5442_v54  ;;  %v2262_v7 = vsel %vm504_vm0, %v2257_v57, %v2261_v31  ;;  %v2610_v9 = vsel %vm1114_vm2, %v2608_v44, %v2609_v45  ;;  %v1015_v29 = vpop.permute.xlu1 %1014 }
  0xbf   : > { %v1051_v51 = vsel %vm729_vm1, %v5608_v50, %v1013_v42  ;;  %v1522_v60 = vshrl.u32 %v6415_v59, 16  ;;  %900 = vst [vmem:[#allocation2 + $0x208] sm:$0xf] %v4832_v40  ;;  %901 = vst [vmem:[#allocation2 + $0x21c] sm:$0xf] %v4833_v41  ;;  %v1130_v35 = vrot.slane %v1050_v49, 1  ;;  %v5022_v13 = vcombine.low %v2610_v9, %v2610_v9  ;;  %2323 = vrot.lane.b32.xlu0 %v2262_v7, %s5691_s15 }
  0xc0   : > { %v1131_v53 = vrot.slane %v1051_v51, 1  ;;  %v5610_v61 = vld [vmem:[%s5761_s8 + $0xa8] sm:$0xff]   ;;  %v5611_v0 = vld [vmem:[%s5761_s8 + $0xb0] ss:$0 sps:$4 sm:$0x11]   ;;  %v5023_v33 = vcombine.high %v2610_v9, %v2610_v9  ;;  %v1524_v1 = vshll.u32 %v6415_v59, 16  ;;  %v1033_v41 = vpop.permute.xlu0 %1032 }
  0xc1   : > { %v1077_v63 = vsel %vm729_vm1, %v5610_v61, %v1031_v52  ;;  %v1078_v2 = vsel %vm729_vm1, %v5611_v0, %v1031_v52  ;;  %v5454_v43 = vld [vmem:[%s7116_s1 + $0x1f0] ss:$8 sps:$4 sm:$0xff]   ;;  %v5475_v56 = vld [vmem:[%s7116_s1 + $0x220] ss:$8 sps:$4 sm:$0xff]   ;;  %v5465_v11 = vld [vmem:[%s7116_s1 + $0x1e4] ss:$8 sps:$4 sm:$0xff]   ;;  %v759_v10 = vsel %vm729_vm1, %v5610_v61, %v726_v14 }
  0xc2   : > { %v1157_v3 = vrot.slane %v1077_v63, 1  ;;  %v1158_v5 = vrot.slane %v1078_v2, 1  ;;  %v5444_v6 = vld [vmem:[#allocation2 + $0x1e0] ss:$20 sps:$4 sm:$0xff]   ;;  %v1132_v8 = vsel %vm1114_vm2, %v1130_v35, %v1131_v53  ;;  %2740 = vst [vmem:[#allocation2 + $0x1f0] sm:$0xf] %v5022_v13  ;;  %4149 = vmatpush1.bf16.msra.mxu0 %v5475_v56  ;;  %v4834_v27 = vcombine.low %v759_v10, %v759_v10  ;;  %3962 = vmatpush2.bf16.msra.mxu1 %v5454_v43 }
  0xc3   : > { %v4864_v17 = vcombine.low %v1132_v8, %v1132_v8  ;;  %v4865_v18 = vcombine.high %v1132_v8, %v1132_v8  ;;  %2741 = vst [vmem:[#allocation2 + $0x204] sm:$0xf] %v5023_v33  ;;  %v5463_v25 = vld [vmem:[%s7116_s1 + $0x1e0] ss:$8 sps:$4 sm:$0xff]   ;;  %3905 = vmatmul.mubr.bf16.gmra.mxu1 %v5444_v6  ;;  %v1526_v16 = vrot.slane %v1524_v1, 1  ;;  %v1529_v55 = vshll.u32 %v6412_v58, 16  ;;  %3963 = vmatprep.subr.bf16.mxu1 %v5465_v11 }
  0xc4   : > { %v1159_v20 = vsel %vm1114_vm2, %v1157_v3, %v1158_v5  ;;  %v6445_v26 = vld [vmem:[%s5761_s8 + $0xbc] ss:$0 sps:$4 sm:$0x11]   ;;  %v5451_v4 = vld [vmem:[#allocation2 + $0xa4] ss:$20 sps:$4 sm:$0xff]   ;;  %v4835_v28 = vcombine.high %v759_v10, %v759_v10  ;;  %v1533_v30 = vshrl.u32 %v6412_v58, 16  ;;  %v728_v5 = vpop.permute.xlu0 %727 }
  0xc5   : > { %v4882_v62 = vcombine.low %v1159_v20, %v1159_v20  ;;  %v4883_v22 = vcombine.high %v1159_v20, %v1159_v20  ;;  %1269 = vst [vmem:[#allocation2 + $0xcc] sm:$0xf] %v4864_v17  ;;  %1270 = vst [vmem:[#allocation2 + $0xe0] sm:$0xf] %v4865_v18  ;;  %v5453_v15 = vld [vmem:[#allocation2 + $0xa0] ss:$20 sps:$4 sm:$0xff]   ;;  %v1527_v39 = vor.u32 %v1526_v16, %v1522_v60  ;;  %3824 = vmatprep.mubr.bf16.mxu0 %v5451_v4  ;;  %v710_v60 = vpop.permute.xlu1 %709 }
  0xc6   : > { %884 = vst [vmem:[#allocation2 + $0xc8] sm:$0xf] %v4816_v23  ;;  %885 = vst [vmem:[#allocation2 + $0xdc] sm:$0xf] %v4817_v24  ;;  %v2264_v32 = vshrl.u32 %v6439_v21, 16  ;;  %v5612_v37 = vld [vmem:[%s5761_s8 + $0x48] sm:$0xff]   ;;  %1617 = vrot.lane.b32.xlu0 %v1533_v30, %s5691_s15  ;;  %3825 = vmatmul.mubr.bf16.gmra.mxu0 %v5453_v15 }
  0xc7   : > { %1287 = vst [vmem:[#allocation2 + $0x234] sm:$0xf] %v4882_v62  ;;  %1288 = vst [vmem:[#allocation2 + $0x248] sm:$0xf] %v4883_v22  ;;  %v5473_v36 = vld [vmem:[%s7116_s1 + $0x1d4] ss:$8 sps:$4 sm:$0xff]   ;;  %v1053_v38 = vsel %vm729_vm1, %v5612_v37, %v1015_v29  ;;  %3964 = vmatpush2.bf16.msra.mxu1 %v5463_v25  ;;  %v743_v3 = vsel %vm729_vm1, %v5612_v37, %v710_v60 }
  0xc8   : > { %v5613_v34 = vld [vmem:[%s5761_s8 + $0x50] ss:$0 sps:$4 sm:$0x11]   ;;  %v1531_v40 = vrot.slane %v1529_v55, 1  ;;  %v5460_v42 = vld [vmem:[#allocation2 + $0x20c] ss:$20 sps:$4 sm:$0xff]   ;;  %3965 = vmatprep.subr.bf16.mxu1 %v5473_v36  ;;  %v4818_v8 = vcombine.low %v743_v3, %v743_v3  ;;  %v4819_v12 = vcombine.high %v743_v3, %v743_v3 }
  0xc9   : > { %v1054_v31 = vsel %vm729_vm1, %v5613_v34, %v1015_v29  ;;  %902 = vst [vmem:[#allocation2 + $0x230] sm:$0xf] %v4834_v27  ;;  %903 = vst [vmem:[#allocation2 + $0x244] sm:$0xf] %v4835_v28  ;;  %v1133_v19 = vrot.slane %v1053_v38, 1  ;;  %v5614_v45 = vld [vmem:[%s5761_s8 + $0xb4] sm:$0xff]   ;;  %3914 = vmatprep.mubr.bf16.mxu1 %v5460_v42  ;;  %v1017_v22 = vpop.permute.xlu1 %1016  ;;  %v712_v29 = vpop.permute.xlu0 %711 }
  0xca   : > { %v1134_v44 = vrot.slane %v1054_v31, 1  ;;  %v1080_v46 = vsel %vm729_vm1, %v5614_v45, %v1033_v41  ;;  %v5615_v47 = vld [vmem:[%s5761_s8 + $0xbc] ss:$0 sps:$4 sm:$0x11]   ;;  %v5471_v51 = vld [vmem:[%s7116_s1 + $0x1d0] ss:$8 sps:$4 sm:$0xff]   ;;  %v1532_v52 = vsel %vm504_vm0, %v1527_v39, %v1531_v40  ;;  %v761_v33 = vsel %vm729_vm1, %v5614_v45, %v728_v5 }
  0xcb   : > { %v1081_v49 = vsel %vm729_vm1, %v5615_v47, %v1033_v41  ;;  %v5462_v50 = vld [vmem:[#allocation2 + $0x208] ss:$20 sps:$4 sm:$0xff]   ;;  %v1160_v54 = vrot.slane %v1080_v46, 1  ;;  %v2266_v58 = vshll.u32 %v6439_v21, 16  ;;  %1615 = vrot.lane.b32.xlu1 %v1532_v52, %s5691_s15  ;;  %v2271_v35 = vshll.u32 %v6445_v26, 16  ;;  %v5616_v23 = vld [vmem:[%s5761_s8 + $0xb4] sm:$0xff]   ;;  %3966 = vmatpush2.bf16.msra.mxu1 %v5471_v51 }
  0xcc   : > { %v1161_v57 = vrot.slane %v1081_v49, 1  ;;  %v1135_v59 = vsel %vm1114_vm2, %v1133_v19, %v1134_v44  ;;  %v2534_v53 = vsel %vm729_vm1, %v6439_v21, 0  ;;  %v2535_v61 = vsel %vm729_vm1, %v6445_v26, 0  ;;  %v6478_v63 = vld [vmem:[%s5761_s8 + $0xbc] ss:$0 sps:$4 sm:$0x11]   ;;  %3915 = vmatmul.mubr.bf16.gmra.mxu1 %v5462_v50 }
  0xcd   : > { %v5493_v0 = vld [vmem:[%s7116_s1 + $0x210] ss:$8 sps:$4 sm:$0xff]   ;;  %v4866_v2 = vcombine.low %v1135_v59, %v1135_v59  ;;  %v4867_v43 = vcombine.high %v1135_v59, %v1135_v59  ;;  %v5483_v6 = vld [vmem:[%s7116_s1 + $0x1c4] ss:$8 sps:$4 sm:$0xff]   ;;  %v5495_v7 = vld [vmem:[%s7116_s1 + $0x214] ss:$8 sps:$4 sm:$0xff]   ;;  %v4836_v48 = vcombine.low %v761_v33, %v761_v33  ;;  %v4837_v14 = vcombine.high %v761_v33, %v761_v33  ;;  %v1564_v46 = vpop.permute.xlu1 %1563 }
  0xce   : > { %v1162_v56 = vsel %vm1114_vm2, %v1160_v54, %v1161_v57  ;;  %v5481_v13 = vld [vmem:[%s7116_s1 + $0x1c0] ss:$8 sps:$4 sm:$0xff]   ;;  %v2268_v1 = vrot.slane %v2266_v58, 1  ;;  %v2273_v17 = vrot.slane %v2271_v35, 1  ;;  %v2611_v18 = vrot.slane %v2534_v53, 1  ;;  %4150 = vmatprep.subr.bf16.mxu0 %v5495_v7  ;;  %v5617_v16 = vld [vmem:[%s5761_s8 + $0x54] sm:$0xff]   ;;  %3967 = vmatprep.subr.bf16.mxu1 %v5483_v6  ;;  %v2300_v54 = vpop.permute.xlu0 %2299 }
  0xcf   : > { %v4884_v9 = vcombine.low %v1162_v56, %v1162_v56  ;;  %v4885_v11 = vcombine.high %v1162_v56, %v1162_v56  ;;  %1271 = vst [vmem:[#allocation2 + $0xf4] sm:$0xf] %v4866_v2  ;;  %1272 = vst [vmem:[#allocation2 + $0x108] sm:$0xf] %v4867_v43  ;;  %v5492_v20 = vld [vmem:[%s7116_s1 + $0x1b4] ss:$8 sps:$4 sm:$0xff]   ;;  %4151 = vmatpush1.bf16.msra.mxu0 %v5493_v0  ;;  %v1056_v55 = vsel %vm729_vm1, %v5617_v16, %v1017_v22 }
  0xd0   : > { %886 = vst [vmem:[#allocation2 + $0xf0] sm:$0xf] %v4818_v8  ;;  %887 = vst [vmem:[#allocation2 + $0x104] sm:$0xf] %v4819_v12  ;;  %v2612_v62 = vrot.slane %v2535_v61, 1  ;;  %v1536_v24 = vshrl.u32 %v5616_v23, 16  ;;  %v2269_v10 = vor.u32 %v2268_v1, %v2264_v32  ;;  %v745_v44 = vsel %vm729_vm1, %v5617_v16, %v712_v29  ;;  %3968 = vmatpush2.bf16.msra.mxu1 %v5481_v13 }
  0xd1   : > { %1289 = vst [vmem:[#allocation2 + $0x25c] sm:$0xf] %v4884_v9  ;;  %1290 = vst [vmem:[#allocation2 + $0x270] sm:$0xf] %v4885_v11  ;;  %v5469_v25 = vld [vmem:[#allocation2 + $0xcc] ss:$20 sps:$4 sm:$0xff]   ;;  %v4820_v52 = vcombine.low %v745_v44, %v745_v44  ;;  %3969 = vmatprep.subr.bf16.mxu1 %v5492_v20  ;;  %v4821_v59 = vcombine.high %v745_v44, %v745_v44  ;;  %v1566_v11 = vpop.permute.xlu1 %1565 }
  0xd2   : > { %v5474_v26 = vld [vmem:[#allocation2 + $0xc8] ss:$20 sps:$4 sm:$0xff]   ;;  %v1538_v28 = vshll.u32 %v5616_v23, 16  ;;  %904 = vst [vmem:[#allocation2 + $0x258] sm:$0xf] %v4836_v48  ;;  %v2613_v36 = vsel %vm1114_vm2, %v2611_v18, %v2612_v62  ;;  %v1136_v37 = vrot.slane %v1056_v55, 1  ;;  %3834 = vmatprep.mubr.bf16.mxu0 %v5469_v25  ;;  %v2274_v34 = vsel %vm504_vm0, %v2269_v10, %v2273_v17 }
  0xd3   : > { %v5618_v4 = vld [vmem:[%s5761_s8 + $0x5c] ss:$0 sps:$4 sm:$0x11]   ;;  %v5478_v15 = vld [vmem:[#allocation2 + $0x234] ss:$20 sps:$4 sm:$0xff]   ;;  %v1543_v32 = vshll.u32 %v6478_v63, 16  ;;  %v5024_v31 = vcombine.low %v2613_v36, %v2613_v36  ;;  %v5025_v39 = vcombine.high %v2613_v36, %v2613_v36  ;;  %3835 = vmatmul.mubr.bf16.gmra.mxu0 %v5474_v26  ;;  %2325 = vrot.lane.b32.xlu1 %v2274_v34, %s5691_s15 }
  0xd4   : > { %v1057_v27 = vsel %vm729_vm1, %v5618_v4, %v1017_v22  ;;  %v6506_v30 = vld [vmem:[%s5761_s8 + $0xc8] ss:$0 sps:$4 sm:$0x11]   ;;  %905 = vst [vmem:[#allocation2 + $0x26c] sm:$0xf] %v4837_v14  ;;  %v6511_v38 = vld [vmem:[%s5761_s8 + $0xc0] sm:$0xff]   ;;  %3924 = vmatprep.mubr.bf16.mxu1 %v5478_v15  ;;  %v1570_v14 = vpop.permute.xlu0 %1569 }
  0xd5   : > { %v1137_v21 = vrot.slane %v1057_v27, 1  ;;  %v1540_v40 = vrot.slane %v1538_v28, 1  ;;  %v5480_v41 = vld [vmem:[#allocation2 + $0x230] ss:$20 sps:$4 sm:$0xff]   ;;  %v1545_v19 = vrot.slane %v1543_v32, 1  ;;  %v1547_v45 = vshrl.u32 %v6478_v63, 16 }
  0xd6   : > { %v5490_v47 = vld [vmem:[%s7116_s1 + $0x1b0] ss:$8 sps:$4 sm:$0xff]   ;;  %2742 = vst [vmem:[#allocation2 + $0x218] sm:$0xf] %v5024_v31  ;;  %2743 = vst [vmem:[#allocation2 + $0x22c] sm:$0xf] %v5025_v39  ;;  %3925 = vmatmul.mubr.bf16.gmra.mxu1 %v5480_v41 }
  0xd7   : > { %v1138_v42 = vsel %vm1114_vm2, %v1136_v37, %v1137_v21  ;;  %v1541_v51 = vor.u32 %v1540_v40, %v1536_v24  ;;  %v5510_v57 = vld [vmem:[%s7116_s1 + $0x200] ss:$8 sps:$4 sm:$0xff]   ;;  %v5512_v58 = vld [vmem:[%s7116_s1 + $0x204] ss:$8 sps:$4 sm:$0xff]   ;;  %v2276_v53 = vshrl.u32 %v6511_v38, 16  ;;  %v2278_v61 = vshll.u32 %v6511_v38, 16  ;;  %1621 = vrot.lane.b32.xlu1 %v1547_v45, %s5691_s15  ;;  %3970 = vmatpush2.bf16.msra.mxu1 %v5490_v47  ;;  %v1568_v21 = vpop.permute.xlu1 %1567 }
  0xd8   : > { %v4868_v49 = vcombine.low %v1138_v42, %v1138_v42  ;;  %v4869_v50 = vcombine.high %v1138_v42, %v1138_v42  ;;  %v5619_v60 = vld [vmem:[%s5761_s8 + $0xc] sm:$0xff]   ;;  %888 = vst [vmem:[#allocation2 + $0x118] sm:$0xf] %v4820_v52  ;;  %v2283_v56 = vshll.u32 %v6506_v30, 16  ;;  %v5499_v5 = vld [vmem:[%s7116_s1 + $0x1a0] ss:$8 sps:$4 sm:$0xff]   ;;  %4152 = vmatprep.subr.bf16.mxu0 %v5512_v58  ;;  %v1572_v42 = vpop.permute.xlu0 %1571 }
  0xd9   : > { %v1628_v35 = vsel %vm729_vm1, %v5619_v60, %v1564_v46  ;;  %v5501_v63 = vld [vmem:[%s7116_s1 + $0x1a4] ss:$8 sps:$4 sm:$0xff]   ;;  %v1546_v0 = vsel %vm504_vm0, %v1541_v51, %v1545_v19  ;;  %v6537_v3 = vld [vmem:[%s5761_s8 + $0xc8] ss:$0 sps:$4 sm:$0x11]   ;;  %v2280_v6 = vrot.slane %v2278_v61, 1  ;;  %4153 = vmatpush1.bf16.msra.mxu0 %v5510_v57 }
  0xda   : > { %1273 = vst [vmem:[#allocation2 + $0x11c] sm:$0xf] %v4868_v49  ;;  %1274 = vst [vmem:[#allocation2 + $0x130] sm:$0xf] %v4869_v50  ;;  %v1691_v2 = vshrl.u32 %v1628_v35, 16  ;;  %v1693_v43 = vshll.u32 %v1628_v35, 16  ;;  %1619 = vrot.lane.b32.xlu0 %v1546_v0, %s5691_s15  ;;  %3971 = vmatprep.subr.bf16.mxu1 %v5501_v63 }
  0xdb   : > { %889 = vst [vmem:[#allocation2 + $0x12c] sm:$0xf] %v4821_v59  ;;  %v2536_v7 = vsel %vm729_vm1, %v6511_v38, 0  ;;  %v2537_v9 = vsel %vm729_vm1, %v6506_v30, 0  ;;  %v5620_v8 = vld [vmem:[%s5761_s8 + $0x18] sm:$0xff]   ;;  %v2285_v17 = vrot.slane %v2283_v56, 1  ;;  %v2281_v62 = vor.u32 %v2280_v6, %v2276_v53  ;;  %3972 = vmatpush2.bf16.msra.mxu1 %v5499_v5  ;;  %v2302_v35 = vpop.permute.xlu1 %2301 }
  0xdc   : > { %v2332_v12 = vsel %vm729_vm1, %v5620_v8, %v2300_v54  ;;  %v5487_v13 = vld [vmem:[#allocation2 + $0xf4] ss:$20 sps:$4 sm:$0xff]   ;;  %v1695_v1 = vrot.slane %v1693_v43, 1  ;;  %v2614_v18 = vrot.slane %v2536_v7, 1  ;;  %v2615_v20 = vrot.slane %v2537_v9, 1  ;;  %v5622_v4 = vld [vmem:[%s5761_s8 + $0xc0] sm:$0xff]  }
  0xdd   : > { %v5509_v33 = vld [vmem:[%s7116_s1 + $0x194] ss:$8 sps:$4 sm:$0xff]   ;;  %v5489_v48 = vld [vmem:[#allocation2 + $0xf0] ss:$20 sps:$4 sm:$0xff]   ;;  %v4966_v24 = vcombine.low %v2332_v12, %v2332_v12  ;;  %v4967_v25 = vcombine.high %v2332_v12, %v2332_v12  ;;  %3844 = vmatprep.mubr.bf16.mxu0 %v5487_v13  ;;  %v1550_v27 = vshrl.u32 %v5622_v4, 16  ;;  %v2286_v15 = vsel %vm504_vm0, %v2281_v62, %v2285_v17 }
  0xde   : > { %v5621_v22 = vld [vmem:[%s5761_s8 + $0x14] ss:$0 sps:$4 sm:$0x11]   ;;  %v5496_v26 = vld [vmem:[#allocation2 + $0x25c] ss:$20 sps:$4 sm:$0xff]   ;;  %v1696_v10 = vor.u32 %v1695_v1, %v1691_v2  ;;  %v2616_v16 = vsel %vm1114_vm2, %v2614_v18, %v2615_v20  ;;  %3845 = vmatmul.mubr.bf16.gmra.mxu0 %v5489_v48  ;;  %v1552_v37 = vshll.u32 %v5622_v4, 16  ;;  %2327 = vrot.lane.b32.xlu0 %v2286_v15, %s5691_s15 }
  0xdf   : > { %v1630_v23 = vsel %vm729_vm1, %v5621_v22, %v1566_v11  ;;  %v5498_v28 = vld [vmem:[#allocation2 + $0x258] ss:$20 sps:$4 sm:$0xff]   ;;  %v5503_v29 = vld [vmem:[%s5761_s8 + $0xd4] ss:$0 sps:$4 sm:$0x11]   ;;  %v5026_v30 = vcombine.low %v2616_v16, %v2616_v16  ;;  %v5027_v36 = vcombine.high %v2616_v16, %v2616_v16  ;;  %3934 = vmatprep.mubr.bf16.mxu1 %v5496_v26  ;;  %v1557_v38 = vshll.u32 %v6537_v3, 16  ;;  %3973 = vmatprep.subr.bf16.mxu1 %v5509_v33 }
  0xe0   : > { %v1697_v55 = vshll.u32 %v1630_v23, 16  ;;  %2475 = vst [vmem:[#allocation2 + $0xc] sm:$0xf] %v4966_v24  ;;  %2476 = vst [vmem:[#allocation2 + $0x20] sm:$0xf] %v4967_v25  ;;  %v1561_v34 = vshrl.u32 %v6537_v3, 16  ;;  %3935 = vmatmul.mubr.bf16.gmra.mxu1 %v5498_v28  ;;  %v2304_v3 = vpop.permute.xlu0 %2303 }
  0xe1   : > { %v5623_v31 = vld [vmem:[%s5761_s8 + $0x18] sm:$0xff]   ;;  %v6565_v40 = vld [vmem:[%s5761_s8 + $0xcc] sm:$0xff]   ;;  %2744 = vst [vmem:[#allocation2 + $0x240] sm:$0xf] %v5026_v30  ;;  %2745 = vst [vmem:[#allocation2 + $0x254] sm:$0xf] %v5027_v36 }
  0xe2   : > { %v1699_v32 = vrot.slane %v1697_v55, 1  ;;  %v1632_v39 = vsel %vm729_vm1, %v5623_v31, %v1568_v21  ;;  %v5507_v41 = vld [vmem:[%s7116_s1 + $0x190] ss:$8 sps:$4 sm:$0xff]   ;;  %v1554_v19 = vrot.slane %v1552_v37, 1  ;;  %v1559_v50 = vrot.slane %v1557_v38, 1  ;;  %1625 = vrot.lane.b32.xlu0 %v1561_v34, %s5691_s15  ;;  %v5625_v13 = vld [vmem:[%s5761_s8 + $0x24] sm:$0xff]  }
  0xe3   : > { %v1701_v44 = vshrl.u32 %v1632_v39, 16  ;;  %v1703_v45 = vshll.u32 %v1632_v39, 16  ;;  %v5624_v46 = vld [vmem:[%s5761_s8 + $0x20] ss:$0 sps:$4 sm:$0x11]   ;;  %v2288_v52 = vshrl.u32 %v6565_v40, 16  ;;  %3974 = vmatpush2.bf16.msra.mxu1 %v5507_v41  ;;  %v2334_v33 = vsel %vm729_vm1, %v5625_v13, %v2302_v35 }
  0xe4   : > { %v1634_v47 = vsel %vm729_vm1, %v5624_v46, %v1570_v14  ;;  %v1700_v49 = vsel %vm504_vm0, %v1696_v10, %v1699_v32  ;;  %v5504_v54 = vld [vmem:[#allocation2 + $0x11c] ss:$20 sps:$4 sm:$0xff]   ;;  %v1555_v59 = vor.u32 %v1554_v19, %v1550_v27  ;;  %v5513_v53 = vld [vmem:[%s7116_s1 + $0x180] ss:$8 sps:$4 sm:$0xff]   ;;  %v5515_v61 = vld [vmem:[%s7116_s1 + $0x184] ss:$8 sps:$4 sm:$0xff]   ;;  %v4968_v17 = vcombine.low %v2334_v33, %v2334_v33  ;;  %v1574_v14 = vpop.permute.xlu1 %1573  ;;  %v1578_v25 = vpop.permute.xlu0 %1577 }
  0xe5   : > { %v1707_v51 = vshll.u32 %v1634_v47, 16  ;;  %v4902_v57 = vcombine.low %v1700_v49, %v1700_v49  ;;  %v4903_v58 = vcombine.high %v1700_v49, %v1700_v49  ;;  %v1705_v60 = vrot.slane %v1703_v45, 1  ;;  %3854 = vmatprep.mubr.bf16.mxu0 %v5504_v54  ;;  %v5506_v56 = vld [vmem:[#allocation2 + $0x118] ss:$20 sps:$4 sm:$0xff]   ;;  %v5626_v20 = vld [vmem:[%s5761_s8 + $0x24] sm:$0xff]   ;;  %3975 = vmatprep.subr.bf16.mxu1 %v5515_v61  ;;  %v5629_v39 = vld [vmem:[%s5761_s8 + $0x30] sm:$0xff]  }
  0xe6   : > { %v2290_v0 = vshll.u32 %v6565_v40, 16  ;;  %v2295_v2 = vshll.u32 %v5503_v29, 16  ;;  %v2538_v43 = vsel %vm729_vm1, %v6565_v40, 0  ;;  %v1560_v5 = vsel %vm504_vm0, %v1555_v59, %v1559_v50  ;;  %3855 = vmatmul.mubr.bf16.gmra.mxu0 %v5506_v56  ;;  %2477 = vst [vmem:[#allocation2 + $0x34] sm:$0xf] %v4968_v17 }
  0xe7   : > { %v1709_v63 = vrot.slane %v1707_v51, 1  ;;  %1947 = vst [vmem:[#allocation2 + $0x8] sm:$0xf] %v4902_v57  ;;  %1948 = vst [vmem:[#allocation2 + $0x1c] sm:$0xf] %v4903_v58  ;;  %v1706_v6 = vor.u32 %v1705_v60, %v1701_v44  ;;  %v2539_v7 = vsel %vm729_vm1, %v5503_v29, 0  ;;  %1623 = vrot.lane.b32.xlu1 %v1560_v5, %s5691_s15  ;;  %v4969_v18 = vcombine.high %v2334_v33, %v2334_v33 }
  0xe8   : > { %v2617_v9 = vrot.slane %v2538_v43, 1  ;;  %v2292_v11 = vrot.slane %v2290_v0, 1  ;;  %v2297_v8 = vrot.slane %v2295_v2, 1  ;;  %v2618_v12 = vrot.slane %v2539_v7, 1  ;;  %3976 = vmatpush2.bf16.msra.mxu1 %v5513_v53  ;;  %v5628_v29 = vld [vmem:[%s5761_s8 + $0x30] sm:$0xff]   ;;  %v1576_v34 = vpop.permute.xlu1 %1575  ;;  %v1580_v44 = vpop.permute.xlu0 %1579  ;;  %v5632_v0 = vld [vmem:[%s5761_s8 + $0x3c] sm:$0xff]  }
  0xe9   : > { %v1710_v1 = vsel %vm504_vm0, %v1706_v6, %v1709_v63  ;;  %v1636_v48 = vsel %vm729_vm1, %v5626_v20, %v1572_v42  ;;  %2478 = vst [vmem:[#allocation2 + $0x48] sm:$0xf] %v4969_v18  ;;  %v5627_v27 = vld [vmem:[%s5761_s8 + $0x2c] ss:$0 sps:$4 sm:$0x11]   ;;  %v2336_v15 = vsel %vm729_vm1, %v5628_v29, %v2304_v3  ;;  %v5692_v38 = vmov 0  }
  0xea   : > { %v4904_v62 = vcombine.low %v1710_v1, %v1710_v1  ;;  %v4905_v22 = vcombine.high %v1710_v1, %v1710_v1  ;;  %v2293_v23 = vor.u32 %v2292_v11, %v2288_v52  ;;  %v2619_v24 = vsel %vm1114_vm2, %v2617_v9, %v2618_v12  ;;  %v5519_v30 = vld [vmem:[#allocation2 + $0x10] ss:$20 sps:$4 sm:$0xff]   ;;  %4170 = vmatprep.mubr.bf16.mxu0 %v5692_v38  ;;  %v5630_v42 = vld [vmem:[%s5761_s8 + $0x38] ss:$0 sps:$4 sm:$0x11]   ;;  %v5631_v52 = vld [vmem:[%s5761_s8 + $0x3c] sm:$0xff]  }
  0xeb   : > { %v5028_v26 = vcombine.low %v2619_v24, %v2619_v24  ;;  %v5029_v10 = vcombine.high %v2619_v24, %v2619_v24  ;;  %v1711_v16 = vshrl.u32 %v1636_v48, 16  ;;  %v1713_v55 = vshll.u32 %v1636_v48, 16  ;;  %v5518_v47 = vld [vmem:[#allocation2 + $0xc] ss:$20 sps:$4 sm:$0xff]  }
  0xec   : > { %1949 = vst [vmem:[#allocation2 + $0x30] sm:$0xf] %v4904_v62  ;;  %1950 = vst [vmem:[#allocation2 + $0x44] sm:$0xf] %v4905_v22  ;;  %v2298_v4 = vsel %vm504_vm0, %v2293_v23, %v2297_v8  ;;  %v1638_v28 = vsel %vm729_vm1, %v5627_v27, %v1574_v14  ;;  %v4970_v21 = vcombine.low %v2336_v15, %v2336_v15  ;;  %3977 = vmatprep.mubr.bf16.mxu1 %v5518_v47  ;;  %v2306_v59 = vpop.permute.xlu1 %2305  ;;  %v2308_v43 = vpop.permute.xlu0 %2307  ;;  %v5522_v9 = vld [vmem:[#allocation2 + $0x38] ss:$20 sps:$4 sm:$0xff]  }
  0xed   : > { %2746 = vst [vmem:[#allocation2 + $0x268] sm:$0xf] %v5028_v26  ;;  %2747 = vst [vmem:[#allocation2 + $0x27c] sm:$0xf] %v5029_v10  ;;  %2329 = vrot.lane.b32.xlu1 %v2298_v4, %s5691_s15  ;;  %v1715_v36 = vrot.slane %v1713_v55, 1  ;;  %v1717_v37 = vshll.u32 %v1638_v28, 16  ;;  %v4971_v32 = vcombine.high %v2336_v15, %v2336_v15  ;;  %v1640_v41 = vsel %vm729_vm1, %v5629_v39, %v1576_v34 }
  0xee   : > { %v5516_v31 = vld [vmem:[#allocation2 + $0x8] ss:$20 sps:$4 sm:$0xff]   ;;  %v1642_v19 = vsel %vm729_vm1, %v5630_v42, %v1578_v25  ;;  %2479 = vst [vmem:[#allocation2 + $0x5c] sm:$0xf] %v4970_v21  ;;  %v1721_v49 = vshrl.u32 %v1640_v41, 16  ;;  %v1723_v50 = vshll.u32 %v1640_v41, 16  ;;  %4171 = vmatmul.mubr.bf16.vlgmr.msra.gmra.mxu0 %v5519_v30  ;;  %v1644_v54 = vsel %vm729_vm1, %v5631_v52, %v1580_v44 }
  0xef   : > { %v1716_v45 = vor.u32 %v1715_v36, %v1711_v16  ;;  %v1719_v46 = vrot.slane %v1717_v37, 1  ;;  %2480 = vst [vmem:[#allocation2 + $0x70] sm:$0xf] %v4971_v32  ;;  %v1727_v51 = vshll.u32 %v1642_v19, 16  ;;  %4180 = vmatprep.mubr.bf16.mxu0 %v5692_v38  ;;  %v1731_v60 = vshrl.u32 %v1644_v54, 16  ;;  %3978 = vmatmul.mubr.bf16.vlgmr.msra.gmra.mxu1 %v5516_v31  ;;  %v5633_v11 = vld [vmem:[%s5761_s8 + $0x48] sm:$0xff]  }
  0xf0   : > { %v1725_v58 = vrot.slane %v1723_v50, 1  ;;  %v1733_v35 = vshll.u32 %v1644_v54, 16  ;;  %v2338_v2 = vsel %vm729_vm1, %v5632_v0, %v2306_v59  ;;  %v5520_v3 = vld [vmem:[#allocation2 + $0x34] ss:$20 sps:$4 sm:$0xff]   ;;  %v2340_v8 = vsel %vm729_vm1, %v5633_v11, %v2308_v43  ;;  %v1582_v13 = vpop.permute.xlu1 %1581  ;;  %v1586_v14 = vpop.permute.xlu0 %1585  ;;  %v5639_v54 = vld [vmem:[%s5761_s8 + $0x60] sm:$0xff]  }
  0xf1   : > { %v1720_v57 = vsel %vm504_vm0, %v1716_v45, %v1719_v46  ;;  %v1729_v63 = vrot.slane %v1727_v51, 1  ;;  %v4972_v5 = vcombine.low %v2338_v2, %v2338_v2  ;;  %v4973_v6 = vcombine.high %v2338_v2, %v2338_v2  ;;  %3987 = vmatprep.mubr.bf16.mxu1 %v5520_v3  ;;  %v5634_v20 = vld [vmem:[%s5761_s8 + $0x44] ss:$0 sps:$4 sm:$0x11]   ;;  %v5636_v55 = vld [vmem:[%s5761_s8 + $0x48] sm:$0xff]   ;;  %v5637_v36 = vld [vmem:[%s5761_s8 + $0x54] sm:$0xff]  }
  0xf2   : > { %v4906_v53 = vcombine.low %v1720_v57, %v1720_v57  ;;  %v4907_v61 = vcombine.high %v1720_v57, %v1720_v57  ;;  %v1726_v56 = vor.u32 %v1725_v58, %v1721_v49  ;;  %v1735_v7 = vrot.slane %v1733_v35, 1  ;;  %v5635_v23 = vld [vmem:[%s5761_s8 + $0x50] ss:$0 sps:$4 sm:$0x11]   ;;  %v5526_v34 = vld [vmem:[#allocation2 + $0x60] ss:$20 sps:$4 sm:$0xff]  }
  0xf3   : > { %2481 = vst [vmem:[#allocation2 + $0x84] sm:$0xf] %v4972_v5  ;;  %2482 = vst [vmem:[#allocation2 + $0x98] sm:$0xf] %v4973_v6  ;;  %v4974_v33 = vcombine.low %v2340_v8, %v2340_v8  ;;  %v4975_v1 = vcombine.high %v2340_v8, %v2340_v8  ;;  %v1646_v48 = vsel %vm729_vm1, %v5634_v20, %v1582_v13  ;;  %v5523_v25 = vld [vmem:[#allocation2 + $0x30] ss:$20 sps:$4 sm:$0xff]  }
  0xf4   : > { %1951 = vst [vmem:[#allocation2 + $0x58] sm:$0xf] %v4906_v53  ;;  %1952 = vst [vmem:[#allocation2 + $0x6c] sm:$0xf] %v4907_v61  ;;  %v1730_v12 = vsel %vm504_vm0, %v1726_v56, %v1729_v63  ;;  %v1736_v62 = vor.u32 %v1735_v7, %v1731_v60  ;;  %v1737_v22 = vshll.u32 %v1646_v48, 16  ;;  %v1650_v24 = vsel %vm729_vm1, %v5635_v23, %v1586_v14  ;;  %v1584_v10 = vpop.permute.xlu1 %1583  ;;  %v1588_v27 = vpop.permute.xlu0 %1587  ;;  %v5638_v19 = vld [vmem:[%s5761_s8 + $0x54] sm:$0xff]  }
  0xf5   : > { %v4908_v17 = vcombine.low %v1730_v12, %v1730_v12  ;;  %v4909_v18 = vcombine.high %v1730_v12, %v1730_v12  ;;  %2483 = vst [vmem:[#allocation2 + $0xac] sm:$0xf] %v4974_v33  ;;  %2484 = vst [vmem:[#allocation2 + $0xc0] sm:$0xf] %v4975_v1  ;;  %v1747_v16 = vshll.u32 %v1650_v24, 16  ;;  %v1648_v4 = vsel %vm729_vm1, %v5636_v55, %v1584_v10  ;;  %v5642_v12 = vld [vmem:[%s5761_s8 + $0x60] sm:$0xff]  }
  0xf6   : > { %4181 = vmatmul.mubr.bf16.gmra.mxu0 %v5522_v9  ;;  %v1739_v26 = vrot.slane %v1737_v22, 1  ;;  %v5524_v29 = vld [vmem:[#allocation2 + $0x5c] ss:$20 sps:$4 sm:$0xff]   ;;  %v1741_v15 = vshrl.u32 %v1648_v4, 16  ;;  %v1743_v30 = vshll.u32 %v1648_v4, 16  ;;  %v1652_v37 = vsel %vm729_vm1, %v5637_v36, %v1588_v27 }
  0xf7   : > { %1953 = vst [vmem:[#allocation2 + $0x80] sm:$0xf] %v4908_v17  ;;  %1954 = vst [vmem:[#allocation2 + $0x94] sm:$0xf] %v4909_v18  ;;  %4190 = vmatprep.mubr.bf16.mxu0 %v5692_v38  ;;  %3988 = vmatmul.mubr.bf16.gmra.mxu1 %v5523_v25  ;;  %v1753_v31 = vshll.u32 %v1652_v37, 16  ;;  %v1749_v41 = vrot.slane %v1747_v16, 1 }
  0xf8   : > { %v1740_v28 = vsel %vm504_vm0, %v1736_v62, %v1739_v26  ;;  %3997 = vmatprep.mubr.bf16.mxu1 %v5524_v29  ;;  %v1745_v39 = vrot.slane %v1743_v30, 1  ;;  %v2310_v42 = vpop.permute.xlu1 %2309  ;;  %v1751_v45 = vshrl.u32 %v1652_v37, 16  ;;  %v2312_v47 = vpop.permute.xlu0 %2311  ;;  %v5640_v0 = vld [vmem:[%s5761_s8 + $0x5c] ss:$0 sps:$4 sm:$0x11]   ;;  %v5643_v48 = vld [vmem:[%s5761_s8 + $0x6c] sm:$0xff]  }
  0xf9   : > { %v4910_v21 = vcombine.low %v1740_v28, %v1740_v28  ;;  %v4911_v32 = vcombine.high %v1740_v28, %v1740_v28  ;;  %v2342_v44 = vsel %vm729_vm1, %v5638_v19, %v2310_v42  ;;  %v1755_v46 = vrot.slane %v1753_v31, 1  ;;  %v5641_v5 = vld [vmem:[%s5761_s8 + $0x68] ss:$0 sps:$4 sm:$0x11]   ;;  %v5644_v16 = vld [vmem:[%s5761_s8 + $0x6c] sm:$0xff]   ;;  %v5645_v36 = vld [vmem:[%s5761_s8 + $0x78] sm:$0xff]  }
  0xfa   : > { %v1746_v49 = vor.u32 %v1745_v39, %v1741_v15  ;;  %v5528_v50 = vld [vmem:[#allocation2 + $0x84] ss:$20 sps:$4 sm:$0xff]   ;;  %v4976_v51 = vcombine.low %v2342_v44, %v2342_v44  ;;  %v4977_v52 = vcombine.high %v2342_v44, %v2342_v44  ;;  %v2344_v57 = vsel %vm729_vm1, %v5639_v54, %v2312_v47  ;;  %v5530_v7 = vld [vmem:[#allocation2 + $0x88] ss:$20 sps:$4 sm:$0xff]  }
  0xfb   : > { %1955 = vst [vmem:[#allocation2 + $0xa8] sm:$0xf] %v4910_v21  ;;  %1956 = vst [vmem:[#allocation2 + $0xbc] sm:$0xf] %v4911_v32  ;;  %v5527_v58 = vld [vmem:[#allocation2 + $0x58] ss:$20 sps:$4 sm:$0xff]   ;;  %v4978_v59 = vcombine.low %v2344_v57, %v2344_v57  ;;  %v4979_v60 = vcombine.high %v2344_v57, %v2344_v57  ;;  %v1756_v56 = vor.u32 %v1755_v46, %v1751_v45 }
  0xfc   : > { %v1750_v35 = vsel %vm504_vm0, %v1746_v49, %v1749_v41  ;;  %2485 = vst [vmem:[#allocation2 + $0xd4] sm:$0xf] %v4976_v51  ;;  %2486 = vst [vmem:[#allocation2 + $0xe8] sm:$0xf] %v4977_v52  ;;  %v1590_v53 = vpop.permute.xlu1 %1589  ;;  %v1594_v43 = vpop.permute.xlu0 %1593  ;;  %v5532_v17 = vld [vmem:[#allocation2 + $0xac] ss:$20 sps:$4 sm:$0xff]  }
  0xfd   : > { %v4912_v61 = vcombine.low %v1750_v35, %v1750_v35  ;;  %v4913_v63 = vcombine.high %v1750_v35, %v1750_v35  ;;  %v1654_v2 = vsel %vm729_vm1, %v5640_v0, %v1590_v53  ;;  %2487 = vst [vmem:[#allocation2 + $0xfc] sm:$0xf] %v4978_v59  ;;  %2488 = vst [vmem:[#allocation2 + $0x110] sm:$0xf] %v4979_v60  ;;  %v5534_v21 = vld [vmem:[#allocation2 + $0xb0] ss:$20 sps:$4 sm:$0xff]  }
  0xfe   : > { %4191 = vmatmul.mubr.bf16.gmra.mxu0 %v5526_v34  ;;  %v1757_v3 = vshll.u32 %v1654_v2, 16  ;;  %v1658_v6 = vsel %vm729_vm1, %v5641_v5, %v1594_v43  ;;  %v5531_v62 = vld [vmem:[#allocation2 + $0x80] ss:$20 sps:$4 sm:$0xff]   ;;  %v5648_v59 = vld [vmem:[%s5761_s8 + $0x78] sm:$0xff]   ;;  %v5649_v5 = vld [vmem:[%s5761_s8 + $0x84] sm:$0xff]  }
  0xff   : > { %4200 = vmatprep.mubr.bf16.mxu0 %v5692_v38  ;;  %3998 = vmatmul.mubr.bf16.gmra.mxu1 %v5527_v58  ;;  %1957 = vst [vmem:[#allocation2 + $0xd0] sm:$0xf] %v4912_v61  ;;  %1958 = vst [vmem:[#allocation2 + $0xe4] sm:$0xf] %v4913_v63  ;;  %v1767_v8 = vshll.u32 %v1658_v6, 16 }
 0x100   : > { %4007 = vmatprep.mubr.bf16.mxu1 %v5528_v50  ;;  %v1759_v9 = vrot.slane %v1757_v3, 1  ;;  %v1592_v11 = vpop.permute.xlu1 %1591  ;;  %v1596_v33 = vpop.permute.xlu0 %1595  ;;  %v5646_v19 = vld [vmem:[%s5761_s8 + $0x74] ss:$0 sps:$4 sm:$0x11]   ;;  %v5538_v63 = vld [vmem:[#allocation2 + $0xd8] ss:$20 sps:$4 sm:$0xff]  }
 0x101   : > { %v1656_v13 = vsel %vm729_vm1, %v5642_v12, %v1592_v11  ;;  %v1660_v14 = vsel %vm729_vm1, %v5643_v48, %v1596_v33  ;;  %v1769_v26 = vrot.slane %v1767_v8, 1  ;;  %v5647_v50 = vld [vmem:[%s5761_s8 + $0x80] ss:$0 sps:$4 sm:$0x11]  }
 0x102   : > { %v1760_v1 = vsel %vm504_vm0, %v1756_v56, %v1759_v9  ;;  %v1761_v18 = vshrl.u32 %v1656_v13, 16  ;;  %v1763_v20 = vshll.u32 %v1656_v13, 16  ;;  %v1773_v24 = vshll.u32 %v1660_v14, 16  ;;  %v5535_v52 = vld [vmem:[#allocation2 + $0xa8] ss:$20 sps:$4 sm:$0xff]  }
 0x103   : > { %v4914_v22 = vcombine.low %v1760_v1, %v1760_v1  ;;  %v4915_v23 = vcombine.high %v1760_v1, %v1760_v1  ;;  %v1771_v4 = vshrl.u32 %v1660_v14, 16  ;;  %v5536_v46 = vld [vmem:[#allocation2 + $0xd4] ss:$20 sps:$4 sm:$0xff]  }
 0x104   : > { %v1765_v25 = vrot.slane %v1763_v20, 1  ;;  %v2314_v10 = vpop.permute.xlu1 %2313  ;;  %v1775_v27 = vrot.slane %v1773_v24, 1  ;;  %v2316_v28 = vpop.permute.xlu0 %2315  ;;  %v5650_v1 = vld [vmem:[%s5761_s8 + $0x84] sm:$0xff]   ;;  %v5542_v24 = vld [vmem:[#allocation2 + $0x100] ss:$20 sps:$4 sm:$0xff]  }
 0x105   : > { %1959 = vst [vmem:[#allocation2 + $0xf8] sm:$0xf] %v4914_v22  ;;  %1960 = vst [vmem:[#allocation2 + $0x10c] sm:$0xf] %v4915_v23  ;;  %v2346_v55 = vsel %vm729_vm1, %v5644_v16, %v2314_v10  ;;  %v2348_v37 = vsel %vm729_vm1, %v5645_v36, %v2316_v28 }
 0x106   : > { %4201 = vmatmul.mubr.bf16.gmra.mxu0 %v5530_v7  ;;  %v1766_v29 = vor.u32 %v1765_v25, %v1761_v18  ;;  %v4980_v15 = vcombine.low %v2346_v55, %v2346_v55  ;;  %v4981_v30 = vcombine.high %v2346_v55, %v2346_v55  ;;  %v4982_v32 = vcombine.low %v2348_v37, %v2348_v37  ;;  %v5540_v7 = vld [vmem:[#allocation2 + $0xfc] ss:$20 sps:$4 sm:$0xff]   ;;  %v5651_v22 = vld [vmem:[%s5761_s8 + $0x8c] ss:$0 sps:$4 sm:$0x11]  }
 0x107   : > { %4210 = vmatprep.mubr.bf16.mxu0 %v5692_v38  ;;  %4008 = vmatmul.mubr.bf16.gmra.mxu1 %v5531_v62  ;;  %v4983_v34 = vcombine.high %v2348_v37, %v2348_v37  ;;  %v1776_v47 = vor.u32 %v1775_v27, %v1771_v4  ;;  %v5539_v12 = vld [vmem:[#allocation2 + $0xd0] ss:$20 sps:$4 sm:$0xff]  }
 0x108   : > { %4017 = vmatprep.mubr.bf16.mxu1 %v5532_v17  ;;  %v1770_v31 = vsel %vm504_vm0, %v1766_v29, %v1769_v26  ;;  %2489 = vst [vmem:[#allocation2 + $0x124] sm:$0xf] %v4980_v15  ;;  %2490 = vst [vmem:[#allocation2 + $0x138] sm:$0xf] %v4981_v30  ;;  %v1598_v39 = vpop.permute.xlu1 %1597  ;;  %v1602_v45 = vpop.permute.xlu0 %1601  ;;  %v5652_v29 = vld [vmem:[%s5761_s8 + $0x90] sm:$0xff]  }
 0x109   : > { %v4916_v41 = vcombine.low %v1770_v31, %v1770_v31  ;;  %v4917_v42 = vcombine.high %v1770_v31, %v1770_v31  ;;  %v1662_v44 = vsel %vm729_vm1, %v5646_v19, %v1598_v39  ;;  %2491 = vst [vmem:[#allocation2 + $0x14c] sm:$0xf] %v4982_v32  ;;  %2492 = vst [vmem:[#allocation2 + $0x160] sm:$0xf] %v4983_v34  ;;  %v5546_v32 = vld [vmem:[#allocation2 + $0x128] ss:$20 sps:$4 sm:$0xff]  }
 0x10a   : > { %v1777_v49 = vshll.u32 %v1662_v44, 16  ;;  %v1666_v51 = vsel %vm729_vm1, %v5647_v50, %v1602_v45  ;;  %v5653_v39 = vld [vmem:[%s5761_s8 + $0x98] ss:$0 sps:$4 sm:$0x11]   ;;  %v5654_v45 = vld [vmem:[%s5761_s8 + $0x90] sm:$0xff]  }
 0x10b   : > { %1961 = vst [vmem:[#allocation2 + $0x120] sm:$0xf] %v4916_v41  ;;  %1962 = vst [vmem:[#allocation2 + $0x134] sm:$0xf] %v4917_v42  ;;  %v1787_v58 = vshll.u32 %v1666_v51, 16 }
 0x10c   : > { %v1779_v54 = vrot.slane %v1777_v49, 1  ;;  %v1600_v57 = vpop.permute.xlu1 %1599  ;;  %v1604_v13 = vpop.permute.xlu0 %1603  ;;  %v5543_v27 = vld [vmem:[#allocation2 + $0xf8] ss:$20 sps:$4 sm:$0xff]   ;;  %v5550_v50 = vld [vmem:[#allocation2 + $0x150] ss:$20 sps:$4 sm:$0xff]  }
 0x10d   : > { %v1664_v60 = vsel %vm729_vm1, %v5648_v59, %v1600_v57  ;;  %v1789_v56 = vrot.slane %v1787_v58, 1  ;;  %v1668_v17 = vsel %vm729_vm1, %v5650_v1, %v1604_v13  ;;  %v5655_v57 = vld [vmem:[%s5761_s8 + $0x9c] sm:$0xff]  }
 0x10e   : > { %4211 = vmatmul.mubr.bf16.gmra.mxu0 %v5534_v21  ;;  %v1780_v35 = vsel %vm504_vm0, %v1776_v47, %v1779_v54  ;;  %v1781_v53 = vshrl.u32 %v1664_v60, 16  ;;  %v1783_v61 = vshll.u32 %v1664_v60, 16  ;;  %v1791_v14 = vshrl.u32 %v1668_v17, 16 }
 0x10f   : > { %4220 = vmatprep.mubr.bf16.mxu0 %v5692_v38  ;;  %4018 = vmatmul.mubr.bf16.gmra.mxu1 %v5535_v52  ;;  %v4918_v0 = vcombine.low %v1780_v35, %v1780_v35  ;;  %v4919_v2 = vcombine.high %v1780_v35, %v1780_v35  ;;  %v1793_v62 = vshll.u32 %v1668_v17, 16  ;;  %v5544_v55 = vld [vmem:[#allocation2 + $0x124] ss:$20 sps:$4 sm:$0xff]  }
 0x110   : > { %4027 = vmatprep.mubr.bf16.mxu1 %v5536_v46  ;;  %v1785_v43 = vrot.slane %v1783_v61, 1  ;;  %v2318_v3 = vpop.permute.xlu1 %2317  ;;  %v2320_v4 = vpop.permute.xlu0 %2319  ;;  %v5548_v31 = vld [vmem:[#allocation2 + $0x14c] ss:$20 sps:$4 sm:$0xff]  }
 0x111   : > { %1963 = vst [vmem:[#allocation2 + $0x148] sm:$0xf] %v4918_v0  ;;  %1964 = vst [vmem:[#allocation2 + $0x15c] sm:$0xf] %v4919_v2  ;;  %v2350_v6 = vsel %vm729_vm1, %v5649_v5, %v2318_v3  ;;  %v1795_v25 = vrot.slane %v1793_v62, 1  ;;  %v2352_v15 = vsel %vm729_vm1, %v5652_v29, %v2320_v4 }
 0x112   : > { %v1786_v9 = vor.u32 %v1785_v43, %v1781_v53  ;;  %v4984_v11 = vcombine.low %v2350_v6, %v2350_v6  ;;  %v4985_v8 = vcombine.high %v2350_v6, %v2350_v6  ;;  %v4986_v37 = vcombine.low %v2352_v15, %v2352_v15  ;;  %v5547_v42 = vld [vmem:[#allocation2 + $0x120] ss:$20 sps:$4 sm:$0xff]   ;;  %v5659_v4 = vld [vmem:[%s5761_s8 + $0xb0] ss:$0 sps:$4 sm:$0x11]  }
 0x113   : > { %v1796_v10 = vor.u32 %v1795_v25, %v1791_v14  ;;  %v4987_v21 = vcombine.high %v2352_v15, %v2352_v15  ;;  %v5660_v15 = vld [vmem:[%s5761_s8 + $0xa8] sm:$0xff]  }
 0x114   : > { %v1790_v33 = vsel %vm504_vm0, %v1786_v9, %v1789_v56  ;;  %2493 = vst [vmem:[#allocation2 + $0x174] sm:$0xf] %v4984_v11  ;;  %2494 = vst [vmem:[#allocation2 + $0x188] sm:$0xf] %v4985_v8  ;;  %v1606_v18 = vpop.permute.xlu1 %1605  ;;  %v1610_v34 = vpop.permute.xlu0 %1609  ;;  %v5657_v9 = vld [vmem:[%s5761_s8 + $0x9c] sm:$0xff]  }
 0x115   : > { %v4920_v20 = vcombine.low %v1790_v33, %v1790_v33  ;;  %v4921_v48 = vcombine.high %v1790_v33, %v1790_v33  ;;  %v1670_v23 = vsel %vm729_vm1, %v5651_v22, %v1606_v18  ;;  %2495 = vst [vmem:[#allocation2 + $0x19c] sm:$0xf] %v4986_v37  ;;  %2496 = vst [vmem:[#allocation2 + $0x1b0] sm:$0xf] %v4987_v21  ;;  %v5658_v22 = vld [vmem:[%s5761_s8 + $0xa8] sm:$0xff]  }
 0x116   : > { %4221 = vmatmul.mubr.bf16.gmra.mxu0 %v5538_v63  ;;  %v1797_v26 = vshll.u32 %v1670_v23, 16  ;;  %v1674_v41 = vsel %vm729_vm1, %v5653_v39, %v1610_v34  ;;  %v5656_v56 = vld [vmem:[%s5761_s8 + $0xa4] ss:$0 sps:$4 sm:$0x11]  }
 0x117   : > { %4230 = vmatprep.mubr.bf16.mxu0 %v5692_v38  ;;  %4028 = vmatmul.mubr.bf16.gmra.mxu1 %v5539_v12  ;;  %1965 = vst [vmem:[#allocation2 + $0x170] sm:$0xf] %v4920_v20  ;;  %1966 = vst [vmem:[#allocation2 + $0x184] sm:$0xf] %v4921_v48  ;;  %v1807_v44 = vshll.u32 %v1674_v41, 16 }
 0x118   : > { %4037 = vmatprep.mubr.bf16.mxu1 %v5540_v7  ;;  %v1799_v16 = vrot.slane %v1797_v26, 1  ;;  %v1608_v19 = vpop.permute.xlu1 %1607  ;;  %v5551_v61 = vld [vmem:[#allocation2 + $0x148] ss:$20 sps:$4 sm:$0xff]   ;;  %v5554_v7 = vld [vmem:[#allocation2 + $0x178] ss:$20 sps:$4 sm:$0xff]  }
 0x119   : > { %v1672_v46 = vsel %vm729_vm1, %v5654_v45, %v1608_v19  ;;  %v1809_v52 = vrot.slane %v1807_v44, 1 }
 0x11a   : > { %v1800_v28 = vsel %vm504_vm0, %v1796_v10, %v1799_v16  ;;  %v1801_v47 = vshrl.u32 %v1672_v46, 16  ;;  %v1803_v49 = vshll.u32 %v1672_v46, 16  ;;  %v5661_v46 = vld [vmem:[%s5761_s8 + $0xb4] sm:$0xff]  }
 0x11b   : > { %v4922_v30 = vcombine.low %v1800_v28, %v1800_v28  ;;  %v4923_v36 = vcombine.high %v1800_v28, %v1800_v28  ;;  %v5552_v60 = vld [vmem:[#allocation2 + $0x174] ss:$20 sps:$4 sm:$0xff]  }
 0x11c   : > { %v1805_v51 = vrot.slane %v1803_v49, 1  ;;  %v2322_v54 = vpop.permute.xlu1 %2321  ;;  %v5556_v1 = vld [vmem:[#allocation2 + $0x19c] ss:$20 sps:$4 sm:$0xff]  }
 0x11d   : > { %1967 = vst [vmem:[#allocation2 + $0x198] sm:$0xf] %v4922_v30  ;;  %1968 = vst [vmem:[#allocation2 + $0x1ac] sm:$0xf] %v4923_v36  ;;  %v2354_v58 = vsel %vm729_vm1, %v5655_v57, %v2322_v54  ;;  %v5562_v36 = vld [vmem:[#allocation2 + $0x1c8] ss:$20 sps:$4 sm:$0xff]  }
 0x11e   : > { %4231 = vmatmul.mubr.bf16.gmra.mxu0 %v5542_v24  ;;  %v1806_v59 = vor.u32 %v1805_v51, %v1801_v47  ;;  %v4988_v35 = vcombine.low %v2354_v58, %v2354_v58  ;;  %v4989_v53 = vcombine.high %v2354_v58, %v2354_v58  ;;  %v5555_v17 = vld [vmem:[#allocation2 + $0x170] ss:$20 sps:$4 sm:$0xff]   ;;  %v5558_v24 = vld [vmem:[#allocation2 + $0x1a0] ss:$20 sps:$4 sm:$0xff]  }
 0x11f   : > { %4240 = vmatprep.mubr.bf16.mxu0 %v5692_v38  ;;  %4038 = vmatmul.mubr.bf16.gmra.mxu1 %v5543_v27  ;;  %v5566_v49 = vld [vmem:[#allocation2 + $0x1f0] ss:$20 sps:$4 sm:$0xff]   ;;  %v5662_v57 = vld [vmem:[%s5761_s8 + $0xb4] sm:$0xff]  }
 0x120   : > { %4047 = vmatprep.mubr.bf16.mxu1 %v5544_v55  ;;  %v1810_v63 = vsel %vm504_vm0, %v1806_v59, %v1809_v52  ;;  %2497 = vst [vmem:[#allocation2 + $0x1c4] sm:$0xf] %v4988_v35  ;;  %2498 = vst [vmem:[#allocation2 + $0x1d8] sm:$0xf] %v4989_v53 }
 0x121   : > { %v4924_v2 = vcombine.low %v1810_v63, %v1810_v63  ;;  %v4925_v43 = vcombine.high %v1810_v63, %v1810_v63  ;;  %v5663_v59 = vld [vmem:[%s5761_s8 + $0xbc] ss:$0 sps:$4 sm:$0x11]  }
 0x123   : > { %1969 = vst [vmem:[#allocation2 + $0x1c0] sm:$0xf] %v4924_v2  ;;  %1970 = vst [vmem:[#allocation2 + $0x1d4] sm:$0xf] %v4925_v43 }
 0x124   : > { %v5559_v16 = vld [vmem:[#allocation2 + $0x198] ss:$20 sps:$4 sm:$0xff]  }
 0x126   : > { %4241 = vmatmul.mubr.bf16.gmra.mxu0 %v5546_v32 }
 0x127   : > { %4250 = vmatprep.mubr.bf16.mxu0 %v5692_v38  ;;  %4048 = vmatmul.mubr.bf16.gmra.mxu1 %v5547_v42  ;;  %v1614_v0 = vpop.permute.xlu1 %1613  ;;  %v5560_v10 = vld [vmem:[#allocation2 + $0x1c4] ss:$20 sps:$4 sm:$0xff]  }
 0x128   : > { %4057 = vmatprep.mubr.bf16.mxu1 %v5548_v31  ;;  %v1678_v3 = vsel %vm729_vm1, %v5656_v56, %v1614_v0  ;;  %v1612_v5 = vpop.permute.xlu0 %1611  ;;  %v5570_v56 = vld [vmem:[#allocation2 + $0x218] ss:$20 sps:$4 sm:$0xff]  }
 0x129   : > { %v1817_v6 = vshll.u32 %v1678_v3, 16  ;;  %v1676_v11 = vsel %vm729_vm1, %v5657_v9, %v1612_v5  ;;  %v5664_v5 = vld [vmem:[%s5761_s8 + $0xc0] sm:$0xff]  }
 0x12a   : > { %v1811_v8 = vshrl.u32 %v1676_v11, 16  ;;  %v1813_v12 = vshll.u32 %v1676_v11, 16  ;;  %v5563_v39 = vld [vmem:[#allocation2 + $0x1c0] ss:$20 sps:$4 sm:$0xff]  }
 0x12b   : > { %v1819_v33 = vrot.slane %v1817_v6, 1 }
 0x12c   : > { %v1815_v13 = vrot.slane %v1813_v12, 1 }
 0x12e   : > { %4251 = vmatmul.mubr.bf16.gmra.mxu0 %v5550_v50  ;;  %v1816_v18 = vor.u32 %v1815_v13, %v1811_v8 }
 0x12f   : > { %4260 = vmatprep.mubr.bf16.mxu0 %v5692_v38  ;;  %4058 = vmatmul.mubr.bf16.gmra.mxu1 %v5551_v61 }
 0x130   : > { %4067 = vmatprep.mubr.bf16.mxu1 %v5552_v60  ;;  %v1820_v20 = vsel %vm504_vm0, %v1816_v18, %v1819_v33 }
 0x131   : > { %v2324_v48 = vpop.permute.xlu0 %2323  ;;  %v4926_v14 = vcombine.low %v1820_v20, %v1820_v20  ;;  %v4927_v62 = vcombine.high %v1820_v20, %v1820_v20 }
 0x132   : > { %v2356_v23 = vsel %vm729_vm1, %v5658_v22, %v2324_v48 }
 0x133   : > { %v4990_v25 = vcombine.low %v2356_v23, %v2356_v23  ;;  %v4991_v26 = vcombine.high %v2356_v23, %v2356_v23  ;;  %1971 = vst [vmem:[#allocation2 + $0x1e8] sm:$0xf] %v4926_v14  ;;  %1972 = vst [vmem:[#allocation2 + $0x1fc] sm:$0xf] %v4927_v62  ;;  %v5666_v14 = vld [vmem:[%s5761_s8 + $0xc0] sm:$0xff]  }
 0x135   : > { %2499 = vst [vmem:[#allocation2 + $0x1ec] sm:$0xf] %v4990_v25  ;;  %2500 = vst [vmem:[#allocation2 + $0x200] sm:$0xf] %v4991_v26  ;;  %v2926_v25 = vlaneseq }
 0x136   : > { %4261 = vmatmul.mubr.bf16.gmra.mxu0 %v5554_v7 }
 0x137   : > { %4270 = vmatprep.mubr.bf16.mxu0 %v5692_v38  ;;  %4068 = vmatmul.mubr.bf16.gmra.mxu1 %v5555_v17  ;;  %v5665_v17 = vld [vmem:[%s5761_s8 + $0xc8] ss:$0 sps:$4 sm:$0x11]  }
 0x138   : > { %4077 = vmatprep.mubr.bf16.mxu1 %v5556_v1  ;;  %v1618_v55 = vpop.permute.xlu0 %1617 }
 0x139   : > { %v1682_v27 = vsel %vm729_vm1, %v5659_v4, %v1618_v55 }
 0x13a   : > { %v1827_v29 = vshll.u32 %v1682_v27, 16  ;;  %v5567_v35 = vld [vmem:[#allocation2 + $0x1e8] ss:$20 sps:$4 sm:$0xff]  }
 0x13c   : > { %v1829_v34 = vrot.slane %v1827_v29, 1  ;;  %v5564_v31 = vld [vmem:[#allocation2 + $0x1ec] ss:$20 sps:$4 sm:$0xff]  }
 0x13d   : > { %v1616_v28 = vpop.permute.xlu1 %1615 }
 0x13e   : > { %4271 = vmatmul.mubr.bf16.gmra.mxu0 %v5558_v24  ;;  %v1680_v30 = vsel %vm729_vm1, %v5660_v15, %v1616_v28  ;;  %v5574_v24 = vld [vmem:[#allocation2 + $0x240] ss:$20 sps:$4 sm:$0xff]   ;;  %v2927_v15 = vshrl.u32 %v2926_v25, 7 }
 0x13f   : > { %4280 = vmatprep.mubr.bf16.mxu0 %v5692_v38  ;;  %4078 = vmatmul.mubr.bf16.gmra.mxu1 %v5559_v16  ;;  %v1821_v37 = vshrl.u32 %v1680_v30, 16  ;;  %v1823_v21 = vshll.u32 %v1680_v30, 16 }
 0x140   : > { %4087 = vmatprep.mubr.bf16.mxu1 %v5560_v10 }
 0x141   : > { %v1825_v32 = vrot.slane %v1823_v21, 1 }
 0x143   : > { %v1826_v41 = vor.u32 %v1825_v32, %v1821_v37  ;;  %v5578_v32 = vld [vmem:[#allocation2 + $0x268] ss:$20 sps:$4 sm:$0xff]  }
 0x145   : > { %v1830_v42 = vsel %vm504_vm0, %v1826_v41, %v1829_v34  ;;  %v2326_v19 = vpop.permute.xlu1 %2325  ;;  %v2924_v34 = vld [vmem:[%s7117_s2] sm:$0x3] }
 0x146   : > { %4281 = vmatmul.mubr.bf16.gmra.mxu0 %v5562_v36  ;;  %v4928_v44 = vcombine.low %v1830_v42, %v1830_v42  ;;  %v4929_v45 = vcombine.high %v1830_v42, %v1830_v42  ;;  %v2358_v47 = vsel %vm729_vm1, %v5661_v46, %v2326_v19 }
 0x147   : > { %4290 = vmatprep.mubr.bf16.mxu0 %v5692_v38  ;;  %4088 = vmatmul.mubr.bf16.gmra.mxu1 %v5563_v39  ;;  %v4992_v50 = vcombine.low %v2358_v47, %v2358_v47  ;;  %v4993_v51 = vcombine.high %v2358_v47, %v2358_v47 }
 0x148   : > { %4097 = vmatprep.mubr.bf16.mxu1 %v5564_v31  ;;  %1973 = vst [vmem:[#allocation2 + $0x210] sm:$0xf] %v4928_v44  ;;  %1974 = vst [vmem:[#allocation2 + $0x224] sm:$0xf] %v4929_v45  ;;  %v2932_v31 = vsub.s32 1, %v2927_v15 }
 0x149   : > { %2501 = vst [vmem:[#allocation2 + $0x214] sm:$0xf] %v4992_v50  ;;  %2502 = vst [vmem:[#allocation2 + $0x228] sm:$0xf] %v4993_v51  ;;  %v1622_v54 = vpop.permute.xlu1 %1621 }
 0x14a   : > { %v1686_v60 = vsel %vm729_vm1, %v5663_v59, %v1622_v54  ;;  %v6712_v39 = vrot.slane %v2924_v34, %v2932_v31 }
 0x14b   : > { %v1837_v63 = vshll.u32 %v1686_v60, 16 }
 0x14c   : > { %v1620_v52 = vpop.permute.xlu0 %1619 }
 0x14d   : > { %v1684_v58 = vsel %vm729_vm1, %v5662_v57, %v1620_v52  ;;  %v1839_v2 = vrot.slane %v1837_v63, 1 }
 0x14e   : > { %4291 = vmatmul.mubr.bf16.gmra.mxu0 %v5566_v49  ;;  %v1831_v53 = vshrl.u32 %v1684_v58, 16  ;;  %v1833_v61 = vshll.u32 %v1684_v58, 16 }
 0x14f   : > { %4300 = vmatprep.mubr.bf16.mxu0 %v5692_v38  ;;  %4098 = vmatmul.mubr.bf16.gmra.mxu1 %v5567_v35  ;;  %v5571_v1 = vld [vmem:[#allocation2 + $0x210] ss:$20 sps:$4 sm:$0xff]  }
 0x150   : > { %v1835_v0 = vrot.slane %v1833_v61, 1  ;;  %v2328_v43 = vpop.permute.xlu0 %2327  ;;  %v5568_v11 = vld [vmem:[#allocation2 + $0x214] ss:$20 sps:$4 sm:$0xff]  }
 0x151   : > { %v2360_v6 = vsel %vm729_vm1, %v5664_v5, %v2328_v43  ;;  %4107 = vmatprep.mubr.bf16.mxu1 %v5568_v11 }
 0x152   : > { %v1836_v3 = vor.u32 %v1835_v0, %v1831_v53  ;;  %v4994_v7 = vcombine.low %v2360_v6, %v2360_v6  ;;  %v4995_v9 = vcombine.high %v2360_v6, %v2360_v6 }
 0x154   : > { %v1840_v8 = vsel %vm504_vm0, %v1836_v3, %v1839_v2  ;;  %2503 = vst [vmem:[#allocation2 + $0x23c] sm:$0xf] %v4994_v7  ;;  %2504 = vst [vmem:[#allocation2 + $0x250] sm:$0xf] %v4995_v9  ;;  %v1626_v33 = vpop.permute.xlu0 %1625 }
 0x155   : > { %v4930_v12 = vcombine.low %v1840_v8, %v1840_v8  ;;  %v4931_v13 = vcombine.high %v1840_v8, %v1840_v8  ;;  %v1690_v18 = vsel %vm729_vm1, %v5665_v17, %v1626_v33 }
 0x156   : > { %4301 = vmatmul.mubr.bf16.gmra.mxu0 %v5570_v56  ;;  %v1847_v48 = vshll.u32 %v1690_v18, 16 }
 0x157   : > { %4310 = vmatprep.mubr.bf16.mxu0 %v5692_v38  ;;  %1975 = vst [vmem:[#allocation2 + $0x238] sm:$0xf] %v4930_v12  ;;  %1976 = vst [vmem:[#allocation2 + $0x24c] sm:$0xf] %v4931_v13  ;;  %4108 = vmatmul.mubr.bf16.gmra.mxu1 %v5571_v1 }
 0x158   : > { %v1849_v10 = vrot.slane %v1847_v48, 1 }
 0x159   : > { %v1624_v20 = vpop.permute.xlu1 %1623 }
 0x15a   : > { %v1688_v62 = vsel %vm729_vm1, %v5666_v14, %v1624_v20  ;;  %v3866_v42 = vpop.f32.mrf.mxu1 }
 0x15b   : > { %v1841_v22 = vshrl.u32 %v1688_v62, 16  ;;  %v1843_v23 = vshll.u32 %v1688_v62, 16  ;;  %v5572_v29 = vld [vmem:[#allocation2 + $0x23c] ss:$20 sps:$4 sm:$0xff]  }
 0x15c   : > { %4117 = vmatprep.mubr.bf16.mxu1 %v5572_v29  ;;  %v3868_v45 = vpop.f32.mrf.mxu1 }
 0x15d   : > { %v1845_v26 = vrot.slane %v1843_v23, 1  ;;  %v6718_v46 = vadd.f32 %v3868_v45, %v6712_v39 }
 0x15e   : > { %4311 = vmatmul.mubr.bf16.gmra.mxu0 %v5574_v24  ;;  %v5575_v36 = vld [vmem:[#allocation2 + $0x238] ss:$20 sps:$4 sm:$0xff]   ;;  %v6720_v47 = vpop.f32.mrf.mxu0  ;;  %v3870_v49 = vpop.f32.mrf.mxu1 }
 0x15f   : > { %v2330_v16 = vpop.permute.xlu1 %2329  ;;  %v1846_v55 = vor.u32 %v1845_v26, %v1841_v22  ;;  %4320 = vmatprep.mubr.bf16.mxu0 %v5692_v38  ;;  %4118 = vmatmul.mubr.bf16.gmra.mxu1 %v5575_v36 }
 0x160   : > { %v2362_v4 = vsel %vm729_vm1, %v6565_v40, %v2330_v16  ;;  %v2928_v40 = vsub.s32 0, %v2927_v15  ;;  %v6725_v51 = vpop.f32.mrf.mxu0  ;;  %v3872_v52 = vpop.f32.mrf.mxu1 }
 0x161   : > { %v4996_v27 = vcombine.low %v2362_v4, %v2362_v4  ;;  %v4997_v28 = vcombine.high %v2362_v4, %v2362_v4  ;;  %v1850_v30 = vsel %vm504_vm0, %v1846_v55, %v1849_v10  ;;  %v6728_v54 = vadd.f32 %v3872_v52, %v6712_v39 }
 0x162   : > { %v4932_v37 = vcombine.low %v1850_v30, %v1850_v30  ;;  %v4933_v21 = vcombine.high %v1850_v30, %v1850_v30  ;;  %v6710_v38 = vrot.slane %v2924_v34, %v2928_v40  ;;  %v6730_v57 = vpop.f32.mrf.mxu0 }
 0x163   : > { %2505 = vst [vmem:[#allocation2 + $0x264] sm:$0xf] %v4996_v27  ;;  %2506 = vst [vmem:[#allocation2 + $0x278] sm:$0xf] %v4997_v28  ;;  %v3876_v58 = vpop.f32.mrf.mxu1 }
 0x164   : > { %1977 = vst [vmem:[#allocation2 + $0x260] sm:$0xf] %v4932_v37  ;;  %1978 = vst [vmem:[#allocation2 + $0x274] sm:$0xf] %v4933_v21  ;;  %v6715_v44 = vadd.f32 %v3866_v42, %v6710_v38  ;;  %v6723_v50 = vadd.f32 %v3870_v49, %v6710_v38  ;;  %v6733_v59 = vadd.f32 %v3876_v58, %v6710_v38  ;;  %v6735_v60 = vpop.f32.mrf.mxu0 }
 0x165   : > { %v3878_v35 = vpop.f32.mrf.mxu1 }
 0x166   : > { %4321 = vmatmul.mubr.bf16.gmra.mxu0 %v5578_v32  ;;  %v6738_v53 = vadd.f32 %v3878_v35, %v6712_v39 }
 0x167   : > { %v6740_v61 = vpop.f32.mrf.mxu0  ;;  %v3880_v63 = vpop.f32.mrf.mxu1 }
 0x168   : > { %v6743_v0 = vadd.f32 %v3880_v63, %v6710_v38 }
 0x169   : > { %v6745_v2 = vpop.f32.mrf.mxu0  ;;  %v3882_v43 = vpop.f32.mrf.mxu1 }
 0x16a   : > { %v5576_v41 = vld [vmem:[#allocation2 + $0x264] ss:$20 sps:$4 sm:$0xff]   ;;  %v6748_v56 = vadd.f32 %v3882_v43, %v6712_v39 }
 0x16b   : > { %v5579_v19 = vld [vmem:[#allocation2 + $0x260] ss:$20 sps:$4 sm:$0xff]   ;;  %4127 = vmatprep.mubr.bf16.mxu1 %v5576_v41  ;;  %v6750_v3 = vpop.f32.mrf.mxu0 }
 0x16c   : > { %4128 = vmatmul.mubr.bf16.gmra.mxu1 %v5579_v19 }
 0x16d   : > { %v6755_v7 = vpop.f32.mrf.mxu0 }
 0x16e   : > { %v3886_v5 = vpop.f32.mrf.mxu1 }
 0x16f   : > { %v6753_v6 = vadd.f32 %v3886_v5, %v6710_v38 }
 0x170   : > { %v3888_v9 = vpop.f32.mrf.mxu1 }
 0x171   : > { %v6758_v11 = vadd.f32 %v3888_v9, %v6712_v39 }
 0x172   : > { %v3890_v12 = vpop.f32.mrf.mxu1 }
 0x173   : > { %v6763_v13 = vadd.f32 %v3890_v12, %v6710_v38 }
 0x174   : > { %v6760_v8 = vpop.f32.mrf.mxu0  ;;  %v3892_v1 = vpop.f32.mrf.mxu1 }
 0x175   : > { %v6768_v17 = vadd.f32 %v3892_v1, %v6712_v39 }
 0x176   : > { %v6765_v33 = vpop.f32.mrf.mxu0 }
 0x177   : > { %v3896_v20 = vpop.f32.mrf.mxu1 }
 0x178   : > { %v6770_v18 = vpop.f32.mrf.mxu0  ;;  %v6773_v48 = vadd.f32 %v3896_v20, %v6710_v38 }
 0x179   : > { %v3898_v62 = vpop.f32.mrf.mxu1 }
 0x17a   : > { %7120 = vst [vmem:[#allocation4_spill] sm:$0xff] %v6773_v48  ;;  %v6775_v14 = vpop.f32.mrf.mxu0  ;;  %v6778_v22 = vadd.f32 %v3898_v62, %v6712_v39 }
 0x17b   : > { %v3900_v24 = vpop.f32.mrf.mxu1 }
 0x17c   : > { %7121 = vst [vmem:[#allocation5_spill] sm:$0xff] %v6778_v22  ;;  %v6780_v23 = vpop.f32.mrf.mxu0  ;;  %v6783_v25 = vadd.f32 %v3900_v24, %v6710_v38 }
 0x17d   : > { %v3902_v10 = vpop.f32.mrf.mxu1 }
 0x17e   : > { %7122 = vst [vmem:[#allocation6_spill] sm:$0xff] %v6783_v25  ;;  %v6785_v26 = vpop.f32.mrf.mxu0  ;;  %v6788_v16 = vadd.f32 %v3902_v10, %v6712_v39  ;;  %v3799_v25 = vadd.f32 %v6745_v2, %v6712_v39 }
 0x180   : > { %7123 = vst [vmem:[#allocation7_spill] sm:$0xff] %v6788_v16  ;;  %v6790_v55 = vpop.f32.mrf.mxu0 }
 0x182   : > { %v6795_v28 = vpop.f32.mrf.mxu0 }
 0x183   : > { %v3906_v4 = vpop.f32.mrf.mxu1 }
 0x184   : > { %v6793_v27 = vadd.f32 %v3906_v4, %v6710_v38 }
 0x185   : > { %v3908_v29 = vpop.f32.mrf.mxu1 }
 0x186   : > { %7124 = vst [vmem:[#allocation8_spill] sm:$0xff] %v6793_v27  ;;  %v6798_v15 = vadd.f32 %v3908_v29, %v6712_v39  ;;  %v6800_v30 = vpop.f32.mrf.mxu0 }
 0x187   : > { %v3910_v36 = vpop.f32.mrf.mxu1 }
 0x188   : > { %7125 = vst [vmem:[#allocation9_spill] sm:$0xff] %v6798_v15  ;;  %v6803_v37 = vadd.f32 %v3910_v36, %v6710_v38  ;;  %v6805_v21 = vpop.f32.mrf.mxu0 }
 0x189   : > { %v3912_v32 = vpop.f32.mrf.mxu1 }
 0x18a   : > { %7126 = vst [vmem:[#allocation10_spill] sm:$0xff] %v6803_v37  ;;  %v6808_v40 = vadd.f32 %v3912_v32, %v6712_v39  ;;  %v6810_v34 = vpop.f32.mrf.mxu0 }
 0x18c   : > { %7127 = vst [vmem:[#allocation11_spill] sm:$0xff] %v6808_v40  ;;  %v3916_v31 = vpop.f32.mrf.mxu1  ;;  %v6815_v42 = vpop.f32.mrf.mxu0 }
 0x18d   : > { %v6813_v41 = vadd.f32 %v3916_v31, %v6710_v38 }
 0x18e   : > { %v3918_v19 = vpop.f32.mrf.mxu1 }
 0x18f   : > { %7128 = vst [vmem:[#allocation12_spill] sm:$0xff] %v6813_v41  ;;  %v6818_v45 = vadd.f32 %v3918_v19, %v6712_v39  ;;  %v3791_v41 = vadd.f32 %v6730_v57, %v6710_v38  ;;  %v3797_v57 = vadd.f32 %v6740_v61, %v6710_v38 }
 0x190   : > { %v3920_v52 = vpop.f32.mrf.mxu1 }
 0x191   : > { %7129 = vst [vmem:[#allocation13_spill] sm:$0xff] %v6818_v45  ;;  %v6823_v58 = vadd.f32 %v3920_v52, %v6710_v38 }
 0x192   : > { %v3922_v63 = vpop.f32.mrf.mxu1 }
 0x193   : > { %v6820_v49 = vpop.f32.mrf.mxu0  ;;  %7130 = vst [vmem:[#allocation14_spill] sm:$0xff] %v6823_v58  ;;  %v6828_v43 = vadd.f32 %v3922_v63, %v6712_v39 }
 0x195   : > { %v6825_v35 = vpop.f32.mrf.mxu0  ;;  %7131 = vst [vmem:[#allocation15_spill] sm:$0xff] %v6828_v43  ;;  %v3789_v43 = vadd.f32 %v6725_v51, %v6712_v39 }
 0x196   : > { %v3926_v9 = vpop.f32.mrf.mxu1 }
 0x197   : > { %v6830_v5 = vpop.f32.mrf.mxu0  ;;  %v6833_v12 = vadd.f32 %v3926_v9, %v6710_v38 }
 0x198   : > { %v3928_v20 = vpop.f32.mrf.mxu1 }
 0x199   : > { %7132 = vst [vmem:[#allocation16_spill] sm:$0xff] %v6833_v12  ;;  %v6835_v1 = vpop.f32.mrf.mxu0  ;;  %v6838_v62 = vadd.f32 %v3928_v20, %v6712_v39 }
 0x19a   : > { %v3930_v10 = vpop.f32.mrf.mxu1 }
 0x19b   : > { %7133 = vst [vmem:[#allocation17_spill] sm:$0xff] %v6838_v62  ;;  %v6843_v4 = vadd.f32 %v3930_v10, %v6710_v38 }
 0x19c   : > { %v3932_v36 = vpop.f32.mrf.mxu1 }
 0x19d   : > { %7134 = vst [vmem:[#allocation18_spill] sm:$0xff] %v6843_v4  ;;  %v6848_v32 = vadd.f32 %v3932_v36, %v6712_v39 }
 0x19e   : > { %v6840_v24 = vpop.f32.mrf.mxu0 }
 0x19f   : > { %7135 = vst [vmem:[#allocation19_spill] sm:$0xff] %v6848_v32 }
 0x1a0   : > { %v6845_v29 = vpop.f32.mrf.mxu0  ;;  %v3936_v19 = vpop.f32.mrf.mxu1 }
 0x1a1   : > { %v6853_v52 = vadd.f32 %v3936_v19, %v6710_v38 }
 0x1a2   : > { %v6850_v31 = vpop.f32.mrf.mxu0  ;;  %v3938_v9 = vpop.f32.mrf.mxu1 }
 0x1a3   : > { %7136 = vst [vmem:[#allocation20_spill] sm:$0xff] %v6853_v52  ;;  %v6858_v20 = vadd.f32 %v3938_v9, %v6712_v39 }
 0x1a4   : > { %v6855_v63 = vpop.f32.mrf.mxu0  ;;  %v3940_v4 = vpop.f32.mrf.mxu1 }
 0x1a5   : > { %7137 = vst [vmem:[#allocation21_spill] sm:$0xff] %v6858_v20  ;;  %v6863_v62 = vadd.f32 %v3940_v4, %v6710_v38  ;;  %v3787_v20 = vadd.f32 %v6720_v47, %v6710_v38 }
 0x1a6   : > { %v6860_v10 = vpop.f32.mrf.mxu0  ;;  %v3942_v32 = vpop.f32.mrf.mxu1 }
 0x1a7   : > { %7138 = vst [vmem:[#allocation22_spill] sm:$0xff] %v6863_v62  ;;  %v6869_v12 = vadd.f32 %v3942_v32, %v6712_v39  ;;  %v6879_v32 = vstv %s4331_s13 }
 0x1a8   : > { %v6866_v36 = vpop.f32.mrf.mxu0 }
 0x1a9   : > { %7139 = vst [vmem:[#allocation23_spill] sm:$0xff] %v6869_v12 }
 0x1aa   : > { %v6871_v19 = vpop.f32.mrf.mxu0 }
 0x1ac   : > { %v6873_v52 = vpop.f32.mrf.mxu0 }
 0x1ae   : > { %v4172_v9 = vpop.f32.mrf.mxu0 }
 0x1af   : > { %v3979_v4 = vpop.f32.mrf.mxu1 }
 0x1b0   : > { %v4174_v62 = vpop.f32.mrf.mxu0  ;;  %v3980_v58 = vadd.f32 %v3979_v4, %v3787_v20  ;;  %v3793_v4 = vadd.f32 %v6735_v60, %v6712_v39 }
 0x1b1   : > { %v3981_v12 = vpop.f32.mrf.mxu1 }
 0x1b2   : > { %v4176_v45 = vpop.f32.mrf.mxu0  ;;  %v4173_v40 = vadd.f32 %v4172_v9, %v3980_v58  ;;  %v3982_v37 = vadd.f32 %v3981_v12, %v3789_v43 }
 0x1b3   : > { %v3983_v15 = vpop.f32.mrf.mxu1 }
 0x1b4   : > { %v4178_v27 = vpop.f32.mrf.mxu0  ;;  %vm4332_vm3 = vcmp.gt.f32.partialorder %v4173_v40, 0.0  ;;  %v4397_v47 = vmul.f32 %v6879_v32, %v4173_v40  ;;  %v4175_v51 = vadd.f32 %v4174_v62, %v3982_v37  ;;  %v3984_v20 = vadd.f32 %v3983_v15, %v3791_v41 }
 0x1b5   : > { %v3985_v58 = vpop.f32.mrf.mxu1 }
 0x1b6   : > { %v4182_v43 = vpop.f32.mrf.mxu0  ;;  %v4461_v12 = vsel %vm4332_vm3, %v4173_v40, %v4397_v47  ;;  %vm4333_vm4 = vcmp.gt.f32.partialorder %v4175_v51, 0.0  ;;  %v4398_v9 = vmul.f32 %v6879_v32, %v4175_v51  ;;  %v4177_v16 = vadd.f32 %v4176_v45, %v3984_v20 }
 0x1b7   : > { %4525 = vst [vmem:[%s6886_s20] sm:$0xff] %v4461_v12  ;;  %v3986_v15 = vadd.f32 %v3985_v58, %v3793_v4  ;;  %v3989_v37 = vpop.f32.mrf.mxu1  ;;  %v3801_v45 = vadd.f32 %v6750_v3, %v6710_v38  ;;  %v3807_v3 = vadd.f32 %v6760_v8, %v6710_v38 }
 0x1b8   : > { %v4184_v41 = vpop.f32.mrf.mxu0  ;;  %v4462_v60 = vsel %vm4333_vm4, %v4175_v51, %v4398_v9  ;;  %vm4334_vm5 = vcmp.gt.f32.partialorder %v4177_v16, 0.0  ;;  %v4399_v61 = vmul.f32 %v6879_v32, %v4177_v16  ;;  %v3990_v62 = vadd.f32 %v3989_v37, %v3797_v57 }
 0x1b9   : > { %4527 = vst [vmem:[%s6886_s20 + $0x10] sm:$0xff] %v4462_v60  ;;  %v4179_v22 = vadd.f32 %v4178_v27, %v3986_v15  ;;  %v3991_v40 = vpop.f32.mrf.mxu1  ;;  %v3803_v9 = vadd.f32 %v6755_v7, %v6712_v39 }
 0x1ba   : > { %v4186_v47 = vpop.f32.mrf.mxu0  ;;  %v4463_v20 = vsel %vm4334_vm5, %v4177_v16, %v4399_v61  ;;  %v4183_v48 = vadd.f32 %v4182_v43, %v3990_v62  ;;  %v3992_v2 = vadd.f32 %v3991_v40, %v3799_v25 }
 0x1bb   : > { %4526 = vst [vmem:[%s6886_s20 + $0x8] sm:$0xff] %v4463_v20  ;;  %vm4335_vm6 = vcmp.gt.f32.partialorder %v4179_v22, 0.0  ;;  %v4400_v4 = vmul.f32 %v6879_v32, %v4179_v22  ;;  %v3993_v51 = vpop.f32.mrf.mxu1 }
 0x1bc   : > { %v4188_v58 = vpop.f32.mrf.mxu0  ;;  %vm4336_vm7 = vcmp.gt.f32.partialorder %v4183_v48, 0.0  ;;  %v4401_v57 = vmul.f32 %v6879_v32, %v4183_v48  ;;  %v4185_v27 = vadd.f32 %v4184_v41, %v3992_v2  ;;  %v3994_v12 = vadd.f32 %v3993_v51, %v3801_v45 }
 0x1bd   : > { %v4464_v16 = vsel %vm4335_vm6, %v4179_v22, %v4400_v4  ;;  %v3995_v25 = vpop.f32.mrf.mxu1  ;;  %v3809_v41 = vadd.f32 %v6765_v33, %v6712_v39 }
 0x1be   : > { %v4192_v43 = vpop.f32.mrf.mxu0  ;;  %4528 = vst [vmem:[%s6886_s20 + $0x18] sm:$0xff] %v4464_v16  ;;  %v4465_v15 = vsel %vm4336_vm7, %v4183_v48, %v4401_v57  ;;  %vm4337_vm8 = vcmp.gt.f32.partialorder %v4185_v27, 0.0  ;;  %v4402_v37 = vmul.f32 %v6879_v32, %v4185_v27  ;;  %v4187_v60 = vadd.f32 %v4186_v47, %v3994_v12 }
 0x1bf   : > { %4529 = vst [vmem:[%s6886_s20 + $0x20] sm:$0xff] %v4465_v15  ;;  %v3996_v61 = vadd.f32 %v3995_v25, %v3803_v9  ;;  %v3999_v7 = vpop.f32.mrf.mxu1  ;;  %v3811_v47 = vadd.f32 %v6770_v18, %v6710_v38  ;;  %v3817_v18 = vadd.f32 %v6780_v23, %v6710_v38 }
 0x1c0   : > { %v4194_v62 = vpop.f32.mrf.mxu0  ;;  %v4466_v40 = vsel %vm4337_vm8, %v4185_v27, %v4402_v37  ;;  %vm4338_vm9 = vcmp.gt.f32.partialorder %v4187_v60, 0.0  ;;  %v4403_v8 = vmul.f32 %v6879_v32, %v4187_v60  ;;  %v4000_v22 = vadd.f32 %v3999_v7, %v3807_v3 }
 0x1c1   : > { %4531 = vst [vmem:[%s6886_s20 + $0x30] sm:$0xff] %v4466_v40  ;;  %v4189_v45 = vadd.f32 %v4188_v58, %v3996_v61  ;;  %v4001_v48 = vpop.f32.mrf.mxu1  ;;  %v3813_v3 = vadd.f32 %v6775_v14, %v6712_v39 }
 0x1c2   : > { %v4196_v20 = vpop.f32.mrf.mxu0  ;;  %v4467_v2 = vsel %vm4338_vm9, %v4187_v60, %v4403_v8  ;;  %v4193_v4 = vadd.f32 %v4192_v43, %v4000_v22  ;;  %v4002_v33 = vadd.f32 %v4001_v48, %v3809_v41  ;;  %v3819_v41 = vadd.f32 %v6785_v26, %v6712_v39 }
 0x1c3   : > { %4530 = vst [vmem:[%s6886_s20 + $0x28] sm:$0xff] %v4467_v2  ;;  %vm4339_vm10 = vcmp.gt.f32.partialorder %v4189_v45, 0.0  ;;  %v4404_v51 = vmul.f32 %v6879_v32, %v4189_v45  ;;  %v4003_v57 = vpop.f32.mrf.mxu1  ;;  %v3821_v48 = vadd.f32 %v6790_v55, %v6710_v38  ;;  %v3827_v55 = vadd.f32 %v6800_v30, %v6710_v38 }
 0x1c4   : > { %v4198_v27 = vpop.f32.mrf.mxu0  ;;  %vm4340_vm11 = vcmp.gt.f32.partialorder %v4193_v4, 0.0  ;;  %v4405_v12 = vmul.f32 %v6879_v32, %v4193_v4  ;;  %v4195_v58 = vadd.f32 %v4194_v62, %v4002_v33  ;;  %v4004_v9 = vadd.f32 %v4003_v57, %v3811_v47 }
 0x1c5   : > { %v4468_v16 = vsel %vm4339_vm10, %v4189_v45, %v4404_v51  ;;  %v4005_v25 = vpop.f32.mrf.mxu1 }
 0x1c6   : > { %v4202_v43 = vpop.f32.mrf.mxu0  ;;  %4532 = vst [vmem:[%s6886_s20 + $0x38] sm:$0xff] %v4468_v16  ;;  %v4469_v15 = vsel %vm4340_vm11, %v4193_v4, %v4405_v12  ;;  %vm4341_vm12 = vcmp.gt.f32.partialorder %v4195_v58, 0.0  ;;  %v4406_v37 = vmul.f32 %v6879_v32, %v4195_v58  ;;  %v4197_v60 = vadd.f32 %v4196_v20, %v4004_v9 }
 0x1c7   : > { %4533 = vst [vmem:[%s6886_s20 + $0x40] sm:$0xff] %v4469_v15  ;;  %v4006_v61 = vadd.f32 %v4005_v25, %v3813_v3  ;;  %v4009_v14 = vpop.f32.mrf.mxu1  ;;  %v3823_v12 = vadd.f32 %v6795_v28, %v6712_v39 }
 0x1c8   : > { %v4204_v7 = vpop.f32.mrf.mxu0  ;;  %v4470_v62 = vsel %vm4341_vm12, %v4195_v58, %v4406_v37  ;;  %vm4342_vm13 = vcmp.gt.f32.partialorder %v4197_v60, 0.0  ;;  %v4407_v23 = vmul.f32 %v6879_v32, %v4197_v60  ;;  %v4010_v40 = vadd.f32 %v4009_v14, %v3817_v18 }
 0x1c9   : > { %4535 = vst [vmem:[%s6886_s20 + $0x50] sm:$0xff] %v4470_v62  ;;  %v4199_v8 = vadd.f32 %v4198_v27, %v4006_v61  ;;  %v4011_v22 = vpop.f32.mrf.mxu1  ;;  %v3831_v62 = vadd.f32 %v6810_v34, %v6710_v38  ;;  %v3837_v34 = vadd.f32 %v6820_v49, %v6710_v38 }
 0x1ca   : > { %v4206_v45 = vpop.f32.mrf.mxu0  ;;  %v4471_v20 = vsel %vm4342_vm13, %v4197_v60, %v4407_v23  ;;  %v4203_v47 = vadd.f32 %v4202_v43, %v4010_v40  ;;  %v4012_v26 = vadd.f32 %v4011_v22, %v3819_v41  ;;  %v3829_v43 = vadd.f32 %v6805_v21, %v6712_v39 }
 0x1cb   : > { %4534 = vst [vmem:[%s6886_s20 + $0x48] sm:$0xff] %v4471_v20  ;;  %vm4343_vm14 = vcmp.gt.f32.partialorder %v4199_v8, 0.0  ;;  %v4408_v2 = vmul.f32 %v6879_v32, %v4199_v8  ;;  %v4013_v4 = vpop.f32.mrf.mxu1 }
 0x1cc   : > { %v4208_v33 = vpop.f32.mrf.mxu0  ;;  %vm4344_vm15 = vcmp.gt.f32.partialorder %v4203_v47, 0.0  ;;  %v4409_v51 = vmul.f32 %v6879_v32, %v4203_v47  ;;  %v4205_v57 = vadd.f32 %v4204_v7, %v4012_v26  ;;  %v4014_v27 = vadd.f32 %v4013_v4, %v3821_v48 }
 0x1cd   : > { %v4472_v58 = vsel %vm4343_vm14, %v4199_v8, %v4408_v2  ;;  %v4015_v9 = vpop.f32.mrf.mxu1  ;;  %v3833_v26 = vadd.f32 %v6815_v42, %v6712_v39 }
 0x1ce   : > { %v4212_v3 = vpop.f32.mrf.mxu0  ;;  %4536 = vst [vmem:[%s6886_s20 + $0x58] sm:$0xff] %v4472_v58  ;;  %v4473_v18 = vsel %vm4344_vm15, %v4203_v47, %v4409_v51  ;;  %vm4345_vm0 = vcmp.gt.f32.partialorder %v4205_v57, 0.0  ;;  %v4410_v16 = vmul.f32 %v6879_v32, %v4205_v57  ;;  %v4207_v25 = vadd.f32 %v4206_v45, %v4014_v27 }
 0x1cf   : > { %4537 = vst [vmem:[%s6886_s20 + $0x60] sm:$0xff] %v4473_v18  ;;  %v4016_v15 = vadd.f32 %v4015_v9, %v3823_v12  ;;  %v4019_v28 = vpop.f32.mrf.mxu1  ;;  %v3839_v12 = vadd.f32 %v6825_v35, %v6712_v39 }
 0x1d0   : > { %v4214_v37 = vpop.f32.mrf.mxu0  ;;  %v4474_v60 = vsel %vm4345_vm0, %v4205_v57, %v4410_v16  ;;  %vm4346_vm1 = vcmp.gt.f32.partialorder %v4207_v25, 0.0  ;;  %v4411_v30 = vmul.f32 %v6879_v32, %v4207_v25  ;;  %v4020_v41 = vadd.f32 %v4019_v28, %v3827_v55 }
 0x1d1   : > { %4539 = vst [vmem:[%s6886_s20 + $0x70] sm:$0xff] %v4474_v60  ;;  %v4209_v61 = vadd.f32 %v4208_v33, %v4016_v15  ;;  %v4021_v14 = vpop.f32.mrf.mxu1 }
 0x1d2   : > { %v4216_v7 = vpop.f32.mrf.mxu0  ;;  %v4475_v23 = vsel %vm4346_vm1, %v4207_v25, %v4411_v30  ;;  %v4213_v40 = vadd.f32 %v4212_v3, %v4020_v41  ;;  %v4022_v21 = vadd.f32 %v4021_v14, %v3829_v43  ;;  %v3841_v43 = vadd.f32 %v6830_v5, %v6710_v38 }
 0x1d3   : > { %4538 = vst [vmem:[%s6886_s20 + $0x68] sm:$0xff] %v4475_v23  ;;  %vm4347_vm2 = vcmp.gt.f32.partialorder %v4209_v61, 0.0  ;;  %v4412_v8 = vmul.f32 %v6879_v32, %v4209_v61  ;;  %v4023_v22 = vpop.f32.mrf.mxu1  ;;  %v3847_v5 = vadd.f32 %v6840_v24, %v6710_v38 }
 0x1d4   : > { %v4218_v45 = vpop.f32.mrf.mxu0  ;;  %vm4348_vm3 = vcmp.gt.f32.partialorder %v4213_v40, 0.0  ;;  %v4413_v48 = vmul.f32 %v6879_v32, %v4213_v40  ;;  %v4215_v20 = vadd.f32 %v4214_v37, %v4022_v21  ;;  %v4024_v47 = vadd.f32 %v4023_v22, %v3831_v62 }
 0x1d5   : > { %v4476_v2 = vsel %vm4347_vm2, %v4209_v61, %v4412_v8  ;;  %v4025_v4 = vpop.f32.mrf.mxu1 }
 0x1d6   : > { %v4222_v33 = vpop.f32.mrf.mxu0  ;;  %4540 = vst [vmem:[%s6886_s20 + $0x78] sm:$0xff] %v4476_v2  ;;  %v4477_v51 = vsel %vm4348_vm3, %v4213_v40, %v4413_v48  ;;  %vm4349_vm4 = vcmp.gt.f32.partialorder %v4215_v20, 0.0  ;;  %v4414_v57 = vmul.f32 %v6879_v32, %v4215_v20  ;;  %v4217_v27 = vadd.f32 %v4216_v7, %v4024_v47 }
 0x1d7   : > { %4541 = vst [vmem:[%s6886_s20 + $0x80] sm:$0xff] %v4477_v51  ;;  %v4026_v55 = vadd.f32 %v4025_v4, %v3833_v26  ;;  %v4029_v42 = vpop.f32.mrf.mxu1  ;;  %v3843_v7 = vadd.f32 %v6835_v1, %v6712_v39 }
 0x1d8   : > { %v4224_v58 = vpop.f32.mrf.mxu0  ;;  %v4478_v9 = vsel %vm4349_vm4, %v4215_v20, %v4414_v57  ;;  %vm4350_vm5 = vcmp.gt.f32.partialorder %v4217_v27, 0.0  ;;  %v4415_v49 = vmul.f32 %v6879_v32, %v4217_v27  ;;  %v4030_v3 = vadd.f32 %v4029_v42, %v3837_v34 }
 0x1d9   : > { %4543 = vst [vmem:[%s6886_s20 + $0x90] sm:$0xff] %v4478_v9  ;;  %v4219_v18 = vadd.f32 %v4218_v45, %v4026_v55  ;;  %v4031_v16 = vpop.f32.mrf.mxu1  ;;  %v3849_v45 = vadd.f32 %v6845_v29, %v6712_v39 }
 0x1da   : > { %v4226_v25 = vpop.f32.mrf.mxu0  ;;  %v4479_v15 = vsel %vm4350_vm5, %v4217_v27, %v4415_v49  ;;  %v4223_v28 = vadd.f32 %v4222_v33, %v4030_v3  ;;  %v4032_v35 = vadd.f32 %v4031_v16, %v3839_v12  ;;  %v3851_v33 = vadd.f32 %v6850_v31, %v6710_v38 }
 0x1db   : > { %4542 = vst [vmem:[%s6886_s20 + $0x88] sm:$0xff] %v4479_v15  ;;  %vm4351_vm6 = vcmp.gt.f32.partialorder %v4219_v18, 0.0  ;;  %v4416_v37 = vmul.f32 %v6879_v32, %v4219_v18  ;;  %v4033_v60 = vpop.f32.mrf.mxu1  ;;  %v3853_v49 = vadd.f32 %v6855_v63, %v6712_v39  ;;  %v3857_v31 = vadd.f32 %v6860_v10, %v6710_v38 }
 0x1dc   : > { %v4228_v30 = vpop.f32.mrf.mxu0  ;;  %vm4352_vm7 = vcmp.gt.f32.partialorder %v4223_v28, 0.0  ;;  %v4417_v41 = vmul.f32 %v6879_v32, %v4223_v28  ;;  %v4225_v61 = vadd.f32 %v4224_v58, %v4032_v35  ;;  %v4034_v14 = vadd.f32 %v4033_v60, %v3841_v43 }
 0x1dd   : > { %v4480_v62 = vsel %vm4351_vm6, %v4219_v18, %v4416_v37  ;;  %v4035_v23 = vpop.f32.mrf.mxu1 }
 0x1de   : > { %v4232_v40 = vpop.f32.mrf.mxu0  ;;  %4544 = vst [vmem:[%s6886_s20 + $0x98] sm:$0xff] %v4480_v62  ;;  %v4481_v21 = vsel %vm4352_vm7, %v4223_v28, %v4417_v41  ;;  %vm4353_vm8 = vcmp.gt.f32.partialorder %v4225_v61, 0.0  ;;  %v4418_v8 = vmul.f32 %v6879_v32, %v4225_v61  ;;  %v4227_v22 = vadd.f32 %v4226_v25, %v4034_v14 }
 0x1df   : > { %4545 = vst [vmem:[%s6886_s20 + $0xa0] sm:$0xff] %v4481_v21  ;;  %v4036_v48 = vadd.f32 %v4035_v23, %v3843_v7  ;;  %v4039_v1 = vpop.f32.mrf.mxu1  ;;  %v3859_v28 = vadd.f32 %v6866_v36, %v6712_v39  ;;  %v3861_v7 = vadd.f32 %v6871_v19, %v6710_v38 }
 0x1e0   : > { %v4234_v20 = vpop.f32.mrf.mxu0  ;;  %v4482_v47 = vsel %vm4353_vm8, %v4225_v61, %v4418_v8  ;;  %vm4354_vm9 = vcmp.gt.f32.partialorder %v4227_v22, 0.0  ;;  %v4419_v24 = vmul.f32 %v6879_v32, %v4227_v22  ;;  %v4040_v26 = vadd.f32 %v4039_v1, %v3847_v5 }
 0x1e1   : > { %4547 = vst [vmem:[%s6886_s20 + $0xb0] sm:$0xff] %v4482_v47  ;;  %v4229_v34 = vadd.f32 %v4228_v30, %v4036_v48  ;;  %v4041_v2 = vpop.f32.mrf.mxu1  ;;  %v3863_v48 = vadd.f32 %v6873_v52, %v6712_v39 }
 0x1e2   : > { %v4236_v4 = vpop.f32.mrf.mxu0  ;;  %v4483_v51 = vsel %vm4354_vm9, %v4227_v22, %v4419_v24  ;;  %v4233_v57 = vadd.f32 %v4232_v40, %v4040_v26  ;;  %v4042_v29 = vadd.f32 %v4041_v2, %v3849_v45 }
 0x1e3   : > { %4546 = vst [vmem:[%s6886_s20 + $0xa8] sm:$0xff] %v4483_v51  ;;  %vm4355_vm10 = vcmp.gt.f32.partialorder %v4229_v34, 0.0  ;;  %v4420_v27 = vmul.f32 %v6879_v32, %v4229_v34  ;;  %v4043_v12 = vpop.f32.mrf.mxu1 }
 0x1e4   : > { %v4238_v55 = vpop.f32.mrf.mxu0  ;;  %vm4356_vm11 = vcmp.gt.f32.partialorder %v4233_v57, 0.0  ;;  %v4421_v42 = vmul.f32 %v6879_v32, %v4233_v57  ;;  %v4235_v58 = vadd.f32 %v4234_v20, %v4042_v29  ;;  %v4044_v9 = vadd.f32 %v4043_v12, %v3851_v33 }
 0x1e5   : > { %v4484_v3 = vsel %vm4355_vm10, %v4229_v34, %v4420_v27  ;;  %v4045_v18 = vpop.f32.mrf.mxu1 }
 0x1e6   : > { %v4242_v16 = vpop.f32.mrf.mxu0  ;;  %4548 = vst [vmem:[%s6886_s20 + $0xb8] sm:$0xff] %v4484_v3  ;;  %v4485_v25 = vsel %vm4356_vm11, %v4233_v57, %v4421_v42  ;;  %vm4357_vm12 = vcmp.gt.f32.partialorder %v4235_v58, 0.0  ;;  %v4422_v43 = vmul.f32 %v6879_v32, %v4235_v58  ;;  %v4237_v15 = vadd.f32 %v4236_v4, %v4044_v9 }
 0x1e7   : > { %4549 = vst [vmem:[%s6886_s20 + $0xc0] sm:$0xff] %v4485_v25  ;;  %v4046_v35 = vadd.f32 %v4045_v18, %v3853_v49  ;;  %v4049_v63 = vpop.f32.mrf.mxu1 }
 0x1e8   : > { %v4244_v37 = vpop.f32.mrf.mxu0  ;;  %v4486_v60 = vsel %vm4357_vm12, %v4235_v58, %v4422_v43  ;;  %vm4358_vm13 = vcmp.gt.f32.partialorder %v4237_v15, 0.0  ;;  %v4423_v10 = vmul.f32 %v6879_v32, %v4237_v15  ;;  %v4050_v30 = vadd.f32 %v4049_v63, %v3857_v31 }
 0x1e9   : > { %4551 = vst [vmem:[%s6886_s20 + $0xd0] sm:$0xff] %v4486_v60  ;;  %v4239_v41 = vadd.f32 %v4238_v55, %v4046_v35  ;;  %v4051_v61 = vpop.f32.mrf.mxu1 }
 0x1ea   : > { %v4246_v14 = vpop.f32.mrf.mxu0  ;;  %v4487_v5 = vsel %vm4358_vm13, %v4237_v15, %v4423_v10  ;;  %v4243_v36 = vadd.f32 %v4242_v16, %v4050_v30  ;;  %v4052_v62 = vadd.f32 %v4051_v61, %v3859_v28 }
 0x1eb   : > { %4550 = vst [vmem:[%s6886_s20 + $0xc8] sm:$0xff] %v4487_v5  ;;  %vm4359_vm14 = vcmp.gt.f32.partialorder %v4239_v41, 0.0  ;;  %v4424_v23 = vmul.f32 %v6879_v32, %v4239_v41  ;;  %v4053_v40 = vpop.f32.mrf.mxu1 }
 0x1ec   : > { %v4248_v21 = vpop.f32.mrf.mxu0  ;;  %vm4360_vm15 = vcmp.gt.f32.partialorder %v4243_v36, 0.0  ;;  %v4425_v8 = vmul.f32 %v6879_v32, %v4243_v36  ;;  %v4245_v22 = vadd.f32 %v4244_v37, %v4052_v62  ;;  %v4054_v45 = vadd.f32 %v4053_v40, %v3861_v7 }
 0x1ed   : > { %v4488_v38 = vsel %vm4359_vm14, %v4239_v41, %v4424_v23  ;;  %v4055_v19 = vpop.f32.mrf.mxu1 }
 0x1ee   : > { %v4252_v1 = vpop.f32.mrf.mxu0  ;;  %4552 = vst [vmem:[%s6886_s20 + $0xd8] sm:$0xff] %v4488_v38  ;;  %v4489_v20 = vsel %vm4360_vm15, %v4243_v36, %v4425_v8  ;;  %vm4361_vm0 = vcmp.gt.f32.partialorder %v4245_v22, 0.0  ;;  %v4426_v47 = vmul.f32 %v6879_v32, %v4245_v22  ;;  %v4247_v24 = vadd.f32 %v4246_v14, %v4054_v45 }
 0x1ef   : > { %4553 = vst [vmem:[%s6886_s20 + $0xe0] sm:$0xff] %v4489_v20  ;;  %v4056_v26 = vadd.f32 %v4055_v19, %v3863_v48  ;;  %v4059_v34 = vpop.f32.mrf.mxu1 }
 0x1f0   : > { %v4254_v2 = vpop.f32.mrf.mxu0  ;;  %v4490_v4 = vsel %vm4361_vm0, %v4245_v22, %v4426_v47  ;;  %vm4362_vm1 = vcmp.gt.f32.partialorder %v4247_v24, 0.0  ;;  %v4427_v33 = vmul.f32 %v6879_v32, %v4247_v24  ;;  %v4060_v39 = vadd.f32 %v4059_v34, %v6715_v44 }
 0x1f1   : > { %4555 = vst [vmem:[%s6886_s20 + $0xf0] sm:$0xff] %v4490_v4  ;;  %v4249_v52 = vadd.f32 %v4248_v21, %v4056_v26  ;;  %v4061_v51 = vpop.f32.mrf.mxu1 }
 0x1f2   : > { %v4256_v57 = vpop.f32.mrf.mxu0  ;;  %v4491_v29 = vsel %vm4362_vm1, %v4247_v24, %v4427_v33  ;;  %v4253_v27 = vadd.f32 %v4252_v1, %v4060_v39  ;;  %v4062_v12 = vadd.f32 %v4061_v51, %v6718_v46 }
 0x1f3   : > { %4554 = vst [vmem:[%s6886_s20 + $0xe8] sm:$0xff] %v4491_v29  ;;  %vm4363_vm2 = vcmp.gt.f32.partialorder %v4249_v52, 0.0  ;;  %v4428_v55 = vmul.f32 %v6879_v32, %v4249_v52  ;;  %v4063_v42 = vpop.f32.mrf.mxu1 }
 0x1f4   : > { %v4258_v58 = vpop.f32.mrf.mxu0  ;;  %vm4364_vm3 = vcmp.gt.f32.partialorder %v4253_v27, 0.0  ;;  %v4429_v9 = vmul.f32 %v6879_v32, %v4253_v27  ;;  %v4255_v44 = vadd.f32 %v4254_v2, %v4062_v12  ;;  %v4064_v49 = vadd.f32 %v4063_v42, %v6723_v50 }
 0x1f5   : > { %v4492_v31 = vsel %vm4363_vm2, %v4249_v52, %v4428_v55  ;;  %v4065_v3 = vpop.f32.mrf.mxu1 }
 0x1f6   : > { %v4262_v18 = vpop.f32.mrf.mxu0  ;;  %4556 = vst [vmem:[%s6886_s20 + $0xf8] sm:$0xff] %v4492_v31  ;;  %v4493_v16 = vsel %vm4364_vm3, %v4253_v27, %v4429_v9  ;;  %vm4365_vm4 = vcmp.gt.f32.partialorder %v4255_v44, 0.0  ;;  %v4430_v46 = vmul.f32 %v6879_v32, %v4255_v44  ;;  %v4257_v25 = vadd.f32 %v4256_v57, %v4064_v49  ;;  %v7140_v9 = vld [vmem:[#allocation4_spill] sm:$0xff] }
 0x1f7   : > { %4557 = vst [vmem:[%s6886_s20 + $0x100] sm:$0xff] %v4493_v16  ;;  %v4066_v43 = vadd.f32 %v4065_v3, %v6728_v54  ;;  %v4069_v15 = vpop.f32.mrf.mxu1 }
 0x1f8   : > { %v4264_v28 = vpop.f32.mrf.mxu0  ;;  %v4494_v35 = vsel %vm4365_vm4, %v4255_v44, %v4430_v46  ;;  %vm4366_vm5 = vcmp.gt.f32.partialorder %v4257_v25, 0.0  ;;  %v4431_v50 = vmul.f32 %v6879_v32, %v4257_v25  ;;  %v4070_v63 = vadd.f32 %v4069_v15, %v6733_v59  ;;  %v7141_v46 = vld [vmem:[#allocation5_spill] sm:$0xff] }
 0x1f9   : > { %4559 = vst [vmem:[%s6886_s20 + $0x110] sm:$0xff] %v4494_v35  ;;  %v4259_v37 = vadd.f32 %v4258_v58, %v4066_v43  ;;  %v4071_v60 = vpop.f32.mrf.mxu1 }
 0x1fa   : > { %v4266_v10 = vpop.f32.mrf.mxu0  ;;  %v4495_v30 = vsel %vm4366_vm5, %v4257_v25, %v4431_v50  ;;  %v4263_v41 = vadd.f32 %v4262_v18, %v4070_v63  ;;  %v4072_v61 = vadd.f32 %v4071_v60, %v6738_v53  ;;  %v7142_v50 = vld [vmem:[#allocation6_spill] sm:$0xff] }
 0x1fb   : > { %4558 = vst [vmem:[%s6886_s20 + $0x108] sm:$0xff] %v4495_v30  ;;  %vm4367_vm6 = vcmp.gt.f32.partialorder %v4259_v37, 0.0  ;;  %v4432_v54 = vmul.f32 %v6879_v32, %v4259_v37  ;;  %v4073_v14 = vpop.f32.mrf.mxu1 }
 0x1fc   : > { %v4268_v7 = vpop.f32.mrf.mxu0  ;;  %vm4368_vm7 = vcmp.gt.f32.partialorder %v4263_v41, 0.0  ;;  %v4433_v5 = vmul.f32 %v6879_v32, %v4263_v41  ;;  %v4265_v59 = vadd.f32 %v4264_v28, %v4072_v61  ;;  %v4074_v36 = vadd.f32 %v4073_v14, %v6743_v0 }
 0x1fd   : > { %v4496_v62 = vsel %vm4367_vm6, %v4259_v37, %v4432_v54  ;;  %v4075_v23 = vpop.f32.mrf.mxu1  ;;  %v7143_v54 = vld [vmem:[#allocation7_spill] sm:$0xff] }
 0x1fe   : > { %v4272_v40 = vpop.f32.mrf.mxu0  ;;  %4560 = vst [vmem:[%s6886_s20 + $0x118] sm:$0xff] %v4496_v62  ;;  %v4497_v21 = vsel %vm4368_vm7, %v4263_v41, %v4433_v5  ;;  %vm4369_vm8 = vcmp.gt.f32.partialorder %v4265_v59, 0.0  ;;  %v4434_v53 = vmul.f32 %v6879_v32, %v4265_v59  ;;  %v4267_v8 = vadd.f32 %v4266_v10, %v4074_v36  ;;  %v7144_v62 = vld [vmem:[#allocation8_spill] sm:$0xff] }
 0x1ff   : > { %4561 = vst [vmem:[%s6886_s20 + $0x120] sm:$0xff] %v4497_v21  ;;  %v4076_v22 = vadd.f32 %v4075_v23, %v6748_v56  ;;  %v4079_v45 = vpop.f32.mrf.mxu1 }
 0x200   : > { %v4274_v48 = vpop.f32.mrf.mxu0  ;;  %v4498_v38 = vsel %vm4369_vm8, %v4265_v59, %v4434_v53  ;;  %vm4370_vm9 = vcmp.gt.f32.partialorder %v4267_v8, 0.0  ;;  %v4435_v0 = vmul.f32 %v6879_v32, %v4267_v8  ;;  %v4080_v19 = vadd.f32 %v4079_v45, %v6753_v6  ;;  %v7145_v45 = vld [vmem:[#allocation9_spill] sm:$0xff] }
 0x201   : > { %4563 = vst [vmem:[%s6886_s20 + $0x130] sm:$0xff] %v4498_v38  ;;  %v4269_v1 = vadd.f32 %v4268_v7, %v4076_v22  ;;  %v4081_v20 = vpop.f32.mrf.mxu1 }
 0x202   : > { %v4276_v47 = vpop.f32.mrf.mxu0  ;;  %v4499_v24 = vsel %vm4370_vm9, %v4267_v8, %v4435_v0  ;;  %v4273_v26 = vadd.f32 %v4272_v40, %v4080_v19  ;;  %v4082_v34 = vadd.f32 %v4081_v20, %v6758_v11 }
 0x203   : > { %4562 = vst [vmem:[%s6886_s20 + $0x128] sm:$0xff] %v4499_v24  ;;  %vm4371_vm10 = vcmp.gt.f32.partialorder %v4269_v1, 0.0  ;;  %v4436_v56 = vmul.f32 %v6879_v32, %v4269_v1  ;;  %v4083_v2 = vpop.f32.mrf.mxu1 }
 0x204   : > { %v4278_v4 = vpop.f32.mrf.mxu0  ;;  %vm4372_vm11 = vcmp.gt.f32.partialorder %v4273_v26, 0.0  ;;  %v4437_v33 = vmul.f32 %v6879_v32, %v4273_v26  ;;  %v4275_v6 = vadd.f32 %v4274_v48, %v4082_v34  ;;  %v4084_v39 = vadd.f32 %v4083_v2, %v6763_v13 }
 0x205   : > { %v4500_v52 = vsel %vm4371_vm10, %v4269_v1, %v4436_v56  ;;  %v4085_v51 = vpop.f32.mrf.mxu1 }
 0x206   : > { %v4282_v57 = vpop.f32.mrf.mxu0  ;;  %4564 = vst [vmem:[%s6886_s20 + $0x138] sm:$0xff] %v4500_v52  ;;  %v4501_v29 = vsel %vm4372_vm11, %v4273_v26, %v4437_v33  ;;  %vm4373_vm12 = vcmp.gt.f32.partialorder %v4275_v6, 0.0  ;;  %v4438_v11 = vmul.f32 %v6879_v32, %v4275_v6  ;;  %v4277_v27 = vadd.f32 %v4276_v47, %v4084_v39  ;;  %v7146_v47 = vld [vmem:[#allocation10_spill] sm:$0xff] }
 0x207   : > { %4565 = vst [vmem:[%s6886_s20 + $0x140] sm:$0xff] %v4501_v29  ;;  %v4086_v12 = vadd.f32 %v4085_v51, %v6768_v17  ;;  %v4089_v55 = vpop.f32.mrf.mxu1 }
 0x208   : > { %v4284_v42 = vpop.f32.mrf.mxu0  ;;  %v4502_v58 = vsel %vm4373_vm12, %v4275_v6, %v4438_v11  ;;  %vm4374_vm13 = vcmp.gt.f32.partialorder %v4277_v27, 0.0  ;;  %v4439_v13 = vmul.f32 %v6879_v32, %v4277_v27  ;;  %v4090_v44 = vadd.f32 %v4089_v55, %v7140_v9  ;;  %v7147_v6 = vld [vmem:[#allocation11_spill] sm:$0xff]  ;;  %v7148_v11 = vld [vmem:[#allocation12_spill] sm:$0xff]  ;;  %v7149_v9 = vld [vmem:[#allocation13_spill] sm:$0xff] }
 0x209   : > { %4567 = vst [vmem:[%s6886_s20 + $0x150] sm:$0xff] %v4502_v58  ;;  %v4279_v49 = vadd.f32 %v4278_v4, %v4086_v12  ;;  %v4091_v31 = vpop.f32.mrf.mxu1 }
 0x20a   : > { %v4286_v3 = vpop.f32.mrf.mxu0  ;;  %v4503_v18 = vsel %vm4374_vm13, %v4277_v27, %v4439_v13  ;;  %v4283_v16 = vadd.f32 %v4282_v57, %v4090_v44  ;;  %v4092_v25 = vadd.f32 %v4091_v31, %v7141_v46  ;;  %v7150_v46 = vld [vmem:[#allocation14_spill] sm:$0xff] }
 0x20b   : > { %4566 = vst [vmem:[%s6886_s20 + $0x148] sm:$0xff] %v4503_v18  ;;  %vm4375_vm14 = vcmp.gt.f32.partialorder %v4279_v49, 0.0  ;;  %v4440_v17 = vmul.f32 %v6879_v32, %v4279_v49  ;;  %v4093_v43 = vpop.f32.mrf.mxu1 }
 0x20c   : > { %v4288_v15 = vpop.f32.mrf.mxu0  ;;  %vm4376_vm15 = vcmp.gt.f32.partialorder %v4283_v16, 0.0  ;;  %v4441_v28 = vmul.f32 %v6879_v32, %v4283_v16  ;;  %v4285_v35 = vadd.f32 %v4284_v42, %v4092_v25  ;;  %v4094_v63 = vadd.f32 %v4093_v43, %v7142_v50 }
 0x20d   : > { %v4504_v37 = vsel %vm4375_vm14, %v4279_v49, %v4440_v17  ;;  %v4095_v60 = vpop.f32.mrf.mxu1 }
 0x20e   : > { %v4292_v10 = vpop.f32.mrf.mxu0  ;;  %4568 = vst [vmem:[%s6886_s20 + $0x158] sm:$0xff] %v4504_v37  ;;  %v4505_v30 = vsel %vm4376_vm15, %v4283_v16, %v4441_v28  ;;  %vm4377_vm0 = vcmp.gt.f32.partialorder %v4285_v35, 0.0  ;;  %v4442_v41 = vmul.f32 %v6879_v32, %v4285_v35  ;;  %v4287_v61 = vadd.f32 %v4286_v3, %v4094_v63  ;;  %v7151_v63 = vld [vmem:[#allocation15_spill] sm:$0xff] }
 0x20f   : > { %4569 = vst [vmem:[%s6886_s20 + $0x160] sm:$0xff] %v4505_v30  ;;  %v4096_v14 = vadd.f32 %v4095_v60, %v7143_v54  ;;  %v4099_v7 = vpop.f32.mrf.mxu1 }
 0x210   : > { %v4294_v5 = vpop.f32.mrf.mxu0  ;;  %v4506_v59 = vsel %vm4377_vm0, %v4285_v35, %v4442_v41  ;;  %vm4378_vm1 = vcmp.gt.f32.partialorder %v4287_v61, 0.0  ;;  %v4443_v36 = vmul.f32 %v6879_v32, %v4287_v61  ;;  %v4100_v23 = vadd.f32 %v4099_v7, %v7144_v62  ;;  %v7152_v7 = vld [vmem:[#allocation16_spill] sm:$0xff] }
 0x211   : > { %4571 = vst [vmem:[%s6886_s20 + $0x170] sm:$0xff] %v4506_v59  ;;  %v4289_v40 = vadd.f32 %v4288_v15, %v4096_v14  ;;  %v4101_v21 = vpop.f32.mrf.mxu1 }
 0x212   : > { %v4296_v53 = vpop.f32.mrf.mxu0  ;;  %v4507_v8 = vsel %vm4378_vm1, %v4287_v61, %v4443_v36  ;;  %v4293_v22 = vadd.f32 %v4292_v10, %v4100_v23  ;;  %v4102_v48 = vadd.f32 %v4101_v21, %v7145_v45  ;;  %v7153_v23 = vld [vmem:[#allocation17_spill] sm:$0xff] }
 0x213   : > { %4570 = vst [vmem:[%s6886_s20 + $0x168] sm:$0xff] %v4507_v8  ;;  %vm4379_vm2 = vcmp.gt.f32.partialorder %v4289_v40, 0.0  ;;  %v4444_v38 = vmul.f32 %v6879_v32, %v4289_v40  ;;  %v4103_v0 = vpop.f32.mrf.mxu1 }
 0x214   : > { %v4298_v19 = vpop.f32.mrf.mxu0  ;;  %vm4380_vm3 = vcmp.gt.f32.partialorder %v4293_v22, 0.0  ;;  %v4445_v1 = vmul.f32 %v6879_v32, %v4293_v22  ;;  %v4295_v20 = vadd.f32 %v4294_v5, %v4102_v48  ;;  %v4104_v24 = vadd.f32 %v4103_v0, %v7146_v47  ;;  %v7154_v48 = vld [vmem:[#allocation18_spill] sm:$0xff]  ;;  %v7155_v47 = vld [vmem:[#allocation19_spill] sm:$0xff] }
 0x215   : > { %v4508_v26 = vsel %vm4379_vm2, %v4289_v40, %v4444_v38  ;;  %v4105_v34 = vpop.f32.mrf.mxu1 }
 0x216   : > { %v4302_v56 = vpop.f32.mrf.mxu0  ;;  %4572 = vst [vmem:[%s6886_s20 + $0x178] sm:$0xff] %v4508_v26  ;;  %v4509_v2 = vsel %vm4380_vm3, %v4293_v22, %v4445_v1  ;;  %vm4381_vm4 = vcmp.gt.f32.partialorder %v4295_v20, 0.0  ;;  %v4446_v4 = vmul.f32 %v6879_v32, %v4295_v20  ;;  %v4297_v33 = vadd.f32 %v4296_v53, %v4104_v24 }
 0x217   : > { %4573 = vst [vmem:[%s6886_s20 + $0x180] sm:$0xff] %v4509_v2  ;;  %v4106_v39 = vadd.f32 %v4105_v34, %v7147_v6  ;;  %v4109_v52 = vpop.f32.mrf.mxu1 }
 0x218   : > { %v4304_v51 = vpop.f32.mrf.mxu0  ;;  %v4510_v57 = vsel %vm4381_vm4, %v4295_v20, %v4446_v4  ;;  %vm4382_vm5 = vcmp.gt.f32.partialorder %v4297_v33, 0.0  ;;  %v4447_v29 = vmul.f32 %v6879_v32, %v4297_v33  ;;  %v4110_v27 = vadd.f32 %v4109_v52, %v7148_v11 }
 0x219   : > { %4575 = vst [vmem:[%s6886_s20 + $0x190] sm:$0xff] %v4510_v57  ;;  %v4299_v12 = vadd.f32 %v4298_v19, %v4106_v39  ;;  %v4111_v55 = vpop.f32.mrf.mxu1  ;;  %v7156_v39 = vld [vmem:[#allocation20_spill] sm:$0xff] }
 0x21a   : > { %v4306_v42 = vpop.f32.mrf.mxu0  ;;  %v4511_v58 = vsel %vm4382_vm5, %v4297_v33, %v4447_v29  ;;  %v4303_v13 = vadd.f32 %v4302_v56, %v4110_v27  ;;  %v4112_v44 = vadd.f32 %v4111_v55, %v7149_v9  ;;  %v7157_v27 = vld [vmem:[#allocation21_spill] sm:$0xff]  ;;  %v7158_v9 = vld [vmem:[#allocation22_spill] sm:$0xff] }
 0x21b   : > { %4574 = vst [vmem:[%s6886_s20 + $0x188] sm:$0xff] %v4511_v58  ;;  %vm4383_vm6 = vcmp.gt.f32.partialorder %v4299_v12, 0.0  ;;  %v4448_v49 = vmul.f32 %v6879_v32, %v4299_v12  ;;  %v4113_v31 = vpop.f32.mrf.mxu1 }
 0x21c   : > { %v4308_v3 = vpop.f32.mrf.mxu0  ;;  %vm4384_vm7 = vcmp.gt.f32.partialorder %v4303_v13, 0.0  ;;  %v4449_v18 = vmul.f32 %v6879_v32, %v4303_v13  ;;  %v4305_v16 = vadd.f32 %v4304_v51, %v4112_v44  ;;  %v4114_v25 = vadd.f32 %v4113_v31, %v7150_v46 }
 0x21d   : > { %v4512_v17 = vsel %vm4383_vm6, %v4299_v12, %v4448_v49  ;;  %v4115_v43 = vpop.f32.mrf.mxu1 }
 0x21e   : > { %v4312_v15 = vpop.f32.mrf.mxu0  ;;  %4576 = vst [vmem:[%s6886_s20 + $0x198] sm:$0xff] %v4512_v17  ;;  %v4513_v28 = vsel %vm4384_vm7, %v4303_v13, %v4449_v18  ;;  %vm4385_vm8 = vcmp.gt.f32.partialorder %v4305_v16, 0.0  ;;  %v4450_v35 = vmul.f32 %v6879_v32, %v4305_v16  ;;  %v4307_v50 = vadd.f32 %v4306_v42, %v4114_v25 }
 0x21f   : > { %4577 = vst [vmem:[%s6886_s20 + $0x1a0] sm:$0xff] %v4513_v28  ;;  %v4116_v37 = vadd.f32 %v4115_v43, %v7151_v63  ;;  %v4119_v61 = vpop.f32.mrf.mxu1 }
 0x220   : > { %v4314_v60 = vpop.f32.mrf.mxu0  ;;  %v4514_v10 = vsel %vm4385_vm8, %v4305_v16, %v4450_v35  ;;  %vm4386_vm9 = vcmp.gt.f32.partialorder %v4307_v50, 0.0  ;;  %v4451_v30 = vmul.f32 %v6879_v32, %v4307_v50  ;;  %v4120_v5 = vadd.f32 %v4119_v61, %v7152_v7  ;;  %v7159_v16 = vld [vmem:[#allocation23_spill] sm:$0xff] }
 0x221   : > { %4579 = vst [vmem:[%s6886_s20 + $0x1b0] sm:$0xff] %v4514_v10  ;;  %v4309_v41 = vadd.f32 %v4308_v3, %v4116_v37  ;;  %v4121_v36 = vpop.f32.mrf.mxu1 }
 0x222   : > { %v4316_v54 = vpop.f32.mrf.mxu0  ;;  %v4515_v14 = vsel %vm4386_vm9, %v4307_v50, %v4451_v30  ;;  %v4313_v62 = vadd.f32 %v4312_v15, %v4120_v5  ;;  %v4122_v40 = vadd.f32 %v4121_v36, %v7153_v23 }
 0x223   : > { %4578 = vst [vmem:[%s6886_s20 + $0x1a8] sm:$0xff] %v4515_v14  ;;  %vm4387_vm10 = vcmp.gt.f32.partialorder %v4309_v41, 0.0  ;;  %v4452_v59 = vmul.f32 %v6879_v32, %v4309_v41  ;;  %v4123_v53 = vpop.f32.mrf.mxu1 }
 0x224   : > { %v4318_v8 = vpop.f32.mrf.mxu0  ;;  %vm4388_vm11 = vcmp.gt.f32.partialorder %v4313_v62, 0.0  ;;  %v4453_v22 = vmul.f32 %v6879_v32, %v4313_v62  ;;  %v4315_v45 = vadd.f32 %v4314_v60, %v4122_v40  ;;  %v4124_v38 = vadd.f32 %v4123_v53, %v7154_v48 }
 0x225   : > { %v4516_v21 = vsel %vm4387_vm10, %v4309_v41, %v4452_v59  ;;  %v4125_v0 = vpop.f32.mrf.mxu1 }
 0x226   : > { %4580 = vst [vmem:[%s6886_s20 + $0x1b8] sm:$0xff] %v4516_v21  ;;  %v4517_v19 = vsel %vm4388_vm11, %v4313_v62, %v4453_v22  ;;  %vm4389_vm12 = vcmp.gt.f32.partialorder %v4315_v45, 0.0  ;;  %v4454_v1 = vmul.f32 %v6879_v32, %v4315_v45  ;;  %v4317_v20 = vadd.f32 %v4316_v54, %v4124_v38  ;;  %v4322_v26 = vpop.f32.mrf.mxu0 }
 0x227   : > { %4581 = vst [vmem:[%s6886_s20 + $0x1c0] sm:$0xff] %v4517_v19  ;;  %v4126_v24 = vadd.f32 %v4125_v0, %v7155_v47 }
 0x228   : > { %v4518_v34 = vsel %vm4389_vm12, %v4315_v45, %v4454_v1  ;;  %vm4390_vm13 = vcmp.gt.f32.partialorder %v4317_v20, 0.0  ;;  %v4455_v56 = vmul.f32 %v6879_v32, %v4317_v20  ;;  %v4324_v51 = vpop.f32.mrf.mxu0 }
 0x229   : > { %4583 = vst [vmem:[%s6886_s20 + $0x1d0] sm:$0xff] %v4518_v34  ;;  %v4319_v2 = vadd.f32 %v4318_v8, %v4126_v24 }
 0x22a   : > { %v4519_v4 = vsel %vm4390_vm13, %v4317_v20, %v4455_v56  ;;  %v4326_v13 = vpop.f32.mrf.mxu0 }
 0x22b   : > { %4582 = vst [vmem:[%s6886_s20 + $0x1c8] sm:$0xff] %v4519_v4  ;;  %vm4391_vm14 = vcmp.gt.f32.partialorder %v4319_v2, 0.0  ;;  %v4456_v6 = vmul.f32 %v6879_v32, %v4319_v2 }
 0x22c   : > { %v4129_v33 = vpop.f32.mrf.mxu1  ;;  %v4328_v43 = vpop.f32.mrf.mxu0 }
 0x22d   : > { %v4130_v52 = vadd.f32 %v4129_v33, %v7156_v39  ;;  %v4520_v29 = vsel %vm4391_vm14, %v4319_v2, %v4456_v6 }
 0x22e   : > { %v4131_v57 = vpop.f32.mrf.mxu1  ;;  %4584 = vst [vmem:[%s6886_s20 + $0x1d8] sm:$0xff] %v4520_v29 }
 0x22f   : > { %v4323_v11 = vadd.f32 %v4322_v26, %v4130_v52  ;;  %v4132_v12 = vadd.f32 %v4131_v57, %v7157_v27 }
 0x230   : > { %v4133_v55 = vpop.f32.mrf.mxu1 }
 0x231   : > { %vm4392_vm15 = vcmp.gt.f32.partialorder %v4323_v11, 0.0  ;;  %v4457_v42 = vmul.f32 %v6879_v32, %v4323_v11  ;;  %v4325_v58 = vadd.f32 %v4324_v51, %v4132_v12  ;;  %v4134_v44 = vadd.f32 %v4133_v55, %v7158_v9 }
 0x232   : > { %v4135_v49 = vpop.f32.mrf.mxu1 }
 0x233   : > { %v4521_v31 = vsel %vm4392_vm15, %v4323_v11, %v4457_v42  ;;  %vm4393_vm0 = vcmp.gt.f32.partialorder %v4325_v58, 0.0  ;;  %v4458_v3 = vmul.f32 %v6879_v32, %v4325_v58  ;;  %v4327_v18 = vadd.f32 %v4326_v13, %v4134_v44 }
 0x234   : > { %4585 = vst [vmem:[%s6886_s20 + $0x1e0] sm:$0xff] %v4521_v31  ;;  %v4136_v46 = vadd.f32 %v4135_v49, %v7159_v16 }
 0x235   : > { %v4522_v25 = vsel %vm4393_vm0, %v4325_v58, %v4458_v3  ;;  %vm4394_vm1 = vcmp.gt.f32.partialorder %v4327_v18, 0.0  ;;  %v4459_v17 = vmul.f32 %v6879_v32, %v4327_v18 }
 0x236   : > { %4587 = vst [vmem:[%s6886_s20 + $0x1f0] sm:$0xff] %v4522_v25  ;;  %v4329_v15 = vadd.f32 %v4328_v43, %v4136_v46 }
 0x237   : > { %v4523_v28 = vsel %vm4394_vm1, %v4327_v18, %v4459_v17 }
 0x238   : > { %4586 = vst [vmem:[%s6886_s20 + $0x1e8] sm:$0xff] %v4523_v28  ;;  %vm4395_vm2 = vcmp.gt.f32.partialorder %v4329_v15, 0.0  ;;  %v4460_v35 = vmul.f32 %v6879_v32, %v4329_v15 }
 0x23a   : > { %v4524_v50 = vsel %vm4395_vm2, %v4329_v15, %v4460_v35 }
 0x23b   : > { %4588 = vst [vmem:[%s6886_s20 + $0x1f8] sm:$0xff] %v4524_v50 }
 0x23c PF: > { %s15_s19 = sadd.s32 1, %s5689_s19   ;;  %s7160_s17 = smov %s5685_s18 }
 0x23d   : > { %p12_p6 = scmp.ge.s32.totalorder %s15_s19, 4   ;;  %s7161_s18 = smov %s7163_s3 }
 0x23f   :  { %14 = sbr.rel (!%p12_p6) target bundleno = 2 (0x2), region = 69 }

</bundles_post_ra>
